<compile_context>
chip_gen: v7x
topology: tpu7x:2x2x1
jax: 0.10.0
libtpu: 0.0.40
codegen_flags: <defaults>
</compile_context>

<pallas_src>
import random
import numpy as np
import jax
import jax.numpy as jnp
from jax.experimental import pallas as pl
from jax.experimental.pallas import tpu as pltpu


# ------------------------------------------------------------------ fused kernel
def seq2seq_kernel(tf_ref,                                   # scalar-prefetch: teacher-force flags [T] (SMEM)
                   src_ref, trg_ref,                         # [bb,S,Din], [bb,T,Dout]
                   w_e_ref, b_e_ref,                         # encoder LSTM  [Din+H,4H], [1,4H]   (cols i,f,o|g)
                   wa_e_ref, wa_h_ref, v_ref,                # attention     [H,H], [H,H], [1,H]
                   w_g_ref, b_d_ref,                         # decoder LSTM  [Dout+2H,4H], [1,4H] (cols i,f,o|g)
                   w_o_ref, b_o_ref,                         # output linear [2H+Dout,Dout], [1,Dout]
                   out_ref,                                  # [bb, T*Dout]  lane-dense output block
                   enc_sc, encp_sc):                         # VMEM scratches [bb,S,H] x2
    bb, S, Din = src_ref.shape
    _, T, Dout = trg_ref.shape
    H = wa_h_ref.shape[0]

    def mm(a, w):  # activations cast to the weight dtype (bf16 on v6e/v7x), f32 accumulation
        return jnp.dot(a.astype(w.dtype), w, preferred_element_type=jnp.float32)

    # -------- hoisted loop invariants (loaded / broadcast exactly once) --------
    src = src_ref[...]                                        # [bb,S,Din] (tiny)
    trg = trg_ref[...]                                        # [bb,T,Dout]
    w_e, w_g, w_o = w_e_ref[...], w_g_ref[...], w_o_ref[...]
    wa_h, v = wa_h_ref[...], v_ref[...]
    b_e = jnp.broadcast_to(b_e_ref[...], (bb, 4 * H))
    b_d = jnp.broadcast_to(b_d_ref[...], (bb, 4 * H))
    b_o = jnp.broadcast_to(b_o_ref[...], (bb, Dout))

    def gate_act(gates):
        # gate columns are pre-ordered [i, f, o | g]: one wide sigmoid + one tanh.
        s3 = jax.nn.sigmoid(gates[:, :3 * H])
        g_g = jnp.tanh(gates[:, 3 * H:])
        return s3[:, :H], s3[:, H:2 * H], s3[:, 2 * H:3 * H], g_g

    # -------- encoder: LSTM over src, fully unrolled (S is a small constant) --------
    h = jnp.zeros((bb, H), jnp.float32)
    c = jnp.zeros((bb, H), jnp.float32)
    for s in range(S):
        gates = mm(jnp.concatenate([src[:, s, :], h], axis=-1), w_e) + b_e   # [bb,4H]
        i_g, f_g, o_g, g_g = gate_act(gates)
        c = f_g * c + i_g * g_g
        h = o_g * jnp.tanh(c)
        enc_sc[:, s:s + 1, :] = h[:, None, :]                 # encoder_outputs (static slice store)

    # step-invariant attention key projection, one [bb*S,H]@[H,H] matmul, parked in VMEM
    encp_sc[...] = mm(enc_sc[...].reshape(bb * S, H), wa_e_ref[...]).reshape(bb, S, H)

    # -------- decoder: attention + LSTMCell + linear, fully unrolled over T --------
    outs = []
    x = trg[:, 0, :]                                          # input = trg[:, 0, :]
    for t in range(T):
        # additive attention: e = tanh(enc@Wa_e + h@Wa_h); score = e.v ; softmax over S
        hp = mm(h, wa_h)                                      # [bb,H]
        e = jnp.tanh(encp_sc[...] + hp[:, None, :])           # [bb,S,H]
        score = jnp.sum(e * v, axis=-1)                       # [bb,S]  (lane reduce)
        m = jnp.max(score, axis=-1, keepdims=True)
        p = jnp.exp(score - m)
        attn = p * pl.reciprocal(jnp.sum(p, axis=-1, keepdims=True), approx=True)  # [bb,S]
        ctx = jnp.sum(attn[:, :, None] * enc_sc[...], axis=1)  # [bb,H] (sublane reduce)

        # LSTM cell on [input ; context ; h_prev] as ONE fused matmul
        gates = mm(jnp.concatenate([x, ctx, h], axis=-1), w_g) + b_d         # [bb,4H]
        i_g, f_g, o_g, g_g = gate_act(gates)
        c = f_g * c + i_g * g_g
        h = o_g * jnp.tanh(c)

        # output linear on [h ; context ; input] as ONE fused matmul
        out = mm(jnp.concatenate([h, ctx, x], axis=-1), w_o) + b_o           # [bb,Dout]
        outs.append(out)

        # next input: teacher forcing (host-sampled flag) ? trg[:, t, :] : output
        x = jnp.where(tf_ref[t] > 0, trg[:, t, :], out)

    # single lane-dense store of the whole [bb, T*Dout] result
    out_ref[...] = jnp.concatenate(outs, axis=-1)


# ------------------------------------------------------------------ wrapper
def seq2seq_forward(src, trg, enc_params, dec_params, tf_flags,
                    *, matmul_dtype=jnp.float32, batch_block=None):
    """src: [B,S,Din], trg: [B,T,Dout] (batch-first, like PyTorch). Returns [B,T,Dout].

    matmul_dtype=jnp.bfloat16 is the recommended setting on v6e/v7x at realistic sizes
    (weights cast here, activations cast in-kernel, accumulation stays f32).
    batch_block lets realistic batches be split across a parallel grid axis (v7x 2 TCs);
    it must be B or a multiple of 8.
    """
    w_ih_e, w_hh_e, b_e = enc_params
    wa_e, wa_h, v, wx, wc, wh, b_d, fo_h, fo_c, fo_x, fo_b = dec_params

    B, S, Din = src.shape
    _, T, Dout = trg.shape
    H = w_hh_e.shape[0]
    bb = B if batch_block is None else batch_block
    assert B % bb == 0 and (bb == B or bb % 8 == 0)
    nb = B // bb

    def reorder(m):  # LSTM gate columns i,f,g,o -> i,f,o,g (wide sigmoid + single tanh)
        return jnp.concatenate([m[:, :2 * H], m[:, 3 * H:4 * H], m[:, 2 * H:3 * H]], axis=1)

    # Pre-concatenate + reorder weights so each step is one fused matmul per gate group.
    w_e = reorder(jnp.concatenate([w_ih_e, w_hh_e], axis=0)).astype(matmul_dtype)   # [Din+H,4H]
    w_g = reorder(jnp.concatenate([wx, wc, wh], axis=0)).astype(matmul_dtype)       # [Dout+2H,4H]
    w_o = jnp.concatenate([fo_h, fo_c, fo_x], axis=0).astype(matmul_dtype)          # [2H+Dout,Dout]
    b_e_r = reorder(b_e).astype(jnp.float32)
    b_d_r = reorder(b_d).astype(jnp.float32)
    wa_e_c = wa_e.astype(matmul_dtype)
    wa_h_c = wa_h.astype(matmul_dtype)
    v_row = jnp.reshape(v, (1, H)).astype(jnp.float32)

    def bspec(shape, batch_sliced):
        n = len(shape)
        if batch_sliced:
            return pl.BlockSpec(shape, lambda b, tf, n=n: (b,) + (0,) * (n - 1))
        return pl.BlockSpec(shape, lambda b, tf, n=n: (0,) * n)

    grid_spec = pltpu.PrefetchScalarGridSpec(
        num_scalar_prefetch=1,
        grid=(nb,),                                           # batch-parallel axis (1 block here)
        in_specs=[
            bspec((bb, S, Din), True),                        # src
            bspec((bb, T, Dout), True),                       # trg
            bspec((Din + H, 4 * H), False), bspec((1, 4 * H), False),       # encoder fused W, bias
            bspec((H, H), False), bspec((H, H), False), bspec((1, H), False),  # Wa_e, Wa_h, v
            bspec((Dout + 2 * H, 4 * H), False), bspec((1, 4 * H), False),  # decoder fused W, bias
            bspec((2 * H + Dout, Dout), False), bspec((1, Dout), False),    # output fused W, bias
        ],
        out_specs=pl.BlockSpec((bb, T * Dout), lambda b, tf: (b, 0)),       # lane-dense output
        scratch_shapes=[pltpu.VMEM((bb, S, H), jnp.float32),   # encoder_outputs  [B,S,H]
                        pltpu.VMEM((bb, S, H), jnp.float32)],  # enc @ Wa_e       [B,S,H]
    )
    out_flat = pl.pallas_call(
        seq2seq_kernel,
        out_shape=jax.ShapeDtypeStruct((B, T * Dout), jnp.float32),
        grid_spec=grid_spec,
        compiler_params=pltpu.CompilerParams(dimension_semantics=("parallel",)),
    )(tf_flags, src, trg, w_e, b_e_r, wa_e_c, wa_h_c, v_row, w_g, b_d_r, w_o, fo_b)
    return out_flat.reshape(B, T, Dout)


# ------------------------------------------------------------------ pure-JAX reference
def reference(src, trg, enc_params, dec_params, tf_flags):
    w_ih_e, w_hh_e, b_e = enc_params
    wa_e, wa_h, v, wx, wc, wh, b_d, fo_h, fo_c, fo_x, fo_b = dec_params
    B, S, _ = src.shape
    T = trg.shape[1]
    H = w_hh_e.shape[0]

    h = jnp.zeros((B, H), jnp.float32)
    c = jnp.zeros((B, H), jnp.float32)
    enc = []
    for s in range(S):
        gates = src[:, s, :] @ w_ih_e + h @ w_hh_e + b_e
        i, f = jax.nn.sigmoid(gates[:, :H]), jax.nn.sigmoid(gates[:, H:2 * H])
        g, o = jnp.tanh(gates[:, 2 * H:3 * H]), jax.nn.sigmoid(gates[:, 3 * H:])
        c = f * c + i * g
        h = o * jnp.tanh(c)
        enc.append(h)
    enc = jnp.stack(enc, axis=1)                              # [B,S,H]

    inp = trg[:, 0, :]
    outs = []
    for t in range(T):
        e = jnp.tanh(jnp.einsum('bsh,hk->bsk', enc, wa_e) + (h @ wa_h)[:, None, :])
        score = jnp.einsum('bsh,hk->bsk', e, v)[..., 0]       # [B,S]
        p = jnp.exp(score - jnp.max(score, axis=-1, keepdims=True))
        attn = p / jnp.sum(p, axis=-1, keepdims=True)
        ctx = jnp.einsum('bs,bsh->bh', attn, enc)
        gates = inp @ wx + ctx @ wc + h @ wh + b_d
        i, f = jax.nn.sigmoid(gates[:, :H]), jax.nn.sigmoid(gates[:, H:2 * H])
        g, o = jnp.tanh(gates[:, 2 * H:3 * H]), jax.nn.sigmoid(gates[:, 3 * H:])
        c = f * c + i * g
        h = o * jnp.tanh(c)
        out = h @ fo_h + ctx @ fo_c + inp @ fo_x + fo_b
        outs.append(out)
        inp = jnp.where(tf_flags[t] > 0, trg[:, t, :], out)
    return jnp.stack(outs, axis=1)                            # [B,T,Dout]


# ------------------------------------------------------------------ main
if __name__ == "__main__":
    B, S, T, Din, Dout, H = 2, 8, 8, 16, 16, 32

    key = jax.random.PRNGKey(0)
    ks = jax.random.split(key, 16)
    scale = 1.0 / np.sqrt(H)
    u = lambda k, shp: jax.random.uniform(k, shp, jnp.float32, -scale, scale)

    # encoder params
    w_ih_e = u(ks[0], (Din, 4 * H))
    w_hh_e = u(ks[1], (H, 4 * H))
    b_e = u(ks[2], (1, 4 * H))
    enc_params = (w_ih_e, w_hh_e, b_e)

    # decoder params (attention + LSTMCell + output linear)
    wa_e = u(ks[3], (H, H))
    wa_h = u(ks[4], (H, H))
    v = u(ks[5], (H, 1))
    wx = u(ks[6], (Dout, 4 * H))
    wc = u(ks[7], (H, 4 * H))
    wh = u(ks[8], (H, 4 * H))
    b_d = u(ks[9], (1, 4 * H))
    fo_h = u(ks[10], (H, Dout))
    fo_c = u(ks[11], (H, Dout))
    fo_x = u(ks[12], (Dout, Dout))
    fo_b = u(ks[13], (1, Dout))
    dec_params = (wa_e, wa_h, v, wx, wc, wh, b_d, fo_h, fo_c, fo_x, fo_b)

    # inputs (PyTorch batch-first)
    src = jax.random.normal(ks[14], (B, S, Din), jnp.float32)
    trg = jax.random.normal(ks[15], (B, T, Dout), jnp.float32)

    # teacher-forcing decisions, deterministic (mirrors `random.random() < ratio`)
    # TODO(synk): the original draws fresh randomness every forward call; here flags are
    #             host-sampled once with seed 0 and passed via scalar prefetch.
    random.seed(0)
    teacher_forcing_ratio = 0.5
    tf_flags = jnp.array(
        [1 if random.random() < teacher_forcing_ratio else 0 for _ in range(T)],
        dtype=jnp.int32)

    # f32 matmuls for the exactness check; pass matmul_dtype=jnp.bfloat16 on v6e/v7x.
    outputs = seq2seq_forward(src, trg, enc_params, dec_params, tf_flags)  # [B,T,Dout]
    jax.block_until_ready(outputs)

    ref = reference(src, trg, enc_params, dec_params, tf_flags)
    np.testing.assert_allclose(np.asarray(outputs), np.asarray(ref),
                               rtol=2e-2, atol=2e-3)
    print("KERNEL_OK")
</pallas_src>

<mosaic_0001>
module attributes {stable_mosaic.version = 11 : i64} {
  func.func @seq2seq_kernel(%arg0: i32, %arg1: memref<8xi32, #tpu.memory_space<smem>>, %arg2: memref<2x8x16xf32, #tpu.memory_space<vmem>>, %arg3: memref<2x8x16xf32, #tpu.memory_space<vmem>>, %arg4: memref<48x128xf32, #tpu.memory_space<vmem>>, %arg5: memref<1x128xf32, #tpu.memory_space<vmem>>, %arg6: memref<32x32xf32, #tpu.memory_space<vmem>>, %arg7: memref<32x32xf32, #tpu.memory_space<vmem>>, %arg8: memref<1x32xf32, #tpu.memory_space<vmem>>, %arg9: memref<80x128xf32, #tpu.memory_space<vmem>>, %arg10: memref<1x128xf32, #tpu.memory_space<vmem>>, %arg11: memref<80x16xf32, #tpu.memory_space<vmem>>, %arg12: memref<1x16xf32, #tpu.memory_space<vmem>>, %arg13: memref<2x128xf32, #tpu.memory_space<vmem>>, %arg14: memref<2x8x32xf32, #tpu.memory_space<vmem>>, %arg15: memref<2x8x32xf32, #tpu.memory_space<vmem>>) attributes {dimension_semantics = [#tpu.dimension_semantics<parallel>], iteration_bounds = array<i64: 1>, scalar_prefetch = 1 : i64, scratch_operands = 2 : i64, tpu.core_type = #tpu.core_type<tc>, window_params = [{transform_indices = @transform_0, window_bounds = array<i64: 2, 8, 16>}, {transform_indices = @transform_1, window_bounds = array<i64: 2, 8, 16>}, {pipeline_mode = #tpu.pipeline_mode<synchronous>, transform_indices = @transform_2, window_bounds = array<i64: 48, 128>}, {pipeline_mode = #tpu.pipeline_mode<synchronous>, transform_indices = @transform_3, window_bounds = array<i64: 1, 128>}, {pipeline_mode = #tpu.pipeline_mode<synchronous>, transform_indices = @transform_4, window_bounds = array<i64: 32, 32>}, {pipeline_mode = #tpu.pipeline_mode<synchronous>, transform_indices = @transform_5, window_bounds = array<i64: 32, 32>}, {pipeline_mode = #tpu.pipeline_mode<synchronous>, transform_indices = @transform_6, window_bounds = array<i64: 1, 32>}, {pipeline_mode = #tpu.pipeline_mode<synchronous>, transform_indices = @transform_7, window_bounds = array<i64: 80, 128>}, {pipeline_mode = #tpu.pipeline_mode<synchronous>, transform_indices = @transform_8, window_bounds = array<i64: 1, 128>}, {pipeline_mode = #tpu.pipeline_mode<synchronous>, transform_indices = @transform_9, window_bounds = array<i64: 80, 16>}, {pipeline_mode = #tpu.pipeline_mode<synchronous>, transform_indices = @transform_10, window_bounds = array<i64: 1, 16>}, {transform_indices = @transform_11, window_bounds = array<i64: 2, 128>}]} {
    %c0 = arith.constant 0 : index
    %c0_0 = arith.constant 0 : index
    %c0_1 = arith.constant 0 : index
    %0 = vector.load %arg2[%c0, %c0_0, %c0_1] : memref<2x8x16xf32, #tpu.memory_space<vmem>>, vector<2x8x16xf32>
    %c0_2 = arith.constant 0 : index
    %c0_3 = arith.constant 0 : index
    %c0_4 = arith.constant 0 : index
    %1 = vector.load %arg3[%c0_2, %c0_3, %c0_4] : memref<2x8x16xf32, #tpu.memory_space<vmem>>, vector<2x8x16xf32>
    %c0_5 = arith.constant 0 : index
    %c0_6 = arith.constant 0 : index
    %2 = vector.load %arg4[%c0_5, %c0_6] : memref<48x128xf32, #tpu.memory_space<vmem>>, vector<48x128xf32>
    %c0_7 = arith.constant 0 : index
    %c0_8 = arith.constant 0 : index
    %3 = vector.load %arg9[%c0_7, %c0_8] : memref<80x128xf32, #tpu.memory_space<vmem>>, vector<80x128xf32>
    %c0_9 = arith.constant 0 : index
    %c0_10 = arith.constant 0 : index
    %4 = vector.load %arg11[%c0_9, %c0_10] : memref<80x16xf32, #tpu.memory_space<vmem>>, vector<80x16xf32>
    %c0_11 = arith.constant 0 : index
    %c0_12 = arith.constant 0 : index
    %5 = vector.load %arg7[%c0_11, %c0_12] : memref<32x32xf32, #tpu.memory_space<vmem>>, vector<32x32xf32>
    %c0_13 = arith.constant 0 : index
    %c0_14 = arith.constant 0 : index
    %6 = vector.load %arg8[%c0_13, %c0_14] : memref<1x32xf32, #tpu.memory_space<vmem>>, vector<1x32xf32>
    %c0_15 = arith.constant 0 : index
    %c0_16 = arith.constant 0 : index
    %7 = vector.load %arg5[%c0_15, %c0_16] : memref<1x128xf32, #tpu.memory_space<vmem>>, vector<1x128xf32>
    %8 = vector.shape_cast %7 : vector<1x128xf32> to vector<1x128xf32>
    %9 = vector.broadcast %8 : vector<1x128xf32> to vector<2x128xf32>
    %c0_17 = arith.constant 0 : index
    %c0_18 = arith.constant 0 : index
    %10 = vector.load %arg10[%c0_17, %c0_18] : memref<1x128xf32, #tpu.memory_space<vmem>>, vector<1x128xf32>
    %11 = vector.shape_cast %10 : vector<1x128xf32> to vector<1x128xf32>
    %12 = vector.broadcast %11 : vector<1x128xf32> to vector<2x128xf32>
    %c0_19 = arith.constant 0 : index
    %c0_20 = arith.constant 0 : index
    %13 = vector.load %arg12[%c0_19, %c0_20] : memref<1x16xf32, #tpu.memory_space<vmem>>, vector<1x16xf32>
    %14 = vector.shape_cast %13 : vector<1x16xf32> to vector<1x16xf32>
    %15 = vector.broadcast %14 : vector<1x16xf32> to vector<2x16xf32>
    %cst = arith.constant 0.000000e+00 : f32
    %16 = vector.broadcast %cst : f32 to vector<2x32xf32>
    %cst_21 = arith.constant 0.000000e+00 : f32
    %17 = vector.broadcast %cst_21 : f32 to vector<2x32xf32>
    %18 = vector.extract_strided_slice %0 {offsets = [0, 0, 0], sizes = [2, 1, 16], strides = [1, 1, 1]} : vector<2x8x16xf32> to vector<2x1x16xf32>
    %19 = vector.shape_cast %18 : vector<2x1x16xf32> to vector<2x16xf32>
    %20 = tpu.concatenate %19, %16 in 1 : vector<2x16xf32>, vector<2x32xf32> -> vector<2x48xf32>
    %cst_22 = arith.constant dense<0.000000e+00> : vector<2x128xf32>
    %21 = tpu.matmul %20, %2, %cst_22 {dimension_numbers = #tpu.dot_dimension_numbers<[1], [0], [0], [1], [0, 0, 1, 1], [], []>} : vector<2x48xf32>, vector<48x128xf32>, vector<2x128xf32> -> vector<2x128xf32>
    %22 = arith.addf %21, %9 : vector<2x128xf32>
    %23 = vector.extract_strided_slice %22 {offsets = [0, 0], sizes = [2, 96], strides = [1, 1]} : vector<2x128xf32> to vector<2x96xf32>
    %24 = arith.negf %23 : vector<2x96xf32>
    %25 = math.exp %24 : vector<2x96xf32>
    %cst_23 = arith.constant 1.000000e+00 : f32
    %26 = vector.broadcast %cst_23 : f32 to vector<2x96xf32>
    %27 = arith.addf %26, %25 : vector<2x96xf32>
    %28 = arith.divf %26, %27 : vector<2x96xf32>
    %29 = vector.extract_strided_slice %22 {offsets = [0, 96], sizes = [2, 32], strides = [1, 1]} : vector<2x128xf32> to vector<2x32xf32>
    %30 = math.tanh %29 : vector<2x32xf32>
    %31 = vector.extract_strided_slice %28 {offsets = [0, 0], sizes = [2, 32], strides = [1, 1]} : vector<2x96xf32> to vector<2x32xf32>
    %32 = vector.extract_strided_slice %28 {offsets = [0, 32], sizes = [2, 32], strides = [1, 1]} : vector<2x96xf32> to vector<2x32xf32>
    %33 = vector.extract_strided_slice %28 {offsets = [0, 64], sizes = [2, 32], strides = [1, 1]} : vector<2x96xf32> to vector<2x32xf32>
    %34 = arith.mulf %32, %17 : vector<2x32xf32>
    %35 = arith.mulf %31, %30 : vector<2x32xf32>
    %36 = arith.addf %34, %35 : vector<2x32xf32>
    %37 = math.tanh %36 : vector<2x32xf32>
    %38 = arith.mulf %33, %37 : vector<2x32xf32>
    %39 = vector.shape_cast %38 : vector<2x32xf32> to vector<2x1x32xf32>
    %c0_24 = arith.constant 0 : index
    %c0_25 = arith.constant 0 : index
    %c0_26 = arith.constant 0 : index
    %40 = vector.load %arg14[%c0_24, %c0_25, %c0_26] : memref<2x8x32xf32, #tpu.memory_space<vmem>>, vector<2x1x32xf32>
    tpu.vector_store %arg14[%c0_24, %c0_25, %c0_26], %39 {strides = array<i32>} : memref<2x8x32xf32, #tpu.memory_space<vmem>>, vector<2x1x32xf32>,
    %41 = vector.extract_strided_slice %0 {offsets = [0, 1, 0], sizes = [2, 1, 16], strides = [1, 1, 1]} : vector<2x8x16xf32> to vector<2x1x16xf32>
    %42 = vector.shape_cast %41 : vector<2x1x16xf32> to vector<2x16xf32>
    %43 = tpu.concatenate %42, %38 in 1 : vector<2x16xf32>, vector<2x32xf32> -> vector<2x48xf32>
    %cst_27 = arith.constant dense<0.000000e+00> : vector<2x128xf32>
    %44 = tpu.matmul %43, %2, %cst_27 {dimension_numbers = #tpu.dot_dimension_numbers<[1], [0], [0], [1], [0, 0, 1, 1], [], []>} : vector<2x48xf32>, vector<48x128xf32>, vector<2x128xf32> -> vector<2x128xf32>
    %45 = arith.addf %44, %9 : vector<2x128xf32>
    %46 = vector.extract_strided_slice %45 {offsets = [0, 0], sizes = [2, 96], strides = [1, 1]} : vector<2x128xf32> to vector<2x96xf32>
    %47 = arith.negf %46 : vector<2x96xf32>
    %48 = math.exp %47 : vector<2x96xf32>
    %cst_28 = arith.constant 1.000000e+00 : f32
    %49 = vector.broadcast %cst_28 : f32 to vector<2x96xf32>
    %50 = arith.addf %49, %48 : vector<2x96xf32>
    %51 = arith.divf %49, %50 : vector<2x96xf32>
    %52 = vector.extract_strided_slice %45 {offsets = [0, 96], sizes = [2, 32], strides = [1, 1]} : vector<2x128xf32> to vector<2x32xf32>
    %53 = math.tanh %52 : vector<2x32xf32>
    %54 = vector.extract_strided_slice %51 {offsets = [0, 0], sizes = [2, 32], strides = [1, 1]} : vector<2x96xf32> to vector<2x32xf32>
    %55 = vector.extract_strided_slice %51 {offsets = [0, 32], sizes = [2, 32], strides = [1, 1]} : vector<2x96xf32> to vector<2x32xf32>
    %56 = vector.extract_strided_slice %51 {offsets = [0, 64], sizes = [2, 32], strides = [1, 1]} : vector<2x96xf32> to vector<2x32xf32>
    %57 = arith.mulf %55, %36 : vector<2x32xf32>
    %58 = arith.mulf %54, %53 : vector<2x32xf32>
    %59 = arith.addf %57, %58 : vector<2x32xf32>
    %60 = math.tanh %59 : vector<2x32xf32>
    %61 = arith.mulf %56, %60 : vector<2x32xf32>
    %62 = vector.shape_cast %61 : vector<2x32xf32> to vector<2x1x32xf32>
    %c0_29 = arith.constant 0 : index
    %c1 = arith.constant 1 : index
    %c0_30 = arith.constant 0 : index
    %63 = vector.load %arg14[%c0_29, %c1, %c0_30] : memref<2x8x32xf32, #tpu.memory_space<vmem>>, vector<2x1x32xf32>
    tpu.vector_store %arg14[%c0_29, %c1, %c0_30], %62 {strides = array<i32>} : memref<2x8x32xf32, #tpu.memory_space<vmem>>, vector<2x1x32xf32>,
    %64 = vector.extract_strided_slice %0 {offsets = [0, 2, 0], sizes = [2, 1, 16], strides = [1, 1, 1]} : vector<2x8x16xf32> to vector<2x1x16xf32>
    %65 = vector.shape_cast %64 : vector<2x1x16xf32> to vector<2x16xf32>
    %66 = tpu.concatenate %65, %61 in 1 : vector<2x16xf32>, vector<2x32xf32> -> vector<2x48xf32>
    %cst_31 = arith.constant dense<0.000000e+00> : vector<2x128xf32>
    %67 = tpu.matmul %66, %2, %cst_31 {dimension_numbers = #tpu.dot_dimension_numbers<[1], [0], [0], [1], [0, 0, 1, 1], [], []>} : vector<2x48xf32>, vector<48x128xf32>, vector<2x128xf32> -> vector<2x128xf32>
    %68 = arith.addf %67, %9 : vector<2x128xf32>
    %69 = vector.extract_strided_slice %68 {offsets = [0, 0], sizes = [2, 96], strides = [1, 1]} : vector<2x128xf32> to vector<2x96xf32>
    %70 = arith.negf %69 : vector<2x96xf32>
    %71 = math.exp %70 : vector<2x96xf32>
    %cst_32 = arith.constant 1.000000e+00 : f32
    %72 = vector.broadcast %cst_32 : f32 to vector<2x96xf32>
    %73 = arith.addf %72, %71 : vector<2x96xf32>
    %74 = arith.divf %72, %73 : vector<2x96xf32>
    %75 = vector.extract_strided_slice %68 {offsets = [0, 96], sizes = [2, 32], strides = [1, 1]} : vector<2x128xf32> to vector<2x32xf32>
    %76 = math.tanh %75 : vector<2x32xf32>
    %77 = vector.extract_strided_slice %74 {offsets = [0, 0], sizes = [2, 32], strides = [1, 1]} : vector<2x96xf32> to vector<2x32xf32>
    %78 = vector.extract_strided_slice %74 {offsets = [0, 32], sizes = [2, 32], strides = [1, 1]} : vector<2x96xf32> to vector<2x32xf32>
    %79 = vector.extract_strided_slice %74 {offsets = [0, 64], sizes = [2, 32], strides = [1, 1]} : vector<2x96xf32> to vector<2x32xf32>
    %80 = arith.mulf %78, %59 : vector<2x32xf32>
    %81 = arith.mulf %77, %76 : vector<2x32xf32>
    %82 = arith.addf %80, %81 : vector<2x32xf32>
    %83 = math.tanh %82 : vector<2x32xf32>
    %84 = arith.mulf %79, %83 : vector<2x32xf32>
    %85 = vector.shape_cast %84 : vector<2x32xf32> to vector<2x1x32xf32>
    %c0_33 = arith.constant 0 : index
    %c2 = arith.constant 2 : index
    %c0_34 = arith.constant 0 : index
    %86 = vector.load %arg14[%c0_33, %c2, %c0_34] : memref<2x8x32xf32, #tpu.memory_space<vmem>>, vector<2x1x32xf32>
    tpu.vector_store %arg14[%c0_33, %c2, %c0_34], %85 {strides = array<i32>} : memref<2x8x32xf32, #tpu.memory_space<vmem>>, vector<2x1x32xf32>,
    %87 = vector.extract_strided_slice %0 {offsets = [0, 3, 0], sizes = [2, 1, 16], strides = [1, 1, 1]} : vector<2x8x16xf32> to vector<2x1x16xf32>
    %88 = vector.shape_cast %87 : vector<2x1x16xf32> to vector<2x16xf32>
    %89 = tpu.concatenate %88, %84 in 1 : vector<2x16xf32>, vector<2x32xf32> -> vector<2x48xf32>
    %cst_35 = arith.constant dense<0.000000e+00> : vector<2x128xf32>
    %90 = tpu.matmul %89, %2, %cst_35 {dimension_numbers = #tpu.dot_dimension_numbers<[1], [0], [0], [1], [0, 0, 1, 1], [], []>} : vector<2x48xf32>, vector<48x128xf32>, vector<2x128xf32> -> vector<2x128xf32>
    %91 = arith.addf %90, %9 : vector<2x128xf32>
    %92 = vector.extract_strided_slice %91 {offsets = [0, 0], sizes = [2, 96], strides = [1, 1]} : vector<2x128xf32> to vector<2x96xf32>
    %93 = arith.negf %92 : vector<2x96xf32>
    %94 = math.exp %93 : vector<2x96xf32>
    %cst_36 = arith.constant 1.000000e+00 : f32
    %95 = vector.broadcast %cst_36 : f32 to vector<2x96xf32>
    %96 = arith.addf %95, %94 : vector<2x96xf32>
    %97 = arith.divf %95, %96 : vector<2x96xf32>
    %98 = vector.extract_strided_slice %91 {offsets = [0, 96], sizes = [2, 32], strides = [1, 1]} : vector<2x128xf32> to vector<2x32xf32>
    %99 = math.tanh %98 : vector<2x32xf32>
    %100 = vector.extract_strided_slice %97 {offsets = [0, 0], sizes = [2, 32], strides = [1, 1]} : vector<2x96xf32> to vector<2x32xf32>
    %101 = vector.extract_strided_slice %97 {offsets = [0, 32], sizes = [2, 32], strides = [1, 1]} : vector<2x96xf32> to vector<2x32xf32>
    %102 = vector.extract_strided_slice %97 {offsets = [0, 64], sizes = [2, 32], strides = [1, 1]} : vector<2x96xf32> to vector<2x32xf32>
    %103 = arith.mulf %101, %82 : vector<2x32xf32>
    %104 = arith.mulf %100, %99 : vector<2x32xf32>
    %105 = arith.addf %103, %104 : vector<2x32xf32>
    %106 = math.tanh %105 : vector<2x32xf32>
    %107 = arith.mulf %102, %106 : vector<2x32xf32>
    %108 = vector.shape_cast %107 : vector<2x32xf32> to vector<2x1x32xf32>
    %c0_37 = arith.constant 0 : index
    %c3 = arith.constant 3 : index
    %c0_38 = arith.constant 0 : index
    %109 = vector.load %arg14[%c0_37, %c3, %c0_38] : memref<2x8x32xf32, #tpu.memory_space<vmem>>, vector<2x1x32xf32>
    tpu.vector_store %arg14[%c0_37, %c3, %c0_38], %108 {strides = array<i32>} : memref<2x8x32xf32, #tpu.memory_space<vmem>>, vector<2x1x32xf32>,
    %110 = vector.extract_strided_slice %0 {offsets = [0, 4, 0], sizes = [2, 1, 16], strides = [1, 1, 1]} : vector<2x8x16xf32> to vector<2x1x16xf32>
    %111 = vector.shape_cast %110 : vector<2x1x16xf32> to vector<2x16xf32>
    %112 = tpu.concatenate %111, %107 in 1 : vector<2x16xf32>, vector<2x32xf32> -> vector<2x48xf32>
    %cst_39 = arith.constant dense<0.000000e+00> : vector<2x128xf32>
    %113 = tpu.matmul %112, %2, %cst_39 {dimension_numbers = #tpu.dot_dimension_numbers<[1], [0], [0], [1], [0, 0, 1, 1], [], []>} : vector<2x48xf32>, vector<48x128xf32>, vector<2x128xf32> -> vector<2x128xf32>
    %114 = arith.addf %113, %9 : vector<2x128xf32>
    %115 = vector.extract_strided_slice %114 {offsets = [0, 0], sizes = [2, 96], strides = [1, 1]} : vector<2x128xf32> to vector<2x96xf32>
    %116 = arith.negf %115 : vector<2x96xf32>
    %117 = math.exp %116 : vector<2x96xf32>
    %cst_40 = arith.constant 1.000000e+00 : f32
    %118 = vector.broadcast %cst_40 : f32 to vector<2x96xf32>
    %119 = arith.addf %118, %117 : vector<2x96xf32>
    %120 = arith.divf %118, %119 : vector<2x96xf32>
    %121 = vector.extract_strided_slice %114 {offsets = [0, 96], sizes = [2, 32], strides = [1, 1]} : vector<2x128xf32> to vector<2x32xf32>
    %122 = math.tanh %121 : vector<2x32xf32>
    %123 = vector.extract_strided_slice %120 {offsets = [0, 0], sizes = [2, 32], strides = [1, 1]} : vector<2x96xf32> to vector<2x32xf32>
    %124 = vector.extract_strided_slice %120 {offsets = [0, 32], sizes = [2, 32], strides = [1, 1]} : vector<2x96xf32> to vector<2x32xf32>
    %125 = vector.extract_strided_slice %120 {offsets = [0, 64], sizes = [2, 32], strides = [1, 1]} : vector<2x96xf32> to vector<2x32xf32>
    %126 = arith.mulf %124, %105 : vector<2x32xf32>
    %127 = arith.mulf %123, %122 : vector<2x32xf32>
    %128 = arith.addf %126, %127 : vector<2x32xf32>
    %129 = math.tanh %128 : vector<2x32xf32>
    %130 = arith.mulf %125, %129 : vector<2x32xf32>
    %131 = vector.shape_cast %130 : vector<2x32xf32> to vector<2x1x32xf32>
    %c0_41 = arith.constant 0 : index
    %c4 = arith.constant 4 : index
    %c0_42 = arith.constant 0 : index
    %132 = vector.load %arg14[%c0_41, %c4, %c0_42] : memref<2x8x32xf32, #tpu.memory_space<vmem>>, vector<2x1x32xf32>
    tpu.vector_store %arg14[%c0_41, %c4, %c0_42], %131 {strides = array<i32>} : memref<2x8x32xf32, #tpu.memory_space<vmem>>, vector<2x1x32xf32>,
    %133 = vector.extract_strided_slice %0 {offsets = [0, 5, 0], sizes = [2, 1, 16], strides = [1, 1, 1]} : vector<2x8x16xf32> to vector<2x1x16xf32>
    %134 = vector.shape_cast %133 : vector<2x1x16xf32> to vector<2x16xf32>
    %135 = tpu.concatenate %134, %130 in 1 : vector<2x16xf32>, vector<2x32xf32> -> vector<2x48xf32>
    %cst_43 = arith.constant dense<0.000000e+00> : vector<2x128xf32>
    %136 = tpu.matmul %135, %2, %cst_43 {dimension_numbers = #tpu.dot_dimension_numbers<[1], [0], [0], [1], [0, 0, 1, 1], [], []>} : vector<2x48xf32>, vector<48x128xf32>, vector<2x128xf32> -> vector<2x128xf32>
    %137 = arith.addf %136, %9 : vector<2x128xf32>
    %138 = vector.extract_strided_slice %137 {offsets = [0, 0], sizes = [2, 96], strides = [1, 1]} : vector<2x128xf32> to vector<2x96xf32>
    %139 = arith.negf %138 : vector<2x96xf32>
    %140 = math.exp %139 : vector<2x96xf32>
    %cst_44 = arith.constant 1.000000e+00 : f32
    %141 = vector.broadcast %cst_44 : f32 to vector<2x96xf32>
    %142 = arith.addf %141, %140 : vector<2x96xf32>
    %143 = arith.divf %141, %142 : vector<2x96xf32>
    %144 = vector.extract_strided_slice %137 {offsets = [0, 96], sizes = [2, 32], strides = [1, 1]} : vector<2x128xf32> to vector<2x32xf32>
    %145 = math.tanh %144 : vector<2x32xf32>
    %146 = vector.extract_strided_slice %143 {offsets = [0, 0], sizes = [2, 32], strides = [1, 1]} : vector<2x96xf32> to vector<2x32xf32>
    %147 = vector.extract_strided_slice %143 {offsets = [0, 32], sizes = [2, 32], strides = [1, 1]} : vector<2x96xf32> to vector<2x32xf32>
    %148 = vector.extract_strided_slice %143 {offsets = [0, 64], sizes = [2, 32], strides = [1, 1]} : vector<2x96xf32> to vector<2x32xf32>
    %149 = arith.mulf %147, %128 : vector<2x32xf32>
    %150 = arith.mulf %146, %145 : vector<2x32xf32>
    %151 = arith.addf %149, %150 : vector<2x32xf32>
    %152 = math.tanh %151 : vector<2x32xf32>
    %153 = arith.mulf %148, %152 : vector<2x32xf32>
    %154 = vector.shape_cast %153 : vector<2x32xf32> to vector<2x1x32xf32>
    %c0_45 = arith.constant 0 : index
    %c5 = arith.constant 5 : index
    %c0_46 = arith.constant 0 : index
    %155 = vector.load %arg14[%c0_45, %c5, %c0_46] : memref<2x8x32xf32, #tpu.memory_space<vmem>>, vector<2x1x32xf32>
    tpu.vector_store %arg14[%c0_45, %c5, %c0_46], %154 {strides = array<i32>} : memref<2x8x32xf32, #tpu.memory_space<vmem>>, vector<2x1x32xf32>,
    %156 = vector.extract_strided_slice %0 {offsets = [0, 6, 0], sizes = [2, 1, 16], strides = [1, 1, 1]} : vector<2x8x16xf32> to vector<2x1x16xf32>
    %157 = vector.shape_cast %156 : vector<2x1x16xf32> to vector<2x16xf32>
    %158 = tpu.concatenate %157, %153 in 1 : vector<2x16xf32>, vector<2x32xf32> -> vector<2x48xf32>
    %cst_47 = arith.constant dense<0.000000e+00> : vector<2x128xf32>
    %159 = tpu.matmul %158, %2, %cst_47 {dimension_numbers = #tpu.dot_dimension_numbers<[1], [0], [0], [1], [0, 0, 1, 1], [], []>} : vector<2x48xf32>, vector<48x128xf32>, vector<2x128xf32> -> vector<2x128xf32>
    %160 = arith.addf %159, %9 : vector<2x128xf32>
    %161 = vector.extract_strided_slice %160 {offsets = [0, 0], sizes = [2, 96], strides = [1, 1]} : vector<2x128xf32> to vector<2x96xf32>
    %162 = arith.negf %161 : vector<2x96xf32>
    %163 = math.exp %162 : vector<2x96xf32>
    %cst_48 = arith.constant 1.000000e+00 : f32
    %164 = vector.broadcast %cst_48 : f32 to vector<2x96xf32>
    %165 = arith.addf %164, %163 : vector<2x96xf32>
    %166 = arith.divf %164, %165 : vector<2x96xf32>
    %167 = vector.extract_strided_slice %160 {offsets = [0, 96], sizes = [2, 32], strides = [1, 1]} : vector<2x128xf32> to vector<2x32xf32>
    %168 = math.tanh %167 : vector<2x32xf32>
    %169 = vector.extract_strided_slice %166 {offsets = [0, 0], sizes = [2, 32], strides = [1, 1]} : vector<2x96xf32> to vector<2x32xf32>
    %170 = vector.extract_strided_slice %166 {offsets = [0, 32], sizes = [2, 32], strides = [1, 1]} : vector<2x96xf32> to vector<2x32xf32>
    %171 = vector.extract_strided_slice %166 {offsets = [0, 64], sizes = [2, 32], strides = [1, 1]} : vector<2x96xf32> to vector<2x32xf32>
    %172 = arith.mulf %170, %151 : vector<2x32xf32>
    %173 = arith.mulf %169, %168 : vector<2x32xf32>
    %174 = arith.addf %172, %173 : vector<2x32xf32>
    %175 = math.tanh %174 : vector<2x32xf32>
    %176 = arith.mulf %171, %175 : vector<2x32xf32>
    %177 = vector.shape_cast %176 : vector<2x32xf32> to vector<2x1x32xf32>
    %c0_49 = arith.constant 0 : index
    %c6 = arith.constant 6 : index
    %c0_50 = arith.constant 0 : index
    %178 = vector.load %arg14[%c0_49, %c6, %c0_50] : memref<2x8x32xf32, #tpu.memory_space<vmem>>, vector<2x1x32xf32>
    tpu.vector_store %arg14[%c0_49, %c6, %c0_50], %177 {strides = array<i32>} : memref<2x8x32xf32, #tpu.memory_space<vmem>>, vector<2x1x32xf32>,
    %179 = vector.extract_strided_slice %0 {offsets = [0, 7, 0], sizes = [2, 1, 16], strides = [1, 1, 1]} : vector<2x8x16xf32> to vector<2x1x16xf32>
    %180 = vector.shape_cast %179 : vector<2x1x16xf32> to vector<2x16xf32>
    %181 = tpu.concatenate %180, %176 in 1 : vector<2x16xf32>, vector<2x32xf32> -> vector<2x48xf32>
    %cst_51 = arith.constant dense<0.000000e+00> : vector<2x128xf32>
    %182 = tpu.matmul %181, %2, %cst_51 {dimension_numbers = #tpu.dot_dimension_numbers<[1], [0], [0], [1], [0, 0, 1, 1], [], []>} : vector<2x48xf32>, vector<48x128xf32>, vector<2x128xf32> -> vector<2x128xf32>
    %183 = arith.addf %182, %9 : vector<2x128xf32>
    %184 = vector.extract_strided_slice %183 {offsets = [0, 0], sizes = [2, 96], strides = [1, 1]} : vector<2x128xf32> to vector<2x96xf32>
    %185 = arith.negf %184 : vector<2x96xf32>
    %186 = math.exp %185 : vector<2x96xf32>
    %cst_52 = arith.constant 1.000000e+00 : f32
    %187 = vector.broadcast %cst_52 : f32 to vector<2x96xf32>
    %188 = arith.addf %187, %186 : vector<2x96xf32>
    %189 = arith.divf %187, %188 : vector<2x96xf32>
    %190 = vector.extract_strided_slice %183 {offsets = [0, 96], sizes = [2, 32], strides = [1, 1]} : vector<2x128xf32> to vector<2x32xf32>
    %191 = math.tanh %190 : vector<2x32xf32>
    %192 = vector.extract_strided_slice %189 {offsets = [0, 0], sizes = [2, 32], strides = [1, 1]} : vector<2x96xf32> to vector<2x32xf32>
    %193 = vector.extract_strided_slice %189 {offsets = [0, 32], sizes = [2, 32], strides = [1, 1]} : vector<2x96xf32> to vector<2x32xf32>
    %194 = vector.extract_strided_slice %189 {offsets = [0, 64], sizes = [2, 32], strides = [1, 1]} : vector<2x96xf32> to vector<2x32xf32>
    %195 = arith.mulf %193, %174 : vector<2x32xf32>
    %196 = arith.mulf %192, %191 : vector<2x32xf32>
    %197 = arith.addf %195, %196 : vector<2x32xf32>
    %198 = math.tanh %197 : vector<2x32xf32>
    %199 = arith.mulf %194, %198 : vector<2x32xf32>
    %200 = vector.shape_cast %199 : vector<2x32xf32> to vector<2x1x32xf32>
    %c0_53 = arith.constant 0 : index
    %c7 = arith.constant 7 : index
    %c0_54 = arith.constant 0 : index
    %201 = vector.load %arg14[%c0_53, %c7, %c0_54] : memref<2x8x32xf32, #tpu.memory_space<vmem>>, vector<2x1x32xf32>
    tpu.vector_store %arg14[%c0_53, %c7, %c0_54], %200 {strides = array<i32>} : memref<2x8x32xf32, #tpu.memory_space<vmem>>, vector<2x1x32xf32>,
    %c0_55 = arith.constant 0 : index
    %c0_56 = arith.constant 0 : index
    %c0_57 = arith.constant 0 : index
    %202 = vector.load %arg14[%c0_55, %c0_56, %c0_57] : memref<2x8x32xf32, #tpu.memory_space<vmem>>, vector<2x8x32xf32>
    %203 = vector.shape_cast %202 : vector<2x8x32xf32> to vector<16x32xf32>
    %c0_58 = arith.constant 0 : index
    %c0_59 = arith.constant 0 : index
    %204 = vector.load %arg6[%c0_58, %c0_59] : memref<32x32xf32, #tpu.memory_space<vmem>>, vector<32x32xf32>
    %cst_60 = arith.constant dense<0.000000e+00> : vector<16x32xf32>
    %205 = tpu.matmul %203, %204, %cst_60 {dimension_numbers = #tpu.dot_dimension_numbers<[1], [0], [0], [1], [0, 0, 1, 1], [], []>} : vector<16x32xf32>, vector<32x32xf32>, vector<16x32xf32> -> vector<16x32xf32>
    %206 = vector.shape_cast %205 : vector<16x32xf32> to vector<2x8x32xf32>
    %c0_61 = arith.constant 0 : index
    %c0_62 = arith.constant 0 : index
    %c0_63 = arith.constant 0 : index
    %207 = vector.load %arg15[%c0_61, %c0_62, %c0_63] : memref<2x8x32xf32, #tpu.memory_space<vmem>>, vector<2x8x32xf32>
    tpu.vector_store %arg15[%c0_61, %c0_62, %c0_63], %206 {strides = array<i32>} : memref<2x8x32xf32, #tpu.memory_space<vmem>>, vector<2x8x32xf32>,
    %208 = vector.extract_strided_slice %1 {offsets = [0, 0, 0], sizes = [2, 1, 16], strides = [1, 1, 1]} : vector<2x8x16xf32> to vector<2x1x16xf32>
    %209 = vector.shape_cast %208 : vector<2x1x16xf32> to vector<2x16xf32>
    %cst_64 = arith.constant dense<0.000000e+00> : vector<2x32xf32>
    %210 = tpu.matmul %199, %5, %cst_64 {dimension_numbers = #tpu.dot_dimension_numbers<[1], [0], [0], [1], [0, 0, 1, 1], [], []>} : vector<2x32xf32>, vector<32x32xf32>, vector<2x32xf32> -> vector<2x32xf32>
    %c0_65 = arith.constant 0 : index
    %c0_66 = arith.constant 0 : index
    %c0_67 = arith.constant 0 : index
    %211 = vector.load %arg15[%c0_65, %c0_66, %c0_67] : memref<2x8x32xf32, #tpu.memory_space<vmem>>, vector<2x8x32xf32>
    %212 = vector.shape_cast %210 : vector<2x32xf32> to vector<2x1x32xf32>
    %213 = vector.broadcast %212 : vector<2x1x32xf32> to vector<2x8x32xf32>
    %214 = arith.addf %211, %213 : vector<2x8x32xf32>
    %215 = math.tanh %214 : vector<2x8x32xf32>
    %216 = vector.shape_cast %6 : vector<1x32xf32> to vector<1x1x32xf32>
    %217 = vector.broadcast %216 : vector<1x1x32xf32> to vector<2x8x32xf32>
    %218 = arith.mulf %215, %217 : vector<2x8x32xf32>
    %cst_68 = arith.constant dense<0.000000e+00> : vector<2x8xf32>
    %219 = vector.multi_reduction <add>, %218, %cst_68 [2] : vector<2x8x32xf32> to vector<2x8xf32>
    %cst_69 = arith.constant dense<0xFF800000> : vector<2xf32>
    %220 = vector.multi_reduction <maximumf>, %219, %cst_69 [1] : vector<2x8xf32> to vector<2xf32>
    %221 = vector.shape_cast %220 : vector<2xf32> to vector<2x1xf32>
    %222 = vector.broadcast %221 : vector<2x1xf32> to vector<2x8xf32>
    %223 = arith.subf %219, %222 : vector<2x8xf32>
    %224 = math.exp %223 : vector<2x8xf32>
    %cst_70 = arith.constant dense<0.000000e+00> : vector<2xf32>
    %225 = vector.multi_reduction <add>, %224, %cst_70 [1] : vector<2x8xf32> to vector<2xf32>
    %226 = vector.shape_cast %225 : vector<2xf32> to vector<2x1xf32>
    %227 = tpu.reciprocal %226 {approx = true} : vector<2x1xf32> -> vector<2x1xf32>
    %228 = vector.broadcast %227 : vector<2x1xf32> to vector<2x8xf32>
    %229 = arith.mulf %224, %228 : vector<2x8xf32>
    %230 = vector.shape_cast %229 : vector<2x8xf32> to vector<2x8x1xf32>
    %c0_71 = arith.constant 0 : index
    %c0_72 = arith.constant 0 : index
    %c0_73 = arith.constant 0 : index
    %231 = vector.load %arg14[%c0_71, %c0_72, %c0_73] : memref<2x8x32xf32, #tpu.memory_space<vmem>>, vector<2x8x32xf32>
    %232 = vector.broadcast %230 : vector<2x8x1xf32> to vector<2x8x32xf32>
    %233 = arith.mulf %232, %231 : vector<2x8x32xf32>
    %cst_74 = arith.constant dense<0.000000e+00> : vector<2x32xf32>
    %234 = vector.multi_reduction <add>, %233, %cst_74 [1] : vector<2x8x32xf32> to vector<2x32xf32>
    %235 = tpu.concatenate %209, %234, %199 in 1 : vector<2x16xf32>, vector<2x32xf32>, vector<2x32xf32> -> vector<2x80xf32>
    %cst_75 = arith.constant dense<0.000000e+00> : vector<2x128xf32>
    %236 = tpu.matmul %235, %3, %cst_75 {dimension_numbers = #tpu.dot_dimension_numbers<[1], [0], [0], [1], [0, 0, 1, 1], [], []>} : vector<2x80xf32>, vector<80x128xf32>, vector<2x128xf32> -> vector<2x128xf32>
    %237 = arith.addf %236, %12 : vector<2x128xf32>
    %238 = vector.extract_strided_slice %237 {offsets = [0, 0], sizes = [2, 96], strides = [1, 1]} : vector<2x128xf32> to vector<2x96xf32>
    %239 = arith.negf %238 : vector<2x96xf32>
    %240 = math.exp %239 : vector<2x96xf32>
    %cst_76 = arith.constant 1.000000e+00 : f32
    %241 = vector.broadcast %cst_76 : f32 to vector<2x96xf32>
    %242 = arith.addf %241, %240 : vector<2x96xf32>
    %243 = arith.divf %241, %242 : vector<2x96xf32>
    %244 = vector.extract_strided_slice %237 {offsets = [0, 96], sizes = [2, 32], strides = [1, 1]} : vector<2x128xf32> to vector<2x32xf32>
    %245 = math.tanh %244 : vector<2x32xf32>
    %246 = vector.extract_strided_slice %243 {offsets = [0, 0], sizes = [2, 32], strides = [1, 1]} : vector<2x96xf32> to vector<2x32xf32>
    %247 = vector.extract_strided_slice %243 {offsets = [0, 32], sizes = [2, 32], strides = [1, 1]} : vector<2x96xf32> to vector<2x32xf32>
    %248 = vector.extract_strided_slice %243 {offsets = [0, 64], sizes = [2, 32], strides = [1, 1]} : vector<2x96xf32> to vector<2x32xf32>
    %249 = arith.mulf %247, %197 : vector<2x32xf32>
    %250 = arith.mulf %246, %245 : vector<2x32xf32>
    %251 = arith.addf %249, %250 : vector<2x32xf32>
    %252 = math.tanh %251 : vector<2x32xf32>
    %253 = arith.mulf %248, %252 : vector<2x32xf32>
    %254 = tpu.concatenate %253, %234, %209 in 1 : vector<2x32xf32>, vector<2x32xf32>, vector<2x16xf32> -> vector<2x80xf32>
    %cst_77 = arith.constant dense<0.000000e+00> : vector<2x16xf32>
    %255 = tpu.matmul %254, %4, %cst_77 {dimension_numbers = #tpu.dot_dimension_numbers<[1], [0], [0], [1], [0, 0, 1, 1], [], []>} : vector<2x80xf32>, vector<80x16xf32>, vector<2x16xf32> -> vector<2x16xf32>
    %256 = arith.addf %255, %15 : vector<2x16xf32>
    %c0_78 = arith.constant 0 : index
    %257 = memref.load %arg1[%c0_78] : memref<8xi32, #tpu.memory_space<smem>>
    %c0_i32 = arith.constant 0 : i32
    %258 = arith.cmpi sgt, %257, %c0_i32 : i32
    %259 = vector.extract_strided_slice %1 {offsets = [0, 0, 0], sizes = [2, 1, 16], strides = [1, 1, 1]} : vector<2x8x16xf32> to vector<2x1x16xf32>
    %260 = vector.shape_cast %259 : vector<2x1x16xf32> to vector<2x16xf32>
    %261 = arith.select %258, %260, %256 : vector<2x16xf32>
    %cst_79 = arith.constant dense<0.000000e+00> : vector<2x32xf32>
    %262 = tpu.matmul %253, %5, %cst_79 {dimension_numbers = #tpu.dot_dimension_numbers<[1], [0], [0], [1], [0, 0, 1, 1], [], []>} : vector<2x32xf32>, vector<32x32xf32>, vector<2x32xf32> -> vector<2x32xf32>
    %c0_80 = arith.constant 0 : index
    %c0_81 = arith.constant 0 : index
    %c0_82 = arith.constant 0 : index
    %263 = vector.load %arg15[%c0_80, %c0_81, %c0_82] : memref<2x8x32xf32, #tpu.memory_space<vmem>>, vector<2x8x32xf32>
    %264 = vector.shape_cast %262 : vector<2x32xf32> to vector<2x1x32xf32>
    %265 = vector.broadcast %264 : vector<2x1x32xf32> to vector<2x8x32xf32>
    %266 = arith.addf %263, %265 : vector<2x8x32xf32>
    %267 = math.tanh %266 : vector<2x8x32xf32>
    %268 = vector.shape_cast %6 : vector<1x32xf32> to vector<1x1x32xf32>
    %269 = vector.broadcast %268 : vector<1x1x32xf32> to vector<2x8x32xf32>
    %270 = arith.mulf %267, %269 : vector<2x8x32xf32>
    %cst_83 = arith.constant dense<0.000000e+00> : vector<2x8xf32>
    %271 = vector.multi_reduction <add>, %270, %cst_83 [2] : vector<2x8x32xf32> to vector<2x8xf32>
    %cst_84 = arith.constant dense<0xFF800000> : vector<2xf32>
    %272 = vector.multi_reduction <maximumf>, %271, %cst_84 [1] : vector<2x8xf32> to vector<2xf32>
    %273 = vector.shape_cast %272 : vector<2xf32> to vector<2x1xf32>
    %274 = vector.broadcast %273 : vector<2x1xf32> to vector<2x8xf32>
    %275 = arith.subf %271, %274 : vector<2x8xf32>
    %276 = math.exp %275 : vector<2x8xf32>
    %cst_85 = arith.constant dense<0.000000e+00> : vector<2xf32>
    %277 = vector.multi_reduction <add>, %276, %cst_85 [1] : vector<2x8xf32> to vector<2xf32>
    %278 = vector.shape_cast %277 : vector<2xf32> to vector<2x1xf32>
    %279 = tpu.reciprocal %278 {approx = true} : vector<2x1xf32> -> vector<2x1xf32>
    %280 = vector.broadcast %279 : vector<2x1xf32> to vector<2x8xf32>
    %281 = arith.mulf %276, %280 : vector<2x8xf32>
    %282 = vector.shape_cast %281 : vector<2x8xf32> to vector<2x8x1xf32>
    %c0_86 = arith.constant 0 : index
    %c0_87 = arith.constant 0 : index
    %c0_88 = arith.constant 0 : index
    %283 = vector.load %arg14[%c0_86, %c0_87, %c0_88] : memref<2x8x32xf32, #tpu.memory_space<vmem>>, vector<2x8x32xf32>
    %284 = vector.broadcast %282 : vector<2x8x1xf32> to vector<2x8x32xf32>
    %285 = arith.mulf %284, %283 : vector<2x8x32xf32>
    %cst_89 = arith.constant dense<0.000000e+00> : vector<2x32xf32>
    %286 = vector.multi_reduction <add>, %285, %cst_89 [1] : vector<2x8x32xf32> to vector<2x32xf32>
    %287 = tpu.concatenate %261, %286, %253 in 1 : vector<2x16xf32>, vector<2x32xf32>, vector<2x32xf32> -> vector<2x80xf32>
    %cst_90 = arith.constant dense<0.000000e+00> : vector<2x128xf32>
    %288 = tpu.matmul %287, %3, %cst_90 {dimension_numbers = #tpu.dot_dimension_numbers<[1], [0], [0], [1], [0, 0, 1, 1], [], []>} : vector<2x80xf32>, vector<80x128xf32>, vector<2x128xf32> -> vector<2x128xf32>
    %289 = arith.addf %288, %12 : vector<2x128xf32>
    %290 = vector.extract_strided_slice %289 {offsets = [0, 0], sizes = [2, 96], strides = [1, 1]} : vector<2x128xf32> to vector<2x96xf32>
    %291 = arith.negf %290 : vector<2x96xf32>
    %292 = math.exp %291 : vector<2x96xf32>
    %cst_91 = arith.constant 1.000000e+00 : f32
    %293 = vector.broadcast %cst_91 : f32 to vector<2x96xf32>
    %294 = arith.addf %293, %292 : vector<2x96xf32>
    %295 = arith.divf %293, %294 : vector<2x96xf32>
    %296 = vector.extract_strided_slice %289 {offsets = [0, 96], sizes = [2, 32], strides = [1, 1]} : vector<2x128xf32> to vector<2x32xf32>
    %297 = math.tanh %296 : vector<2x32xf32>
    %298 = vector.extract_strided_slice %295 {offsets = [0, 0], sizes = [2, 32], strides = [1, 1]} : vector<2x96xf32> to vector<2x32xf32>
    %299 = vector.extract_strided_slice %295 {offsets = [0, 32], sizes = [2, 32], strides = [1, 1]} : vector<2x96xf32> to vector<2x32xf32>
    %300 = vector.extract_strided_slice %295 {offsets = [0, 64], sizes = [2, 32], strides = [1, 1]} : vector<2x96xf32> to vector<2x32xf32>
    %301 = arith.mulf %299, %251 : vector<2x32xf32>
    %302 = arith.mulf %298, %297 : vector<2x32xf32>
    %303 = arith.addf %301, %302 : vector<2x32xf32>
    %304 = math.tanh %303 : vector<2x32xf32>
    %305 = arith.mulf %300, %304 : vector<2x32xf32>
    %306 = tpu.concatenate %305, %286, %261 in 1 : vector<2x32xf32>, vector<2x32xf32>, vector<2x16xf32> -> vector<2x80xf32>
    %cst_92 = arith.constant dense<0.000000e+00> : vector<2x16xf32>
    %307 = tpu.matmul %306, %4, %cst_92 {dimension_numbers = #tpu.dot_dimension_numbers<[1], [0], [0], [1], [0, 0, 1, 1], [], []>} : vector<2x80xf32>, vector<80x16xf32>, vector<2x16xf32> -> vector<2x16xf32>
    %308 = arith.addf %307, %15 : vector<2x16xf32>
    %c1_93 = arith.constant 1 : index
    %309 = memref.load %arg1[%c1_93] : memref<8xi32, #tpu.memory_space<smem>>
    %c0_i32_94 = arith.constant 0 : i32
    %310 = arith.cmpi sgt, %309, %c0_i32_94 : i32
    %311 = vector.extract_strided_slice %1 {offsets = [0, 1, 0], sizes = [2, 1, 16], strides = [1, 1, 1]} : vector<2x8x16xf32> to vector<2x1x16xf32>
    %312 = vector.shape_cast %311 : vector<2x1x16xf32> to vector<2x16xf32>
    %313 = arith.select %310, %312, %308 : vector<2x16xf32>
    %cst_95 = arith.constant dense<0.000000e+00> : vector<2x32xf32>
    %314 = tpu.matmul %305, %5, %cst_95 {dimension_numbers = #tpu.dot_dimension_numbers<[1], [0], [0], [1], [0, 0, 1, 1], [], []>} : vector<2x32xf32>, vector<32x32xf32>, vector<2x32xf32> -> vector<2x32xf32>
    %c0_96 = arith.constant 0 : index
    %c0_97 = arith.constant 0 : index
    %c0_98 = arith.constant 0 : index
    %315 = vector.load %arg15[%c0_96, %c0_97, %c0_98] : memref<2x8x32xf32, #tpu.memory_space<vmem>>, vector<2x8x32xf32>
    %316 = vector.shape_cast %314 : vector<2x32xf32> to vector<2x1x32xf32>
    %317 = vector.broadcast %316 : vector<2x1x32xf32> to vector<2x8x32xf32>
    %318 = arith.addf %315, %317 : vector<2x8x32xf32>
    %319 = math.tanh %318 : vector<2x8x32xf32>
    %320 = vector.shape_cast %6 : vector<1x32xf32> to vector<1x1x32xf32>
    %321 = vector.broadcast %320 : vector<1x1x32xf32> to vector<2x8x32xf32>
    %322 = arith.mulf %319, %321 : vector<2x8x32xf32>
    %cst_99 = arith.constant dense<0.000000e+00> : vector<2x8xf32>
    %323 = vector.multi_reduction <add>, %322, %cst_99 [2] : vector<2x8x32xf32> to vector<2x8xf32>
    %cst_100 = arith.constant dense<0xFF800000> : vector<2xf32>
    %324 = vector.multi_reduction <maximumf>, %323, %cst_100 [1] : vector<2x8xf32> to vector<2xf32>
    %325 = vector.shape_cast %324 : vector<2xf32> to vector<2x1xf32>
    %326 = vector.broadcast %325 : vector<2x1xf32> to vector<2x8xf32>
    %327 = arith.subf %323, %326 : vector<2x8xf32>
    %328 = math.exp %327 : vector<2x8xf32>
    %cst_101 = arith.constant dense<0.000000e+00> : vector<2xf32>
    %329 = vector.multi_reduction <add>, %328, %cst_101 [1] : vector<2x8xf32> to vector<2xf32>
    %330 = vector.shape_cast %329 : vector<2xf32> to vector<2x1xf32>
    %331 = tpu.reciprocal %330 {approx = true} : vector<2x1xf32> -> vector<2x1xf32>
    %332 = vector.broadcast %331 : vector<2x1xf32> to vector<2x8xf32>
    %333 = arith.mulf %328, %332 : vector<2x8xf32>
    %334 = vector.shape_cast %333 : vector<2x8xf32> to vector<2x8x1xf32>
    %c0_102 = arith.constant 0 : index
    %c0_103 = arith.constant 0 : index
    %c0_104 = arith.constant 0 : index
    %335 = vector.load %arg14[%c0_102, %c0_103, %c0_104] : memref<2x8x32xf32, #tpu.memory_space<vmem>>, vector<2x8x32xf32>
    %336 = vector.broadcast %334 : vector<2x8x1xf32> to vector<2x8x32xf32>
    %337 = arith.mulf %336, %335 : vector<2x8x32xf32>
    %cst_105 = arith.constant dense<0.000000e+00> : vector<2x32xf32>
    %338 = vector.multi_reduction <add>, %337, %cst_105 [1] : vector<2x8x32xf32> to vector<2x32xf32>
    %339 = tpu.concatenate %313, %338, %305 in 1 : vector<2x16xf32>, vector<2x32xf32>, vector<2x32xf32> -> vector<2x80xf32>
    %cst_106 = arith.constant dense<0.000000e+00> : vector<2x128xf32>
    %340 = tpu.matmul %339, %3, %cst_106 {dimension_numbers = #tpu.dot_dimension_numbers<[1], [0], [0], [1], [0, 0, 1, 1], [], []>} : vector<2x80xf32>, vector<80x128xf32>, vector<2x128xf32> -> vector<2x128xf32>
    %341 = arith.addf %340, %12 : vector<2x128xf32>
    %342 = vector.extract_strided_slice %341 {offsets = [0, 0], sizes = [2, 96], strides = [1, 1]} : vector<2x128xf32> to vector<2x96xf32>
    %343 = arith.negf %342 : vector<2x96xf32>
    %344 = math.exp %343 : vector<2x96xf32>
    %cst_107 = arith.constant 1.000000e+00 : f32
    %345 = vector.broadcast %cst_107 : f32 to vector<2x96xf32>
    %346 = arith.addf %345, %344 : vector<2x96xf32>
    %347 = arith.divf %345, %346 : vector<2x96xf32>
    %348 = vector.extract_strided_slice %341 {offsets = [0, 96], sizes = [2, 32], strides = [1, 1]} : vector<2x128xf32> to vector<2x32xf32>
    %349 = math.tanh %348 : vector<2x32xf32>
    %350 = vector.extract_strided_slice %347 {offsets = [0, 0], sizes = [2, 32], strides = [1, 1]} : vector<2x96xf32> to vector<2x32xf32>
    %351 = vector.extract_strided_slice %347 {offsets = [0, 32], sizes = [2, 32], strides = [1, 1]} : vector<2x96xf32> to vector<2x32xf32>
    %352 = vector.extract_strided_slice %347 {offsets = [0, 64], sizes = [2, 32], strides = [1, 1]} : vector<2x96xf32> to vector<2x32xf32>
    %353 = arith.mulf %351, %303 : vector<2x32xf32>
    %354 = arith.mulf %350, %349 : vector<2x32xf32>
    %355 = arith.addf %353, %354 : vector<2x32xf32>
    %356 = math.tanh %355 : vector<2x32xf32>
    %357 = arith.mulf %352, %356 : vector<2x32xf32>
    %358 = tpu.concatenate %357, %338, %313 in 1 : vector<2x32xf32>, vector<2x32xf32>, vector<2x16xf32> -> vector<2x80xf32>
    %cst_108 = arith.constant dense<0.000000e+00> : vector<2x16xf32>
    %359 = tpu.matmul %358, %4, %cst_108 {dimension_numbers = #tpu.dot_dimension_numbers<[1], [0], [0], [1], [0, 0, 1, 1], [], []>} : vector<2x80xf32>, vector<80x16xf32>, vector<2x16xf32> -> vector<2x16xf32>
    %360 = arith.addf %359, %15 : vector<2x16xf32>
    %c2_109 = arith.constant 2 : index
    %361 = memref.load %arg1[%c2_109] : memref<8xi32, #tpu.memory_space<smem>>
    %c0_i32_110 = arith.constant 0 : i32
    %362 = arith.cmpi sgt, %361, %c0_i32_110 : i32
    %363 = vector.extract_strided_slice %1 {offsets = [0, 2, 0], sizes = [2, 1, 16], strides = [1, 1, 1]} : vector<2x8x16xf32> to vector<2x1x16xf32>
    %364 = vector.shape_cast %363 : vector<2x1x16xf32> to vector<2x16xf32>
    %365 = arith.select %362, %364, %360 : vector<2x16xf32>
    %cst_111 = arith.constant dense<0.000000e+00> : vector<2x32xf32>
    %366 = tpu.matmul %357, %5, %cst_111 {dimension_numbers = #tpu.dot_dimension_numbers<[1], [0], [0], [1], [0, 0, 1, 1], [], []>} : vector<2x32xf32>, vector<32x32xf32>, vector<2x32xf32> -> vector<2x32xf32>
    %c0_112 = arith.constant 0 : index
    %c0_113 = arith.constant 0 : index
    %c0_114 = arith.constant 0 : index
    %367 = vector.load %arg15[%c0_112, %c0_113, %c0_114] : memref<2x8x32xf32, #tpu.memory_space<vmem>>, vector<2x8x32xf32>
    %368 = vector.shape_cast %366 : vector<2x32xf32> to vector<2x1x32xf32>
    %369 = vector.broadcast %368 : vector<2x1x32xf32> to vector<2x8x32xf32>
    %370 = arith.addf %367, %369 : vector<2x8x32xf32>
    %371 = math.tanh %370 : vector<2x8x32xf32>
    %372 = vector.shape_cast %6 : vector<1x32xf32> to vector<1x1x32xf32>
    %373 = vector.broadcast %372 : vector<1x1x32xf32> to vector<2x8x32xf32>
    %374 = arith.mulf %371, %373 : vector<2x8x32xf32>
    %cst_115 = arith.constant dense<0.000000e+00> : vector<2x8xf32>
    %375 = vector.multi_reduction <add>, %374, %cst_115 [2] : vector<2x8x32xf32> to vector<2x8xf32>
    %cst_116 = arith.constant dense<0xFF800000> : vector<2xf32>
    %376 = vector.multi_reduction <maximumf>, %375, %cst_116 [1] : vector<2x8xf32> to vector<2xf32>
    %377 = vector.shape_cast %376 : vector<2xf32> to vector<2x1xf32>
    %378 = vector.broadcast %377 : vector<2x1xf32> to vector<2x8xf32>
    %379 = arith.subf %375, %378 : vector<2x8xf32>
    %380 = math.exp %379 : vector<2x8xf32>
    %cst_117 = arith.constant dense<0.000000e+00> : vector<2xf32>
    %381 = vector.multi_reduction <add>, %380, %cst_117 [1] : vector<2x8xf32> to vector<2xf32>
    %382 = vector.shape_cast %381 : vector<2xf32> to vector<2x1xf32>
    %383 = tpu.reciprocal %382 {approx = true} : vector<2x1xf32> -> vector<2x1xf32>
    %384 = vector.broadcast %383 : vector<2x1xf32> to vector<2x8xf32>
    %385 = arith.mulf %380, %384 : vector<2x8xf32>
    %386 = vector.shape_cast %385 : vector<2x8xf32> to vector<2x8x1xf32>
    %c0_118 = arith.constant 0 : index
    %c0_119 = arith.constant 0 : index
    %c0_120 = arith.constant 0 : index
    %387 = vector.load %arg14[%c0_118, %c0_119, %c0_120] : memref<2x8x32xf32, #tpu.memory_space<vmem>>, vector<2x8x32xf32>
    %388 = vector.broadcast %386 : vector<2x8x1xf32> to vector<2x8x32xf32>
    %389 = arith.mulf %388, %387 : vector<2x8x32xf32>
    %cst_121 = arith.constant dense<0.000000e+00> : vector<2x32xf32>
    %390 = vector.multi_reduction <add>, %389, %cst_121 [1] : vector<2x8x32xf32> to vector<2x32xf32>
    %391 = tpu.concatenate %365, %390, %357 in 1 : vector<2x16xf32>, vector<2x32xf32>, vector<2x32xf32> -> vector<2x80xf32>
    %cst_122 = arith.constant dense<0.000000e+00> : vector<2x128xf32>
    %392 = tpu.matmul %391, %3, %cst_122 {dimension_numbers = #tpu.dot_dimension_numbers<[1], [0], [0], [1], [0, 0, 1, 1], [], []>} : vector<2x80xf32>, vector<80x128xf32>, vector<2x128xf32> -> vector<2x128xf32>
    %393 = arith.addf %392, %12 : vector<2x128xf32>
    %394 = vector.extract_strided_slice %393 {offsets = [0, 0], sizes = [2, 96], strides = [1, 1]} : vector<2x128xf32> to vector<2x96xf32>
    %395 = arith.negf %394 : vector<2x96xf32>
    %396 = math.exp %395 : vector<2x96xf32>
    %cst_123 = arith.constant 1.000000e+00 : f32
    %397 = vector.broadcast %cst_123 : f32 to vector<2x96xf32>
    %398 = arith.addf %397, %396 : vector<2x96xf32>
    %399 = arith.divf %397, %398 : vector<2x96xf32>
    %400 = vector.extract_strided_slice %393 {offsets = [0, 96], sizes = [2, 32], strides = [1, 1]} : vector<2x128xf32> to vector<2x32xf32>
    %401 = math.tanh %400 : vector<2x32xf32>
    %402 = vector.extract_strided_slice %399 {offsets = [0, 0], sizes = [2, 32], strides = [1, 1]} : vector<2x96xf32> to vector<2x32xf32>
    %403 = vector.extract_strided_slice %399 {offsets = [0, 32], sizes = [2, 32], strides = [1, 1]} : vector<2x96xf32> to vector<2x32xf32>
    %404 = vector.extract_strided_slice %399 {offsets = [0, 64], sizes = [2, 32], strides = [1, 1]} : vector<2x96xf32> to vector<2x32xf32>
    %405 = arith.mulf %403, %355 : vector<2x32xf32>
    %406 = arith.mulf %402, %401 : vector<2x32xf32>
    %407 = arith.addf %405, %406 : vector<2x32xf32>
    %408 = math.tanh %407 : vector<2x32xf32>
    %409 = arith.mulf %404, %408 : vector<2x32xf32>
    %410 = tpu.concatenate %409, %390, %365 in 1 : vector<2x32xf32>, vector<2x32xf32>, vector<2x16xf32> -> vector<2x80xf32>
    %cst_124 = arith.constant dense<0.000000e+00> : vector<2x16xf32>
    %411 = tpu.matmul %410, %4, %cst_124 {dimension_numbers = #tpu.dot_dimension_numbers<[1], [0], [0], [1], [0, 0, 1, 1], [], []>} : vector<2x80xf32>, vector<80x16xf32>, vector<2x16xf32> -> vector<2x16xf32>
    %412 = arith.addf %411, %15 : vector<2x16xf32>
    %c3_125 = arith.constant 3 : index
    %413 = memref.load %arg1[%c3_125] : memref<8xi32, #tpu.memory_space<smem>>
    %c0_i32_126 = arith.constant 0 : i32
    %414 = arith.cmpi sgt, %413, %c0_i32_126 : i32
    %415 = vector.extract_strided_slice %1 {offsets = [0, 3, 0], sizes = [2, 1, 16], strides = [1, 1, 1]} : vector<2x8x16xf32> to vector<2x1x16xf32>
    %416 = vector.shape_cast %415 : vector<2x1x16xf32> to vector<2x16xf32>
    %417 = arith.select %414, %416, %412 : vector<2x16xf32>
    %cst_127 = arith.constant dense<0.000000e+00> : vector<2x32xf32>
    %418 = tpu.matmul %409, %5, %cst_127 {dimension_numbers = #tpu.dot_dimension_numbers<[1], [0], [0], [1], [0, 0, 1, 1], [], []>} : vector<2x32xf32>, vector<32x32xf32>, vector<2x32xf32> -> vector<2x32xf32>
    %c0_128 = arith.constant 0 : index
    %c0_129 = arith.constant 0 : index
    %c0_130 = arith.constant 0 : index
    %419 = vector.load %arg15[%c0_128, %c0_129, %c0_130] : memref<2x8x32xf32, #tpu.memory_space<vmem>>, vector<2x8x32xf32>
    %420 = vector.shape_cast %418 : vector<2x32xf32> to vector<2x1x32xf32>
    %421 = vector.broadcast %420 : vector<2x1x32xf32> to vector<2x8x32xf32>
    %422 = arith.addf %419, %421 : vector<2x8x32xf32>
    %423 = math.tanh %422 : vector<2x8x32xf32>
    %424 = vector.shape_cast %6 : vector<1x32xf32> to vector<1x1x32xf32>
    %425 = vector.broadcast %424 : vector<1x1x32xf32> to vector<2x8x32xf32>
    %426 = arith.mulf %423, %425 : vector<2x8x32xf32>
    %cst_131 = arith.constant dense<0.000000e+00> : vector<2x8xf32>
    %427 = vector.multi_reduction <add>, %426, %cst_131 [2] : vector<2x8x32xf32> to vector<2x8xf32>
    %cst_132 = arith.constant dense<0xFF800000> : vector<2xf32>
    %428 = vector.multi_reduction <maximumf>, %427, %cst_132 [1] : vector<2x8xf32> to vector<2xf32>
    %429 = vector.shape_cast %428 : vector<2xf32> to vector<2x1xf32>
    %430 = vector.broadcast %429 : vector<2x1xf32> to vector<2x8xf32>
    %431 = arith.subf %427, %430 : vector<2x8xf32>
    %432 = math.exp %431 : vector<2x8xf32>
    %cst_133 = arith.constant dense<0.000000e+00> : vector<2xf32>
    %433 = vector.multi_reduction <add>, %432, %cst_133 [1] : vector<2x8xf32> to vector<2xf32>
    %434 = vector.shape_cast %433 : vector<2xf32> to vector<2x1xf32>
    %435 = tpu.reciprocal %434 {approx = true} : vector<2x1xf32> -> vector<2x1xf32>
    %436 = vector.broadcast %435 : vector<2x1xf32> to vector<2x8xf32>
    %437 = arith.mulf %432, %436 : vector<2x8xf32>
    %438 = vector.shape_cast %437 : vector<2x8xf32> to vector<2x8x1xf32>
    %c0_134 = arith.constant 0 : index
    %c0_135 = arith.constant 0 : index
    %c0_136 = arith.constant 0 : index
    %439 = vector.load %arg14[%c0_134, %c0_135, %c0_136] : memref<2x8x32xf32, #tpu.memory_space<vmem>>, vector<2x8x32xf32>
    %440 = vector.broadcast %438 : vector<2x8x1xf32> to vector<2x8x32xf32>
    %441 = arith.mulf %440, %439 : vector<2x8x32xf32>
    %cst_137 = arith.constant dense<0.000000e+00> : vector<2x32xf32>
    %442 = vector.multi_reduction <add>, %441, %cst_137 [1] : vector<2x8x32xf32> to vector<2x32xf32>
    %443 = tpu.concatenate %417, %442, %409 in 1 : vector<2x16xf32>, vector<2x32xf32>, vector<2x32xf32> -> vector<2x80xf32>
    %cst_138 = arith.constant dense<0.000000e+00> : vector<2x128xf32>
    %444 = tpu.matmul %443, %3, %cst_138 {dimension_numbers = #tpu.dot_dimension_numbers<[1], [0], [0], [1], [0, 0, 1, 1], [], []>} : vector<2x80xf32>, vector<80x128xf32>, vector<2x128xf32> -> vector<2x128xf32>
    %445 = arith.addf %444, %12 : vector<2x128xf32>
    %446 = vector.extract_strided_slice %445 {offsets = [0, 0], sizes = [2, 96], strides = [1, 1]} : vector<2x128xf32> to vector<2x96xf32>
    %447 = arith.negf %446 : vector<2x96xf32>
    %448 = math.exp %447 : vector<2x96xf32>
    %cst_139 = arith.constant 1.000000e+00 : f32
    %449 = vector.broadcast %cst_139 : f32 to vector<2x96xf32>
    %450 = arith.addf %449, %448 : vector<2x96xf32>
    %451 = arith.divf %449, %450 : vector<2x96xf32>
    %452 = vector.extract_strided_slice %445 {offsets = [0, 96], sizes = [2, 32], strides = [1, 1]} : vector<2x128xf32> to vector<2x32xf32>
    %453 = math.tanh %452 : vector<2x32xf32>
    %454 = vector.extract_strided_slice %451 {offsets = [0, 0], sizes = [2, 32], strides = [1, 1]} : vector<2x96xf32> to vector<2x32xf32>
    %455 = vector.extract_strided_slice %451 {offsets = [0, 32], sizes = [2, 32], strides = [1, 1]} : vector<2x96xf32> to vector<2x32xf32>
    %456 = vector.extract_strided_slice %451 {offsets = [0, 64], sizes = [2, 32], strides = [1, 1]} : vector<2x96xf32> to vector<2x32xf32>
    %457 = arith.mulf %455, %407 : vector<2x32xf32>
    %458 = arith.mulf %454, %453 : vector<2x32xf32>
    %459 = arith.addf %457, %458 : vector<2x32xf32>
    %460 = math.tanh %459 : vector<2x32xf32>
    %461 = arith.mulf %456, %460 : vector<2x32xf32>
    %462 = tpu.concatenate %461, %442, %417 in 1 : vector<2x32xf32>, vector<2x32xf32>, vector<2x16xf32> -> vector<2x80xf32>
    %cst_140 = arith.constant dense<0.000000e+00> : vector<2x16xf32>
    %463 = tpu.matmul %462, %4, %cst_140 {dimension_numbers = #tpu.dot_dimension_numbers<[1], [0], [0], [1], [0, 0, 1, 1], [], []>} : vector<2x80xf32>, vector<80x16xf32>, vector<2x16xf32> -> vector<2x16xf32>
    %464 = arith.addf %463, %15 : vector<2x16xf32>
    %c4_141 = arith.constant 4 : index
    %465 = memref.load %arg1[%c4_141] : memref<8xi32, #tpu.memory_space<smem>>
    %c0_i32_142 = arith.constant 0 : i32
    %466 = arith.cmpi sgt, %465, %c0_i32_142 : i32
    %467 = vector.extract_strided_slice %1 {offsets = [0, 4, 0], sizes = [2, 1, 16], strides = [1, 1, 1]} : vector<2x8x16xf32> to vector<2x1x16xf32>
    %468 = vector.shape_cast %467 : vector<2x1x16xf32> to vector<2x16xf32>
    %469 = arith.select %466, %468, %464 : vector<2x16xf32>
    %cst_143 = arith.constant dense<0.000000e+00> : vector<2x32xf32>
    %470 = tpu.matmul %461, %5, %cst_143 {dimension_numbers = #tpu.dot_dimension_numbers<[1], [0], [0], [1], [0, 0, 1, 1], [], []>} : vector<2x32xf32>, vector<32x32xf32>, vector<2x32xf32> -> vector<2x32xf32>
    %c0_144 = arith.constant 0 : index
    %c0_145 = arith.constant 0 : index
    %c0_146 = arith.constant 0 : index
    %471 = vector.load %arg15[%c0_144, %c0_145, %c0_146] : memref<2x8x32xf32, #tpu.memory_space<vmem>>, vector<2x8x32xf32>
    %472 = vector.shape_cast %470 : vector<2x32xf32> to vector<2x1x32xf32>
    %473 = vector.broadcast %472 : vector<2x1x32xf32> to vector<2x8x32xf32>
    %474 = arith.addf %471, %473 : vector<2x8x32xf32>
    %475 = math.tanh %474 : vector<2x8x32xf32>
    %476 = vector.shape_cast %6 : vector<1x32xf32> to vector<1x1x32xf32>
    %477 = vector.broadcast %476 : vector<1x1x32xf32> to vector<2x8x32xf32>
    %478 = arith.mulf %475, %477 : vector<2x8x32xf32>
    %cst_147 = arith.constant dense<0.000000e+00> : vector<2x8xf32>
    %479 = vector.multi_reduction <add>, %478, %cst_147 [2] : vector<2x8x32xf32> to vector<2x8xf32>
    %cst_148 = arith.constant dense<0xFF800000> : vector<2xf32>
    %480 = vector.multi_reduction <maximumf>, %479, %cst_148 [1] : vector<2x8xf32> to vector<2xf32>
    %481 = vector.shape_cast %480 : vector<2xf32> to vector<2x1xf32>
    %482 = vector.broadcast %481 : vector<2x1xf32> to vector<2x8xf32>
    %483 = arith.subf %479, %482 : vector<2x8xf32>
    %484 = math.exp %483 : vector<2x8xf32>
    %cst_149 = arith.constant dense<0.000000e+00> : vector<2xf32>
    %485 = vector.multi_reduction <add>, %484, %cst_149 [1] : vector<2x8xf32> to vector<2xf32>
    %486 = vector.shape_cast %485 : vector<2xf32> to vector<2x1xf32>
    %487 = tpu.reciprocal %486 {approx = true} : vector<2x1xf32> -> vector<2x1xf32>
    %488 = vector.broadcast %487 : vector<2x1xf32> to vector<2x8xf32>
    %489 = arith.mulf %484, %488 : vector<2x8xf32>
    %490 = vector.shape_cast %489 : vector<2x8xf32> to vector<2x8x1xf32>
    %c0_150 = arith.constant 0 : index
    %c0_151 = arith.constant 0 : index
    %c0_152 = arith.constant 0 : index
    %491 = vector.load %arg14[%c0_150, %c0_151, %c0_152] : memref<2x8x32xf32, #tpu.memory_space<vmem>>, vector<2x8x32xf32>
    %492 = vector.broadcast %490 : vector<2x8x1xf32> to vector<2x8x32xf32>
    %493 = arith.mulf %492, %491 : vector<2x8x32xf32>
    %cst_153 = arith.constant dense<0.000000e+00> : vector<2x32xf32>
    %494 = vector.multi_reduction <add>, %493, %cst_153 [1] : vector<2x8x32xf32> to vector<2x32xf32>
    %495 = tpu.concatenate %469, %494, %461 in 1 : vector<2x16xf32>, vector<2x32xf32>, vector<2x32xf32> -> vector<2x80xf32>
    %cst_154 = arith.constant dense<0.000000e+00> : vector<2x128xf32>
    %496 = tpu.matmul %495, %3, %cst_154 {dimension_numbers = #tpu.dot_dimension_numbers<[1], [0], [0], [1], [0, 0, 1, 1], [], []>} : vector<2x80xf32>, vector<80x128xf32>, vector<2x128xf32> -> vector<2x128xf32>
    %497 = arith.addf %496, %12 : vector<2x128xf32>
    %498 = vector.extract_strided_slice %497 {offsets = [0, 0], sizes = [2, 96], strides = [1, 1]} : vector<2x128xf32> to vector<2x96xf32>
    %499 = arith.negf %498 : vector<2x96xf32>
    %500 = math.exp %499 : vector<2x96xf32>
    %cst_155 = arith.constant 1.000000e+00 : f32
    %501 = vector.broadcast %cst_155 : f32 to vector<2x96xf32>
    %502 = arith.addf %501, %500 : vector<2x96xf32>
    %503 = arith.divf %501, %502 : vector<2x96xf32>
    %504 = vector.extract_strided_slice %497 {offsets = [0, 96], sizes = [2, 32], strides = [1, 1]} : vector<2x128xf32> to vector<2x32xf32>
    %505 = math.tanh %504 : vector<2x32xf32>
    %506 = vector.extract_strided_slice %503 {offsets = [0, 0], sizes = [2, 32], strides = [1, 1]} : vector<2x96xf32> to vector<2x32xf32>
    %507 = vector.extract_strided_slice %503 {offsets = [0, 32], sizes = [2, 32], strides = [1, 1]} : vector<2x96xf32> to vector<2x32xf32>
    %508 = vector.extract_strided_slice %503 {offsets = [0, 64], sizes = [2, 32], strides = [1, 1]} : vector<2x96xf32> to vector<2x32xf32>
    %509 = arith.mulf %507, %459 : vector<2x32xf32>
    %510 = arith.mulf %506, %505 : vector<2x32xf32>
    %511 = arith.addf %509, %510 : vector<2x32xf32>
    %512 = math.tanh %511 : vector<2x32xf32>
    %513 = arith.mulf %508, %512 : vector<2x32xf32>
    %514 = tpu.concatenate %513, %494, %469 in 1 : vector<2x32xf32>, vector<2x32xf32>, vector<2x16xf32> -> vector<2x80xf32>
    %cst_156 = arith.constant dense<0.000000e+00> : vector<2x16xf32>
    %515 = tpu.matmul %514, %4, %cst_156 {dimension_numbers = #tpu.dot_dimension_numbers<[1], [0], [0], [1], [0, 0, 1, 1], [], []>} : vector<2x80xf32>, vector<80x16xf32>, vector<2x16xf32> -> vector<2x16xf32>
    %516 = arith.addf %515, %15 : vector<2x16xf32>
    %c5_157 = arith.constant 5 : index
    %517 = memref.load %arg1[%c5_157] : memref<8xi32, #tpu.memory_space<smem>>
    %c0_i32_158 = arith.constant 0 : i32
    %518 = arith.cmpi sgt, %517, %c0_i32_158 : i32
    %519 = vector.extract_strided_slice %1 {offsets = [0, 5, 0], sizes = [2, 1, 16], strides = [1, 1, 1]} : vector<2x8x16xf32> to vector<2x1x16xf32>
    %520 = vector.shape_cast %519 : vector<2x1x16xf32> to vector<2x16xf32>
    %521 = arith.select %518, %520, %516 : vector<2x16xf32>
    %cst_159 = arith.constant dense<0.000000e+00> : vector<2x32xf32>
    %522 = tpu.matmul %513, %5, %cst_159 {dimension_numbers = #tpu.dot_dimension_numbers<[1], [0], [0], [1], [0, 0, 1, 1], [], []>} : vector<2x32xf32>, vector<32x32xf32>, vector<2x32xf32> -> vector<2x32xf32>
    %c0_160 = arith.constant 0 : index
    %c0_161 = arith.constant 0 : index
    %c0_162 = arith.constant 0 : index
    %523 = vector.load %arg15[%c0_160, %c0_161, %c0_162] : memref<2x8x32xf32, #tpu.memory_space<vmem>>, vector<2x8x32xf32>
    %524 = vector.shape_cast %522 : vector<2x32xf32> to vector<2x1x32xf32>
    %525 = vector.broadcast %524 : vector<2x1x32xf32> to vector<2x8x32xf32>
    %526 = arith.addf %523, %525 : vector<2x8x32xf32>
    %527 = math.tanh %526 : vector<2x8x32xf32>
    %528 = vector.shape_cast %6 : vector<1x32xf32> to vector<1x1x32xf32>
    %529 = vector.broadcast %528 : vector<1x1x32xf32> to vector<2x8x32xf32>
    %530 = arith.mulf %527, %529 : vector<2x8x32xf32>
    %cst_163 = arith.constant dense<0.000000e+00> : vector<2x8xf32>
    %531 = vector.multi_reduction <add>, %530, %cst_163 [2] : vector<2x8x32xf32> to vector<2x8xf32>
    %cst_164 = arith.constant dense<0xFF800000> : vector<2xf32>
    %532 = vector.multi_reduction <maximumf>, %531, %cst_164 [1] : vector<2x8xf32> to vector<2xf32>
    %533 = vector.shape_cast %532 : vector<2xf32> to vector<2x1xf32>
    %534 = vector.broadcast %533 : vector<2x1xf32> to vector<2x8xf32>
    %535 = arith.subf %531, %534 : vector<2x8xf32>
    %536 = math.exp %535 : vector<2x8xf32>
    %cst_165 = arith.constant dense<0.000000e+00> : vector<2xf32>
    %537 = vector.multi_reduction <add>, %536, %cst_165 [1] : vector<2x8xf32> to vector<2xf32>
    %538 = vector.shape_cast %537 : vector<2xf32> to vector<2x1xf32>
    %539 = tpu.reciprocal %538 {approx = true} : vector<2x1xf32> -> vector<2x1xf32>
    %540 = vector.broadcast %539 : vector<2x1xf32> to vector<2x8xf32>
    %541 = arith.mulf %536, %540 : vector<2x8xf32>
    %542 = vector.shape_cast %541 : vector<2x8xf32> to vector<2x8x1xf32>
    %c0_166 = arith.constant 0 : index
    %c0_167 = arith.constant 0 : index
    %c0_168 = arith.constant 0 : index
    %543 = vector.load %arg14[%c0_166, %c0_167, %c0_168] : memref<2x8x32xf32, #tpu.memory_space<vmem>>, vector<2x8x32xf32>
    %544 = vector.broadcast %542 : vector<2x8x1xf32> to vector<2x8x32xf32>
    %545 = arith.mulf %544, %543 : vector<2x8x32xf32>
    %cst_169 = arith.constant dense<0.000000e+00> : vector<2x32xf32>
    %546 = vector.multi_reduction <add>, %545, %cst_169 [1] : vector<2x8x32xf32> to vector<2x32xf32>
    %547 = tpu.concatenate %521, %546, %513 in 1 : vector<2x16xf32>, vector<2x32xf32>, vector<2x32xf32> -> vector<2x80xf32>
    %cst_170 = arith.constant dense<0.000000e+00> : vector<2x128xf32>
    %548 = tpu.matmul %547, %3, %cst_170 {dimension_numbers = #tpu.dot_dimension_numbers<[1], [0], [0], [1], [0, 0, 1, 1], [], []>} : vector<2x80xf32>, vector<80x128xf32>, vector<2x128xf32> -> vector<2x128xf32>
    %549 = arith.addf %548, %12 : vector<2x128xf32>
    %550 = vector.extract_strided_slice %549 {offsets = [0, 0], sizes = [2, 96], strides = [1, 1]} : vector<2x128xf32> to vector<2x96xf32>
    %551 = arith.negf %550 : vector<2x96xf32>
    %552 = math.exp %551 : vector<2x96xf32>
    %cst_171 = arith.constant 1.000000e+00 : f32
    %553 = vector.broadcast %cst_171 : f32 to vector<2x96xf32>
    %554 = arith.addf %553, %552 : vector<2x96xf32>
    %555 = arith.divf %553, %554 : vector<2x96xf32>
    %556 = vector.extract_strided_slice %549 {offsets = [0, 96], sizes = [2, 32], strides = [1, 1]} : vector<2x128xf32> to vector<2x32xf32>
    %557 = math.tanh %556 : vector<2x32xf32>
    %558 = vector.extract_strided_slice %555 {offsets = [0, 0], sizes = [2, 32], strides = [1, 1]} : vector<2x96xf32> to vector<2x32xf32>
    %559 = vector.extract_strided_slice %555 {offsets = [0, 32], sizes = [2, 32], strides = [1, 1]} : vector<2x96xf32> to vector<2x32xf32>
    %560 = vector.extract_strided_slice %555 {offsets = [0, 64], sizes = [2, 32], strides = [1, 1]} : vector<2x96xf32> to vector<2x32xf32>
    %561 = arith.mulf %559, %511 : vector<2x32xf32>
    %562 = arith.mulf %558, %557 : vector<2x32xf32>
    %563 = arith.addf %561, %562 : vector<2x32xf32>
    %564 = math.tanh %563 : vector<2x32xf32>
    %565 = arith.mulf %560, %564 : vector<2x32xf32>
    %566 = tpu.concatenate %565, %546, %521 in 1 : vector<2x32xf32>, vector<2x32xf32>, vector<2x16xf32> -> vector<2x80xf32>
    %cst_172 = arith.constant dense<0.000000e+00> : vector<2x16xf32>
    %567 = tpu.matmul %566, %4, %cst_172 {dimension_numbers = #tpu.dot_dimension_numbers<[1], [0], [0], [1], [0, 0, 1, 1], [], []>} : vector<2x80xf32>, vector<80x16xf32>, vector<2x16xf32> -> vector<2x16xf32>
    %568 = arith.addf %567, %15 : vector<2x16xf32>
    %c6_173 = arith.constant 6 : index
    %569 = memref.load %arg1[%c6_173] : memref<8xi32, #tpu.memory_space<smem>>
    %c0_i32_174 = arith.constant 0 : i32
    %570 = arith.cmpi sgt, %569, %c0_i32_174 : i32
    %571 = vector.extract_strided_slice %1 {offsets = [0, 6, 0], sizes = [2, 1, 16], strides = [1, 1, 1]} : vector<2x8x16xf32> to vector<2x1x16xf32>
    %572 = vector.shape_cast %571 : vector<2x1x16xf32> to vector<2x16xf32>
    %573 = arith.select %570, %572, %568 : vector<2x16xf32>
    %cst_175 = arith.constant dense<0.000000e+00> : vector<2x32xf32>
    %574 = tpu.matmul %565, %5, %cst_175 {dimension_numbers = #tpu.dot_dimension_numbers<[1], [0], [0], [1], [0, 0, 1, 1], [], []>} : vector<2x32xf32>, vector<32x32xf32>, vector<2x32xf32> -> vector<2x32xf32>
    %c0_176 = arith.constant 0 : index
    %c0_177 = arith.constant 0 : index
    %c0_178 = arith.constant 0 : index
    %575 = vector.load %arg15[%c0_176, %c0_177, %c0_178] : memref<2x8x32xf32, #tpu.memory_space<vmem>>, vector<2x8x32xf32>
    %576 = vector.shape_cast %574 : vector<2x32xf32> to vector<2x1x32xf32>
    %577 = vector.broadcast %576 : vector<2x1x32xf32> to vector<2x8x32xf32>
    %578 = arith.addf %575, %577 : vector<2x8x32xf32>
    %579 = math.tanh %578 : vector<2x8x32xf32>
    %580 = vector.shape_cast %6 : vector<1x32xf32> to vector<1x1x32xf32>
    %581 = vector.broadcast %580 : vector<1x1x32xf32> to vector<2x8x32xf32>
    %582 = arith.mulf %579, %581 : vector<2x8x32xf32>
    %cst_179 = arith.constant dense<0.000000e+00> : vector<2x8xf32>
    %583 = vector.multi_reduction <add>, %582, %cst_179 [2] : vector<2x8x32xf32> to vector<2x8xf32>
    %cst_180 = arith.constant dense<0xFF800000> : vector<2xf32>
    %584 = vector.multi_reduction <maximumf>, %583, %cst_180 [1] : vector<2x8xf32> to vector<2xf32>
    %585 = vector.shape_cast %584 : vector<2xf32> to vector<2x1xf32>
    %586 = vector.broadcast %585 : vector<2x1xf32> to vector<2x8xf32>
    %587 = arith.subf %583, %586 : vector<2x8xf32>
    %588 = math.exp %587 : vector<2x8xf32>
    %cst_181 = arith.constant dense<0.000000e+00> : vector<2xf32>
    %589 = vector.multi_reduction <add>, %588, %cst_181 [1] : vector<2x8xf32> to vector<2xf32>
    %590 = vector.shape_cast %589 : vector<2xf32> to vector<2x1xf32>
    %591 = tpu.reciprocal %590 {approx = true} : vector<2x1xf32> -> vector<2x1xf32>
    %592 = vector.broadcast %591 : vector<2x1xf32> to vector<2x8xf32>
    %593 = arith.mulf %588, %592 : vector<2x8xf32>
    %594 = vector.shape_cast %593 : vector<2x8xf32> to vector<2x8x1xf32>
    %c0_182 = arith.constant 0 : index
    %c0_183 = arith.constant 0 : index
    %c0_184 = arith.constant 0 : index
    %595 = vector.load %arg14[%c0_182, %c0_183, %c0_184] : memref<2x8x32xf32, #tpu.memory_space<vmem>>, vector<2x8x32xf32>
    %596 = vector.broadcast %594 : vector<2x8x1xf32> to vector<2x8x32xf32>
    %597 = arith.mulf %596, %595 : vector<2x8x32xf32>
    %cst_185 = arith.constant dense<0.000000e+00> : vector<2x32xf32>
    %598 = vector.multi_reduction <add>, %597, %cst_185 [1] : vector<2x8x32xf32> to vector<2x32xf32>
    %599 = tpu.concatenate %573, %598, %565 in 1 : vector<2x16xf32>, vector<2x32xf32>, vector<2x32xf32> -> vector<2x80xf32>
    %cst_186 = arith.constant dense<0.000000e+00> : vector<2x128xf32>
    %600 = tpu.matmul %599, %3, %cst_186 {dimension_numbers = #tpu.dot_dimension_numbers<[1], [0], [0], [1], [0, 0, 1, 1], [], []>} : vector<2x80xf32>, vector<80x128xf32>, vector<2x128xf32> -> vector<2x128xf32>
    %601 = arith.addf %600, %12 : vector<2x128xf32>
    %602 = vector.extract_strided_slice %601 {offsets = [0, 0], sizes = [2, 96], strides = [1, 1]} : vector<2x128xf32> to vector<2x96xf32>
    %603 = arith.negf %602 : vector<2x96xf32>
    %604 = math.exp %603 : vector<2x96xf32>
    %cst_187 = arith.constant 1.000000e+00 : f32
    %605 = vector.broadcast %cst_187 : f32 to vector<2x96xf32>
    %606 = arith.addf %605, %604 : vector<2x96xf32>
    %607 = arith.divf %605, %606 : vector<2x96xf32>
    %608 = vector.extract_strided_slice %601 {offsets = [0, 96], sizes = [2, 32], strides = [1, 1]} : vector<2x128xf32> to vector<2x32xf32>
    %609 = math.tanh %608 : vector<2x32xf32>
    %610 = vector.extract_strided_slice %607 {offsets = [0, 0], sizes = [2, 32], strides = [1, 1]} : vector<2x96xf32> to vector<2x32xf32>
    %611 = vector.extract_strided_slice %607 {offsets = [0, 32], sizes = [2, 32], strides = [1, 1]} : vector<2x96xf32> to vector<2x32xf32>
    %612 = vector.extract_strided_slice %607 {offsets = [0, 64], sizes = [2, 32], strides = [1, 1]} : vector<2x96xf32> to vector<2x32xf32>
    %613 = arith.mulf %611, %563 : vector<2x32xf32>
    %614 = arith.mulf %610, %609 : vector<2x32xf32>
    %615 = arith.addf %613, %614 : vector<2x32xf32>
    %616 = math.tanh %615 : vector<2x32xf32>
    %617 = arith.mulf %612, %616 : vector<2x32xf32>
    %618 = tpu.concatenate %617, %598, %573 in 1 : vector<2x32xf32>, vector<2x32xf32>, vector<2x16xf32> -> vector<2x80xf32>
    %cst_188 = arith.constant dense<0.000000e+00> : vector<2x16xf32>
    %619 = tpu.matmul %618, %4, %cst_188 {dimension_numbers = #tpu.dot_dimension_numbers<[1], [0], [0], [1], [0, 0, 1, 1], [], []>} : vector<2x80xf32>, vector<80x16xf32>, vector<2x16xf32> -> vector<2x16xf32>
    %620 = arith.addf %619, %15 : vector<2x16xf32>
    %621 = tpu.concatenate %256, %308, %360, %412, %464, %516, %568, %620 in 1 : vector<2x16xf32>, vector<2x16xf32>, vector<2x16xf32>, vector<2x16xf32>, vector<2x16xf32>, vector<2x16xf32>, vector<2x16xf32>, vector<2x16xf32> -> vector<2x128xf32>
    %c0_189 = arith.constant 0 : index
    %c0_190 = arith.constant 0 : index
    %622 = vector.load %arg13[%c0_189, %c0_190] : memref<2x128xf32, #tpu.memory_space<vmem>>, vector<2x128xf32>
    tpu.vector_store %arg13[%c0_189, %c0_190], %621 {strides = array<i32>} : memref<2x128xf32, #tpu.memory_space<vmem>>, vector<2x128xf32>,
    return
  }
  func.func @transform_0(%arg0: i32, %arg1: memref<8xi32, #tpu.memory_space<smem>>) -> (i32, i32, i32) {
    %c0_i32 = arith.constant 0 : i32
    %c0_i32_0 = arith.constant 0 : i32
    %c0_i32_1 = arith.constant 0 : i32
    return %arg0, %c0_i32, %c0_i32_0 : i32, i32, i32
  }
  func.func @transform_1(%arg0: i32, %arg1: memref<8xi32, #tpu.memory_space<smem>>) -> (i32, i32, i32) {
    %c0_i32 = arith.constant 0 : i32
    %c0_i32_0 = arith.constant 0 : i32
    %c0_i32_1 = arith.constant 0 : i32
    return %arg0, %c0_i32, %c0_i32_0 : i32, i32, i32
  }
  func.func @transform_2(%arg0: i32, %arg1: memref<8xi32, #tpu.memory_space<smem>>) -> (i32, i32) {
    %c0_i32 = arith.constant 0 : i32
    %c0_i32_0 = arith.constant 0 : i32
    %c0_i32_1 = arith.constant 0 : i32
    return %c0_i32, %c0_i32_0 : i32, i32
  }
  func.func @transform_3(%arg0: i32, %arg1: memref<8xi32, #tpu.memory_space<smem>>) -> (i32, i32) {
    %c0_i32 = arith.constant 0 : i32
    %c0_i32_0 = arith.constant 0 : i32
    %c0_i32_1 = arith.constant 0 : i32
    return %c0_i32, %c0_i32_0 : i32, i32
  }
  func.func @transform_4(%arg0: i32, %arg1: memref<8xi32, #tpu.memory_space<smem>>) -> (i32, i32) {
    %c0_i32 = arith.constant 0 : i32
    %c0_i32_0 = arith.constant 0 : i32
    %c0_i32_1 = arith.constant 0 : i32
    return %c0_i32, %c0_i32_0 : i32, i32
  }
  func.func @transform_5(%arg0: i32, %arg1: memref<8xi32, #tpu.memory_space<smem>>) -> (i32, i32) {
    %c0_i32 = arith.constant 0 : i32
    %c0_i32_0 = arith.constant 0 : i32
    %c0_i32_1 = arith.constant 0 : i32
    return %c0_i32, %c0_i32_0 : i32, i32
  }
  func.func @transform_6(%arg0: i32, %arg1: memref<8xi32, #tpu.memory_space<smem>>) -> (i32, i32) {
    %c0_i32 = arith.constant 0 : i32
    %c0_i32_0 = arith.constant 0 : i32
    %c0_i32_1 = arith.constant 0 : i32
    return %c0_i32, %c0_i32_0 : i32, i32
  }
  func.func @transform_7(%arg0: i32, %arg1: memref<8xi32, #tpu.memory_space<smem>>) -> (i32, i32) {
    %c0_i32 = arith.constant 0 : i32
    %c0_i32_0 = arith.constant 0 : i32
    %c0_i32_1 = arith.constant 0 : i32
    return %c0_i32, %c0_i32_0 : i32, i32
  }
  func.func @transform_8(%arg0: i32, %arg1: memref<8xi32, #tpu.memory_space<smem>>) -> (i32, i32) {
    %c0_i32 = arith.constant 0 : i32
    %c0_i32_0 = arith.constant 0 : i32
    %c0_i32_1 = arith.constant 0 : i32
    return %c0_i32, %c0_i32_0 : i32, i32
  }
  func.func @transform_9(%arg0: i32, %arg1: memref<8xi32, #tpu.memory_space<smem>>) -> (i32, i32) {
    %c0_i32 = arith.constant 0 : i32
    %c0_i32_0 = arith.constant 0 : i32
    %c0_i32_1 = arith.constant 0 : i32
    return %c0_i32, %c0_i32_0 : i32, i32
  }
  func.func @transform_10(%arg0: i32, %arg1: memref<8xi32, #tpu.memory_space<smem>>) -> (i32, i32) {
    %c0_i32 = arith.constant 0 : i32
    %c0_i32_0 = arith.constant 0 : i32
    %c0_i32_1 = arith.constant 0 : i32
    return %c0_i32, %c0_i32_0 : i32, i32
  }
  func.func @transform_11(%arg0: i32, %arg1: memref<8xi32, #tpu.memory_space<smem>>) -> (i32, i32) {
    %c0_i32 = arith.constant 0 : i32
    %c0_i32_0 = arith.constant 0 : i32
    return %arg0, %c0_i32 : i32, i32
  }
}

</mosaic_0001>

<bundles_post_ra>
// kernel: tpu_custom_call.1
= control target key start
LH: loop header
LB: loop body
LE: loop exit
PB: predicated region body
PF: predicated region fallthrough
CT: control target
= control target key end

     0   :  { %s8039_s0 = inlined_call_operand.vmem [shape: s32[8], index: 0, kind: input, shape index: {}]   ;;  %s8040_s1 = inlined_call_operand.hbm [shape: f32[2,8,16], index: 1, kind: input, shape index: {}]   ;;  %s8041_s2 = inlined_call_operand.hbm [shape: f32[2,8,16], index: 2, kind: input, shape index: {}]   ;;  %s8042_s3 = inlined_call_operand.hbm [shape: f32[48,128], index: 3, kind: input, shape index: {}]   ;;  %s8043_s4 = inlined_call_operand.vmem [shape: f32[1,128], index: 4, kind: input, shape index: {}]   ;;  %s8044_s5 = inlined_call_operand.vmem [shape: f32[32,32], index: 5, kind: input, shape index: {}]   ;;  %s8045_s6 = inlined_call_operand.hbm [shape: f32[32,32], index: 6, kind: input, shape index: {}]   ;;  %s8046_s7 = inlined_call_operand.hbm [shape: f32[1,32], index: 7, kind: input, shape index: {}]   ;;  %s8047_s8 = inlined_call_operand.vmem [shape: f32[80,128], index: 8, kind: input, shape index: {}]   ;;  %s8048_s9 = inlined_call_operand.hbm [shape: f32[1,128], index: 9, kind: input, shape index: {}]   ;;  %s8049_s10 = inlined_call_operand.vmem [shape: f32[80,16], index: 10, kind: input, shape index: {}]   ;;  %s8050_s11 = inlined_call_operand.vmem [shape: f32[1,16], index: 11, kind: input, shape index: {}]   ;;  %s8051_s12 = inlined_call_operand.hbm [shape: f32[2,128], index: 12, kind: output, shape index: {}]  }
   0x1   :  { %s17_s23 = sshll.u32 %s8039_s0, 4  ;;  %s18_s23 = int_to_ptr.vmem [resolvable:$true] %s17_s23 }
   0x2   :  { %s6419_s24 = scalar_lea.vmem %s18_s23, 16  ;;  %p6424_p1 = scmp.lt.s32.totalorder %s18_s23, %s18_s23 }
   0x3   :  { %p6420_p0 = scmp.ne.s32.totalorder %s18_s23, %s6419_s24  ;;  %p6425_p2 = scmp.lt.s32.totalorder %s6419_s24, %s6419_s24 }
   0x5   :  { %p6426_p3 = por %p6425_p2, %p6424_p1 }
   0x7   :  { %p6427_p4 = pnand %p6426_p3, %p6420_p0 }
   0x9   :  { %6430 = shalt.err (!%p6427_p4)  }
   0xa   :  { %s6597_s25 = smov [#allocation5]  }
   0xb   :  { %20 = dma.vmem_to_smem %s18_s23, 16, %s6597_s25, [#allocation4] }
   0xc   :  { %6585 = dma.done.wait [#allocation4], 16 }
   0xd   :  { %6586 = vsyncadd [#allocation4], 4294967280 }
   0xe   :  { %22 = sfence }
   0xf   :  { %23 = vsyncpa [#allocation7], 0 }
  0x10   :  { %24 = vsyncpa [#allocation10], 0 }
  0x11   :  { %25 = vsyncpa [#allocation13], 0 }
  0x12   :  { %26 = vsyncpa [#allocation16], 0 }
  0x13   :  { %27 = vsyncpa [#allocation8], 0  ;;  %s6598_s26 = smov [#allocation9]   ;;  %s6599_s27 = smov [#allocation12]  }
  0x14   :  { %s45_s0 = sshll.u32 %s6598_s26, 4  ;;  %s73_s28 = sshll.u32 %s6599_s27, 4  ;;  %s46_s0 = int_to_ptr.vmem [resolvable:$true] %s45_s0  ;;  %s6687_s28 = int_to_ptr.vmem [resolvable:$true] %s73_s28 }
  0x15   :  { %s6431_s13 = scalar_lea.hbm %s8041_s2, 256 }
  0x16   :  { %p6432_p5 = scmp.ne.s32.totalorder %s8041_s2, %s6431_s13  ;;  %p6435_p6 = scmp.lt.u32.totalorder %s6431_s13, %s8041_s2 }
  0x18   :  { %p6437_p7 = pnand %p6435_p6, %p6432_p5 }
  0x1a   :  { %6440 = shalt.err (!%p6437_p7)
}
  0x1b   :  { %s6441_s18 = scalar_lea.vmem %s46_s0, 256  ;;  %p6446_p9 = scmp.lt.s32.totalorder %s46_s0, %s46_s0 }
  0x1c   :  { %p6442_p8 = scmp.ne.s32.totalorder %s46_s0, %s6441_s18  ;;  %p6447_p10 = scmp.lt.s32.totalorder %s6441_s18, %s6441_s18 }
  0x1e   :  { %p6448_p11 = por %p6447_p10, %p6446_p9 }
  0x20   :  { %p6449_p12 = pnand %p6448_p11, %p6442_p8 }
  0x22   :  { %6452 = shalt.err (!%p6449_p12)
}
  0x23   :  { %s6600_s19 = smov 128   ;;  %s6601_s20 = smov 8  }
  0x24   :  { %51 = dma.hbm_to_vmem [thread:$0]  %s8041_s2, 256, %s46_s0, [#allocation10], %s6600_s19, %s6600_s19, %s6601_s20  }
  0x25   :  { %s6453_s25 = scalar_lea.hbm %s8045_s6, 512 }
  0x26   :  { %p6454_p13 = scmp.ne.s32.totalorder %s8045_s6, %s6453_s25  ;;  %p6457_p0 = scmp.lt.u32.totalorder %s6453_s25, %s8045_s6 }
  0x28   :  { %p6459_p1 = pnand %p6457_p0, %p6454_p13 }
  0x2a   :  { %6462 = shalt.err (!%p6459_p1)
}
  0x2b   :  { %s6463_s13 = scalar_lea.vmem %s6687_s28, 512  ;;  %p6468_p3 = scmp.lt.s32.totalorder %s6687_s28, %s6687_s28 }
  0x2c   :  { %p6464_p2 = scmp.ne.s32.totalorder %s6687_s28, %s6463_s13  ;;  %p6469_p4 = scmp.lt.s32.totalorder %s6463_s13, %s6463_s13 }
  0x2e   :  { %p6470_p5 = por %p6469_p4, %p6468_p3 }
  0x30   :  { %p6471_p6 = pnand %p6470_p5, %p6464_p2 }
  0x32   :  { %6474 = shalt.err (!%p6471_p6)
}
  0x33   :  { %79 = dma.hbm_to_vmem [thread:$0]  %s8045_s6, 512, %s6687_s28, [#allocation13], %s6600_s19, %s6600_s19, %s6601_s20  }
  0x34   :  { %s6602_s14 = smov [#allocation6]   ;;  %s6603_s16 = smov [#allocation11]  }
  0x35   :  { %s33_s15 = sshll.u32 %s6602_s14, 4  ;;  %s57_s17 = sshll.u32 %s6603_s16, 4  ;;  %s34_s15 = int_to_ptr.vmem [resolvable:$true] %s33_s15  ;;  %s6724_s17 = int_to_ptr.vmem [resolvable:$true] %s57_s17 }
  0x36   :  { %s6475_s22 = scalar_lea.hbm %s8040_s1, 256 }
  0x37   :  { %p6476_p7 = scmp.ne.s32.totalorder %s8040_s1, %s6475_s22  ;;  %p6479_p8 = scmp.lt.u32.totalorder %s6475_s22, %s8040_s1 }
  0x39   :  { %p6481_p9 = pnand %p6479_p8, %p6476_p7 }
  0x3b   :  { %6484 = shalt.err (!%p6481_p9)
}
  0x3c   :  { %s6485_s6 = scalar_lea.vmem %s34_s15, 256  ;;  %p6490_p11 = scmp.lt.s32.totalorder %s34_s15, %s34_s15 }
  0x3d   :  { %p6486_p10 = scmp.ne.s32.totalorder %s34_s15, %s6485_s6  ;;  %p6491_p12 = scmp.lt.s32.totalorder %s6485_s6, %s6485_s6 }
  0x3f   :  { %p6492_p13 = por %p6491_p12, %p6490_p11 }
  0x41   :  { %p6493_p0 = pnand %p6492_p13, %p6486_p10 }
  0x43   :  { %6496 = shalt.err (!%p6493_p0)
}
  0x44   :  { %39 = dma.hbm_to_vmem [thread:$0]  %s8040_s1, 256, %s34_s15, [#allocation7], %s6600_s19, %s6600_s19, %s6601_s20  }
  0x45   :  { %s6497_s13 = scalar_lea.hbm %s8042_s3, 768 }
  0x46   :  { %p6498_p1 = scmp.ne.s32.totalorder %s8042_s3, %s6497_s13  ;;  %p6501_p2 = scmp.lt.u32.totalorder %s6497_s13, %s8042_s3 }
  0x48   :  { %p6503_p3 = pnand %p6501_p2, %p6498_p1 }
  0x4a   :  { %6506 = shalt.err (!%p6503_p3)
}
  0x4b   :  { %s6507_s18 = scalar_lea.vmem %s6724_s17, 768  ;;  %p6512_p5 = scmp.lt.s32.totalorder %s6724_s17, %s6724_s17 }
  0x4c   :  { %p6508_p4 = scmp.ne.s32.totalorder %s6724_s17, %s6507_s18  ;;  %p6513_p6 = scmp.lt.s32.totalorder %s6507_s18, %s6507_s18 }
  0x4e   :  { %p6514_p7 = por %p6513_p6, %p6512_p5 }
  0x50   :  { %p6515_p8 = pnand %p6514_p7, %p6508_p4 }
  0x52   :  { %6518 = shalt.err (!%p6515_p8)
}
  0x53   :  { %63 = dma.hbm_to_vmem [thread:$0]  %s8042_s3, 768, %s6724_s17, [#allocation10], %s6600_s19, %s6600_s19, %s6601_s20  }
  0x54   :  { %s6604_s21 = smov [#allocation14]   ;;  %s6605_s23 = smov [#allocation15]  }
  0x55   :  { %s86_s22 = sshll.u32 %s6604_s21, 4  ;;  %s98_s24 = sshll.u32 %s6605_s23, 4  ;;  %s87_s22 = int_to_ptr.vmem [resolvable:$true] %s86_s22  ;;  %s99_s24 = int_to_ptr.vmem [resolvable:$true] %s98_s24 }
  0x56   :  { %s6519_s6 = scalar_lea.hbm %s8046_s7, 16 }
  0x57   :  { %p6520_p9 = scmp.ne.s32.totalorder %s8046_s7, %s6519_s6  ;;  %p6523_p10 = scmp.lt.u32.totalorder %s6519_s6, %s8046_s7 }
  0x59   :  { %p6525_p11 = pnand %p6523_p10, %p6520_p9 }
  0x5b   :  { %6528 = shalt.err (!%p6525_p11)
}
  0x5c   :  { %s6529_s3 = scalar_lea.vmem %s87_s22, 16  ;;  %s6533_s19 = scalar_lea.vmem %s87_s22, 32 }
  0x5d   :  { %p6530_p12 = scmp.ne.s32.totalorder %s87_s22, %s6529_s3  ;;  %p6534_p13 = scmp.lt.s32.totalorder %s87_s22, %s87_s22 }
  0x5e   :  { %p6535_p0 = scmp.lt.s32.totalorder %s6533_s19, %s6529_s3 }
  0x60   :  { %p6536_p1 = por %p6535_p0, %p6534_p13 }
  0x62   :  { %p6537_p2 = pnand %p6536_p1, %p6530_p12 }
  0x64   :  { %6540 = shalt.err (!%p6537_p2)
}
  0x65   :  { %89 = dma.hbm_to_vmem [thread:$0]  %s8046_s7, 16, %s87_s22, [#allocation13]  }
  0x66   :  { %s6541_s0 = scalar_lea.hbm %s8048_s9, 16 }
  0x67   :  { %p6542_p3 = scmp.ne.s32.totalorder %s8048_s9, %s6541_s0  ;;  %p6545_p4 = scmp.lt.u32.totalorder %s6541_s0, %s8048_s9 }
  0x69   :  { %p6547_p5 = pnand %p6545_p4, %p6542_p3 }
  0x6b   :  { %6550 = shalt.err (!%p6547_p5)
}
  0x6c   :  { %s6551_s15 = scalar_lea.vmem %s99_s24, 16  ;;  %s6555_s21 = scalar_lea.vmem %s99_s24, 32 }
  0x6d   :  { %p6552_p6 = scmp.ne.s32.totalorder %s99_s24, %s6551_s15  ;;  %p6556_p7 = scmp.lt.s32.totalorder %s99_s24, %s99_s24 }
  0x6e   :  { %p6557_p8 = scmp.lt.s32.totalorder %s6555_s21, %s6551_s15 }
  0x70   :  { %p6558_p9 = por %p6557_p8, %p6556_p7 }
  0x72   :  { %p6559_p10 = pnand %p6558_p9, %p6552_p6 }
  0x74   :  { %6562 = shalt.err (!%p6559_p10)
}
  0x75   :  { %101 = dma.hbm_to_vmem [thread:$0]  %s8048_s9, 16, %s99_s24, [#allocation16]  }
  0x76   :  { %6587 = dma.done.wait [#allocation7], 256  }
  0x77   :  { %6588 = vsyncadd [#allocation7], 4294967040 }
  0x78   :  { %6589 = dma.done.wait [#allocation10], 1024  }
  0x79   :  { %6590 = vsyncadd [#allocation10], 4294966272 }
  0x7a   :  { %6591 = dma.done.wait [#allocation13], 528  }
  0x7b   :  { %6592 = vsyncadd [#allocation13], 4294966768 }
  0x7c   :  { %6593 = dma.done.wait [#allocation16], 16  }
  0x7d   :  { %6594 = vsyncadd [#allocation16], 4294967280  ;;  %v6606_v0 = vmov 0.0|0.0   ;;  %vm6607_vm0 = vmmov 0   ;;  %v6608_v1 = vmov 0.0   ;;  %v128_v2 = vld [vmem:[#allocation11] sm:$0xff] }
  0x7e   :  { %5808 = vmatprep.subr.bf16.mxu0 %v6606_v0  ;;  %5233 = vmatprep.mubr.msk.f32.mxu0 %vm6607_vm0, %v6608_v1  ;;  %v129_v3 = vld [vmem:[#allocation11 + $0x8] sm:$0xff]  ;;  %v130_v4 = vld [vmem:[#allocation11 + $0x10] sm:$0xff]  ;;  %v131_v6 = vld [vmem:[#allocation11 + $0x18] sm:$0xff]  ;;  %vm183_vm1 = vcmask 1041409   ;;  %vm186_vm2 = vcmask 130048   ;;  %vm188_vm3 = vcmask 392192  }
  0x7f   :  { %5817 = vmatprep.subr.bf16.mxu1 %v6606_v0  ;;  %5248 = vmatprep.mubr.msk.f32.mxu1 %vm6607_vm0, %v6608_v1  ;;  %v6791_v5 = vpack.c.bf16 %v129_v3, %v128_v2  ;;  %v125_v7 = vld [vmem:[#allocation6 + $0x8] sm:$0xff]  ;;  %v6794_v8 = vpack.c.bf16 %v131_v6, %v130_v4  ;;  %v132_v9 = vld [vmem:[#allocation11 + $0x20] sm:$0xff]  ;;  %s6609_s24 = smov 32   ;;  %vm326_vm4 = vcmask 1042434   ;;  %vm471_vm5 = vcmask 1043459   ;;  %s6612_s25 = smov 64  }
  0x80   :  { %v133_v10 = vld [vmem:[#allocation11 + $0x28] sm:$0xff]  ;;  %v6798_v11 = vrot.slane %v125_v7, 7  ;;  %v6801_v12 = vld [vmem:[#allocation6] sm:$0xff]  ;;  %vm616_vm6 = vcmask 1044484   ;;  %vm761_vm7 = vcmask 1045509   ;;  %vm906_vm8 = vcmask 1046534  }
  0x81   :  { %5810 = vmatpush3.bf16.msra.mxu0 %v6791_v5  ;;  %5819 = vmatpush3.bf16.msra.mxu1 %v6791_v5  ;;  %v6804_v13 = vpack.c.bf16 %v133_v10, %v132_v9  ;;  %v6829_v16 = vld [vmem:[%s8043_s4] ss:$0 sm:$0xff]  ;;  %s6610_s4 = smov 80   ;;  %vm1051_vm9 = vcmask 1047559   ;;  %vm1206_vm10 = vcmask 1040384   ;;  %vm323_vm11 = vcmask 253952  }
  0x82   :  { %5811 = vmatprep.subr.bf16.mxu0 %v6606_v0  ;;  %5820 = vmatprep.subr.bf16.mxu1 %v6606_v0  ;;  %v184_v14 = vsel %vm183_vm1, %v6798_v11, %v6801_v12  ;;  %v327_v34 = vsel %vm326_vm4, %v6798_v11, %v6801_v12  ;;  %v472_v55 = vsel %vm471_vm5, %v6798_v11, %v6801_v12  ;;  %vm1351_vm12 = vcmask 261120   ;;  %s4913_s30 = sld [smem:[#allocation5 + $0x1]]  ;;  %s4918_s19 = sld [smem:[#allocation5 + $0x2]] }
  0x83   :  { %v187_v15 = vsel %vm186_vm2, %v184_v14, 0.0  ;;  %vm1576_vm13 = vcmask 58368   ;;  %vm1676_vm14 = vcmask 654336   ;;  %vm1785_vm15 = vcmask 523264   ;;  %s4923_s17 = sld [smem:[#allocation5 + $0x3]]  ;;  %s4928_s2 = sld [smem:[#allocation5 + $0x4]] }
  0x84   :  { %s4938_s1 = sld [smem:[#allocation5 + $0x6]]  ;;  %s6616_s21 = smov 48  }
  0x85   :  { %5813 = vmatpush3.bf16.msra.mxu0 %v6794_v8  ;;  %5822 = vmatpush3.bf16.msra.mxu1 %v6794_v8  ;;  %s6617_s7 = smov 96  }
  0x86   :  { %5814 = vmatprep.subr.bf16.mxu0 %v6606_v0  ;;  %5823 = vmatprep.subr.bf16.mxu1 %v6606_v0 }
  0x88   :  { %p2280_p12 = scmp.gt.s32.totalorder %s4913_s30, 0  ;;  %p2704_p13 = scmp.gt.s32.totalorder %s4918_s19, 0 }
  0x89   :  { %5816 = vmatpush3.bf16.msra.mxu0 %v6804_v13  ;;  %5825 = vmatpush3.bf16.msra.mxu1 %v6804_v13  ;;  %p3130_p0 = scmp.gt.s32.totalorder %s4923_s17, 0  ;;  %p3556_p1 = scmp.gt.s32.totalorder %s4928_s2, 0 }
  0x8a   :  { %5826 = vmatprep.subr.bf16.mxu0 %v6606_v0  ;;  %5835 = vmatprep.subr.bf16.mxu1 %v6606_v0  ;;  %s2281_s3 = scalar_select %p2280_p12, 1, 0 }
  0x8b   :  { %s2705_s20 = scalar_select %p2704_p13, 1, 0 }
  0x8c   :  { %5234 = vmatmul.mubr.msk.f32.vlgmr.msra.gmra.mrb[0].mxu0 %vm188_vm3, %v187_v15  ;;  %s3131_s13 = scalar_select %p3130_p0, 1, 0 }
  0x8d   :  { %5828 = vmatpush3.bf16.msra.mxu0 %v6791_v5  ;;  %5263 = vmatprep.mubr.msk.f32.mxu0 %vm6607_vm0, %v6608_v1  ;;  %s3557_s0 = scalar_select %p3556_p1, 1, 0 }
  0x8e   :  { %5829 = vmatprep.subr.bf16.mxu0 %v6606_v0  ;;  %p4408_p3 = scmp.gt.s32.totalorder %s4938_s1, 0 }
  0x90   :  { %s4409_s15 = scalar_select %p4408_p3, 1, 0 }
  0x91   :  { %5831 = vmatpush3.bf16.msra.mxu0 %v6794_v8 }
  0x92   :  { %5832 = vmatprep.subr.bf16.mxu0 %v6606_v0 }
  0x95   :  { %5834 = vmatpush3.bf16.msra.mxu0 %v6804_v13 }
  0x96   :  { %5844 = vmatprep.subr.bf16.mxu0 %v6606_v0 }
 0x15f   :  { %v258_v17 = vpop.f32.mrb[0].mxu0 }
 0x160   :  { %v259_v18 = vadd.f32 %v6829_v16, %v258_v17  ;;  %v5235_v19 = vpop.f32.mrb[1].mxu0 }
 0x162   :  { %6200 = vtanh.f32 %v259_v18  ;;  %v4887_v21 = vmul.f32 -1.442695, %v259_v18 }
 0x164   :  { %6202 = vpow2.f32 %v4887_v21 }
 0x16c   :  { %v6201_v20 = vpop.eup %6200 }
 0x16d   :  { %271 = vrot.lane.b32.xlu0 %v6201_v20, %s6609_s24  ;;  %v617_v20 = vsel %vm616_vm6, %v6798_v11, %v6801_v12 }
 0x16e   :  { %v6203_v22 = vpop.eup %6202 }
 0x16f   :  { %v265_v23 = vadd.f32 1.0, %v6203_v22 }
 0x171   :  { %6204 = vrcp.f32 %v265_v23 }
 0x17b   :  { %v6205_v24 = vpop.eup %6204 }
 0x17c   :  { %v269_v27 = vmul.f32 0.0, %v6205_v24 }
 0x1df   :  { %v272_v25 = vpop.permute.xlu0 %271 }
 0x1e0   :  { %v274_v26 = vmul.f32 %v6205_v24, %v272_v25 }
 0x1e2   :  { %276 = vrot.lane.b32.xlu0 %v274_v26, %s6609_s24 }
 0x254   :  { %v277_v28 = vpop.permute.xlu0 %276 }
 0x255   :  { %v279_v29 = vadd.f32 %v277_v28, %v269_v27 }
 0x257   :  { %6206 = vtanh.f32 %v279_v29 }
 0x261   :  { %v6207_v30 = vpop.eup %6206 }
 0x262   :  { %282 = vrot.lane.b32.xlu1 %v6207_v30, %s6609_s24 }
 0x2d4   :  { %v283_v31 = vpop.permute.xlu1 %282 }
 0x2d5   :  { %v6835_v32 = vmul.f32 %v6205_v24, %v283_v31 }
 0x2d7   :  { %v329_v33 = vrot.slane %v6835_v32, 7 }
 0x2d9   :  { %330 = vrot.lane.b32.xlu1 %v329_v33, %s6610_s4 }
 0x34b   :  { %v331_v35 = vpop.permute.xlu1 %330 }
 0x34c   :  { %v333_v36 = vsel %vm186_vm2, %v327_v34, %v331_v35 }
 0x34d   :  { %v335_v37 = vrot.slane %v333_v36, 1 }
 0x34f   :  { %5249 = vmatmul.mubr.msk.f32.vlgmr.msra.gmra.mrb[0].mxu1 %vm188_vm3, %v335_v37 }
 0x350   :  { %5837 = vmatpush3.bf16.msra.mxu1 %v6791_v5  ;;  %5278 = vmatprep.mubr.msk.f32.mxu1 %vm6607_vm0, %v6608_v1 }
 0x351   :  { %5838 = vmatprep.subr.bf16.mxu1 %v6606_v0 }
 0x354   :  { %5840 = vmatpush3.bf16.msra.mxu1 %v6794_v8 }
 0x355   :  { %5841 = vmatprep.subr.bf16.mxu1 %v6606_v0 }
 0x358   :  { %5843 = vmatpush3.bf16.msra.mxu1 %v6804_v13 }
 0x359   :  { %5853 = vmatprep.subr.bf16.mxu1 %v6606_v0 }
 0x422   :  { %v404_v38 = vpop.f32.mrb[0].mxu1 }
 0x423   :  { %v405_v39 = vadd.f32 %v6829_v16, %v404_v38  ;;  %v5250_v40 = vpop.f32.mrb[1].mxu1 }
 0x425   :  { %6208 = vtanh.f32 %v405_v39  ;;  %v4889_v42 = vmul.f32 -1.442695, %v405_v39 }
 0x427   :  { %6210 = vpow2.f32 %v4889_v42  ;;  %v762_v42 = vsel %vm761_vm7, %v6798_v11, %v6801_v12 }
 0x42f   :  { %v6209_v41 = vpop.eup %6208 }
 0x430   :  { %417 = vrot.lane.b32.xlu0 %v6209_v41, %s6609_s24 }
 0x431   :  { %v6211_v43 = vpop.eup %6210 }
 0x432   :  { %v411_v44 = vadd.f32 1.0, %v6211_v43 }
 0x434   :  { %6212 = vrcp.f32 %v411_v44 }
 0x43e   :  { %v6213_v45 = vpop.eup %6212 }
 0x43f   :  { %v415_v48 = vmul.f32 %v6213_v45, %v279_v29 }
 0x4a2   :  { %v418_v46 = vpop.permute.xlu0 %417 }
 0x4a3   :  { %v420_v47 = vmul.f32 %v6213_v45, %v418_v46 }
 0x4a5   :  { %422 = vrot.lane.b32.xlu1 %v420_v47, %s6609_s24 }
 0x517   :  { %v423_v49 = vpop.permute.xlu1 %422 }
 0x518   :  { %v425_v50 = vadd.f32 %v423_v49, %v415_v48 }
 0x51a   :  { %6214 = vtanh.f32 %v425_v50 }
 0x524   :  { %v6215_v51 = vpop.eup %6214 }
 0x525   :  { %428 = vrot.lane.b32.xlu0 %v6215_v51, %s6609_s24 }
 0x597   :  { %v429_v52 = vpop.permute.xlu0 %428 }
 0x598   :  { %v6856_v53 = vmul.f32 %v6213_v45, %v429_v52 }
 0x59a   :  { %v474_v54 = vrot.slane %v6856_v53, 6 }
 0x59c   :  { %475 = vrot.lane.b32.xlu1 %v474_v54, %s6610_s4 }
 0x60e   :  { %v476_v56 = vpop.permute.xlu1 %475 }
 0x60f   :  { %v478_v57 = vsel %vm186_vm2, %v472_v55, %v476_v56 }
 0x610   :  { %v480_v58 = vrot.slane %v478_v57, 2 }
 0x612   :  { %5264 = vmatmul.mubr.msk.f32.vlgmr.msra.gmra.mrb[2].mxu0 %vm188_vm3, %v480_v58 }
 0x613   :  { %5846 = vmatpush3.bf16.msra.mxu0 %v6791_v5  ;;  %5293 = vmatprep.mubr.msk.f32.mxu0 %vm6607_vm0, %v6608_v1 }
 0x614   :  { %5847 = vmatprep.subr.bf16.mxu0 %v6606_v0 }
 0x617   :  { %5849 = vmatpush3.bf16.msra.mxu0 %v6794_v8 }
 0x618   :  { %5850 = vmatprep.subr.bf16.mxu0 %v6606_v0 }
 0x61b   :  { %5852 = vmatpush3.bf16.msra.mxu0 %v6804_v13 }
 0x61c   :  { %5862 = vmatprep.subr.bf16.mxu0 %v6606_v0 }
 0x6e5   :  { %v549_v59 = vpop.f32.mrb[2].mxu0 }
 0x6e6   :  { %v550_v60 = vadd.f32 %v6829_v16, %v549_v59  ;;  %v5265_v61 = vpop.f32.mrb[3].mxu0 }
 0x6e8   :  { %6216 = vtanh.f32 %v550_v60  ;;  %v4891_v63 = vmul.f32 -1.442695, %v550_v60 }
 0x6ea   :  { %6218 = vpow2.f32 %v4891_v63 }
 0x6f2   :  { %v6217_v62 = vpop.eup %6216 }
 0x6f3   :  { %562 = vrot.lane.b32.xlu0 %v6217_v62, %s6609_s24 }
 0x6f4   :  { %v6219_v2 = vpop.eup %6218 }
 0x6f5   :  { %v556_v3 = vadd.f32 1.0, %v6219_v2  ;;  %v907_v2 = vsel %vm906_vm8, %v6798_v11, %v6801_v12 }
 0x6f7   :  { %6220 = vrcp.f32 %v556_v3 }
 0x701   :  { %v6221_v4 = vpop.eup %6220 }
 0x702   :  { %v560_v9 = vmul.f32 %v6221_v4, %v425_v50 }
 0x765   :  { %v563_v6 = vpop.permute.xlu0 %562 }
 0x766   :  { %v565_v7 = vmul.f32 %v6221_v4, %v563_v6 }
 0x768   :  { %567 = vrot.lane.b32.xlu1 %v565_v7, %s6609_s24 }
 0x7da   :  { %v568_v10 = vpop.permute.xlu1 %567 }
 0x7db   :  { %v570_v14 = vadd.f32 %v568_v10, %v560_v9 }
 0x7dd   :  { %6222 = vtanh.f32 %v570_v14 }
 0x7e7   :  { %v6223_v15 = vpop.eup %6222 }
 0x7e8   :  { %573 = vrot.lane.b32.xlu0 %v6223_v15, %s6609_s24 }
 0x85a   :  { %v574_v17 = vpop.permute.xlu0 %573 }
 0x85b   :  { %v6877_v18 = vmul.f32 %v6221_v4, %v574_v17 }
 0x85d   :  { %v619_v19 = vrot.slane %v6877_v18, 5 }
 0x85f   :  { %620 = vrot.lane.b32.xlu1 %v619_v19, %s6610_s4 }
 0x8d1   :  { %v621_v21 = vpop.permute.xlu1 %620 }
 0x8d2   :  { %v623_v22 = vsel %vm186_vm2, %v617_v20, %v621_v21 }
 0x8d3   :  { %v625_v23 = vrot.slane %v623_v22, 3 }
 0x8d5   :  { %5279 = vmatmul.mubr.msk.f32.vlgmr.msra.gmra.mrb[2].mxu1 %vm188_vm3, %v625_v23 }
 0x8d6   :  { %5855 = vmatpush3.bf16.msra.mxu1 %v6791_v5  ;;  %5308 = vmatprep.mubr.msk.f32.mxu1 %vm6607_vm0, %v6608_v1 }
 0x8d7   :  { %5856 = vmatprep.subr.bf16.mxu1 %v6606_v0 }
 0x8da   :  { %5858 = vmatpush3.bf16.msra.mxu1 %v6794_v8 }
 0x8db   :  { %5859 = vmatprep.subr.bf16.mxu1 %v6606_v0 }
 0x8de   :  { %5861 = vmatpush3.bf16.msra.mxu1 %v6804_v13 }
 0x8df   :  { %5871 = vmatprep.subr.bf16.mxu1 %v6606_v0 }
 0x9a8   :  { %v694_v24 = vpop.f32.mrb[2].mxu1 }
 0x9a9   :  { %v695_v25 = vadd.f32 %v6829_v16, %v694_v24  ;;  %v5280_v26 = vpop.f32.mrb[3].mxu1 }
 0x9ab   :  { %6224 = vtanh.f32 %v695_v25  ;;  %v4893_v28 = vmul.f32 -1.442695, %v695_v25 }
 0x9ad   :  { %6226 = vpow2.f32 %v4893_v28 }
 0x9b5   :  { %v6225_v27 = vpop.eup %6224 }
 0x9b6   :  { %707 = vrot.lane.b32.xlu0 %v6225_v27, %s6609_s24  ;;  %v1052_v27 = vsel %vm1051_vm9, %v6798_v11, %v6801_v12 }
 0x9b7   :  { %v6227_v29 = vpop.eup %6226 }
 0x9b8   :  { %v701_v30 = vadd.f32 1.0, %v6227_v29 }
 0x9ba   :  { %6228 = vrcp.f32 %v701_v30 }
 0x9c4   :  { %v6229_v31 = vpop.eup %6228 }
 0x9c5   :  { %v705_v35 = vmul.f32 %v6229_v31, %v570_v14 }
 0xa28   :  { %v708_v33 = vpop.permute.xlu0 %707 }
 0xa29   :  { %v710_v34 = vmul.f32 %v6229_v31, %v708_v33 }
 0xa2b   :  { %712 = vrot.lane.b32.xlu1 %v710_v34, %s6609_s24 }
 0xa9d   :  { %v713_v36 = vpop.permute.xlu1 %712 }
 0xa9e   :  { %v715_v37 = vadd.f32 %v713_v36, %v705_v35 }
 0xaa0   :  { %6230 = vtanh.f32 %v715_v37 }
 0xaaa   :  { %v6231_v38 = vpop.eup %6230 }
 0xaab   :  { %718 = vrot.lane.b32.xlu0 %v6231_v38, %s6609_s24 }
 0xb1d   :  { %v719_v39 = vpop.permute.xlu0 %718 }
 0xb1e   :  { %v6898_v40 = vmul.f32 %v6229_v31, %v719_v39 }
 0xb20   :  { %v764_v41 = vrot.slane %v6898_v40, 4 }
 0xb22   :  { %765 = vrot.lane.b32.xlu1 %v764_v41, %s6610_s4 }
 0xb94   :  { %v766_v43 = vpop.permute.xlu1 %765 }
 0xb95   :  { %v768_v44 = vsel %vm186_vm2, %v762_v42, %v766_v43 }
 0xb96   :  { %v770_v45 = vrot.slane %v768_v44, 4 }
 0xb98   :  { %5294 = vmatmul.mubr.msk.f32.vlgmr.msra.gmra.mrb[4].mxu0 %vm188_vm3, %v770_v45 }
 0xb99   :  { %5864 = vmatpush3.bf16.msra.mxu0 %v6791_v5  ;;  %5323 = vmatprep.mubr.msk.f32.mxu0 %vm6607_vm0, %v6608_v1 }
 0xb9a   :  { %5865 = vmatprep.subr.bf16.mxu0 %v6606_v0 }
 0xb9d   :  { %5867 = vmatpush3.bf16.msra.mxu0 %v6794_v8 }
 0xb9e   :  { %5868 = vmatprep.subr.bf16.mxu0 %v6606_v0 }
 0xba1   :  { %5870 = vmatpush3.bf16.msra.mxu0 %v6804_v13 }
 0xc6b   :  { %v839_v46 = vpop.f32.mrb[4].mxu0 }
 0xc6c   :  { %v840_v47 = vadd.f32 %v6829_v16, %v839_v46  ;;  %v5295_v48 = vpop.f32.mrb[5].mxu0 }
 0xc6e   :  { %6232 = vtanh.f32 %v840_v47  ;;  %v4895_v50 = vmul.f32 -1.442695, %v840_v47 }
 0xc70   :  { %6234 = vpow2.f32 %v4895_v50 }
 0xc78   :  { %v6233_v49 = vpop.eup %6232 }
 0xc79   :  { %852 = vrot.lane.b32.xlu0 %v6233_v49, %s6609_s24 }
 0xc7a   :  { %v6235_v51 = vpop.eup %6234 }
 0xc7b   :  { %v846_v52 = vadd.f32 1.0, %v6235_v51 }
 0xc7d   :  { %6236 = vrcp.f32 %v846_v52 }
 0xc87   :  { %v6237_v54 = vpop.eup %6236 }
 0xc88   :  { %v850_v57 = vmul.f32 %v6237_v54, %v715_v37 }
 0xceb   :  { %v853_v55 = vpop.permute.xlu0 %852 }
 0xcec   :  { %v855_v56 = vmul.f32 %v6237_v54, %v853_v55 }
 0xcee   :  { %857 = vrot.lane.b32.xlu1 %v855_v56, %s6609_s24 }
 0xd60   :  { %v858_v58 = vpop.permute.xlu1 %857 }
 0xd61   :  { %v860_v59 = vadd.f32 %v858_v58, %v850_v57 }
 0xd63   :  { %6238 = vtanh.f32 %v860_v59 }
 0xd6d   :  { %v6239_v60 = vpop.eup %6238 }
 0xd6e   :  { %863 = vrot.lane.b32.xlu0 %v6239_v60, %s6609_s24 }
 0xde0   :  { %v864_v61 = vpop.permute.xlu0 %863 }
 0xde1   :  { %v6918_v62 = vmul.f32 %v6237_v54, %v864_v61  ;;  %v6611_v61 = vmov 1966171168  }
 0xde3   :  { %v909_v63 = vrot.slane %v6918_v62, 3 }
 0xde5   :  { %910 = vrot.lane.b32.xlu1 %v909_v63, %s6610_s4  ;;  %v288_v63 = vunpack.c.l.s4 %v6611_v61 }
 0xe57   :  { %v911_v3 = vpop.permute.xlu1 %910 }
 0xe58   :  { %v913_v4 = vsel %vm186_vm2, %v907_v2, %v911_v3  ;;  %v290_v2 = vlaneseq }
 0xe59   :  { %v915_v6 = vrot.slane %v913_v4, 5  ;;  %v289_v4 = vunpack.c.0.s8 %v288_v63 }
 0xe5b   :  { %5309 = vmatmul.mubr.msk.f32.vlgmr.msra.gmra.mrb[4].mxu1 %vm188_vm3, %v915_v6  ;;  %v6966_v6 = vshrl.u32 %v290_v2, 7 }
 0xe5c   :  { %5873 = vmatpush3.bf16.msra.mxu1 %v6791_v5  ;;  %5338 = vmatprep.mubr.msk.f32.mxu1 %vm6607_vm0, %v6608_v1 }
 0xe5d   :  { %5874 = vmatprep.subr.bf16.mxu1 %v6606_v0 }
 0xe60   :  { %5876 = vmatpush3.bf16.msra.mxu1 %v6794_v8 }
 0xe61   :  { %5877 = vmatprep.subr.bf16.mxu1 %v6606_v0 }
 0xe64   :  { %5879 = vmatpush3.bf16.msra.mxu1 %v6804_v13 }
 0xe65   :  { %5888 = vmatprep.subr.bf16.mxu1 %v6606_v0 }
 0xf2e   :  { %v984_v7 = vpop.f32.mrb[4].mxu1 }
 0xf2f   :  { %v985_v9 = vadd.f32 %v6829_v16, %v984_v7  ;;  %v5310_v10 = vpop.f32.mrb[5].mxu1  ;;  %v6969_v7 = vsub.s32 %v289_v4, %v6966_v6 }
 0xf31   :  { %6240 = vtanh.f32 %v985_v9  ;;  %v4897_v5 = vmul.f32 -1.442695, %v985_v9 }
 0xf33   :  { %6242 = vpow2.f32 %v4897_v5  ;;  %v584_v5 = vrot.slane %v6877_v18, %v6969_v7 }
 0xf3b   :  { %v6241_v14 = vpop.eup %6240 }
 0xf3c   :  { %997 = vrot.lane.b32.xlu0 %v6241_v14, %s6609_s24 }
 0xf3d   :  { %v6243_v15 = vpop.eup %6242 }
 0xf3e   :  { %v991_v17 = vadd.f32 1.0, %v6243_v15 }
 0xf40   :  { %6244 = vrcp.f32 %v991_v17  ;;  %v6980_v17 = vsub.s32 0, %v6966_v6 }
 0xf4a   :  { %v6245_v8 = vpop.eup %6244 }
 0xf4b   :  { %v995_v13 = vmul.f32 %v6245_v8, %v860_v59 }
 0xfae   :  { %v998_v19 = vpop.permute.xlu0 %997 }
 0xfaf   :  { %v1000_v20 = vmul.f32 %v6245_v8, %v998_v19 }
 0xfb1   :  { %1002 = vrot.lane.b32.xlu1 %v1000_v20, %s6609_s24 }
0x1023   :  { %v1003_v21 = vpop.permute.xlu1 %1002 }
0x1024   :  { %v1005_v22 = vadd.f32 %v1003_v21, %v995_v13 }
0x1026   :  { %6246 = vtanh.f32 %v1005_v22 }
0x1030   :  { %v6247_v23 = vpop.eup %6246 }
0x1031   :  { %1008 = vrot.lane.b32.xlu0 %v6247_v23, %s6609_s24 }
0x10a3   :  { %v1009_v24 = vpop.permute.xlu0 %1008 }
0x10a4   :  { %v6939_v25 = vmul.f32 %v6245_v8, %v1009_v24  ;;  %v592_v8 = vrot.slane %v584_v5, %v6969_v7 }
0x10a6   :  { %v1054_v26 = vrot.slane %v6939_v25, 2  ;;  %v603_v13 = vrot.slane %v592_v8, %v6980_v17  ;;  %v1347_v8 = vld [vmem:[%s8044_s5] sm:$0xff] }
0x10a8   :  { %1055 = vrot.lane.b32.xlu1 %v1054_v26, %s6610_s4 }
0x111a   :  { %v1056_v28 = vpop.permute.xlu1 %1055 }
0x111b   :  { %v1058_v29 = vsel %vm186_vm2, %v1052_v27, %v1056_v28 }
0x111c   :  { %v1060_v30 = vrot.slane %v1058_v29, 6 }
0x111e   :  { %5324 = vmatmul.mubr.msk.f32.vlgmr.msra.gmra.mrb[6].mxu0 %vm188_vm3, %v1060_v30 }
0x11f1   :  { %v1129_v31 = vpop.f32.mrb[6].mxu0 }
0x11f2   :  { %v1130_v33 = vadd.f32 %v6829_v16, %v1129_v31  ;;  %v5325_v34 = vpop.f32.mrb[7].mxu0 }
0x11f4   :  { %6248 = vtanh.f32 %v1130_v33  ;;  %v4899_v36 = vmul.f32 -1.442695, %v1130_v33 }
0x11f6   :  { %6250 = vpow2.f32 %v4899_v36 }
0x11fe   :  { %v6249_v35 = vpop.eup %6248 }
0x11ff   :  { %1142 = vrot.lane.b32.xlu0 %v6249_v35, %s6609_s24 }
0x1200   :  { %v6251_v37 = vpop.eup %6250 }
0x1201   :  { %v1136_v38 = vadd.f32 1.0, %v6251_v37 }
0x1203   :  { %6252 = vrcp.f32 %v1136_v38 }
0x120d   :  { %v6253_v39 = vpop.eup %6252 }
0x120e   :  { %v1140_v43 = vmul.f32 %v6253_v39, %v1005_v22 }
0x1271   :  { %v1143_v41 = vpop.permute.xlu0 %1142 }
0x1272   :  { %v1145_v42 = vmul.f32 %v6253_v39, %v1143_v41 }
0x1274   :  { %1147 = vrot.lane.b32.xlu1 %v1145_v42, %s6609_s24  ;;  %v439_v42 = vrot.slane %v6856_v53, %v6969_v7 }
0x12e6   :  { %v1148_v44 = vpop.permute.xlu1 %1147 }
0x12e7   :  { %v6951_v45 = vadd.f32 %v1148_v44, %v1140_v43  ;;  %v447_v44 = vrot.slane %v439_v42, %v6969_v7 }
0x12e9   :  { %6254 = vtanh.f32 %v6951_v45 }
0x12f3   :  { %v6255_v46 = vpop.eup %6254 }
0x12f4   :  { %1153 = vrot.lane.b32.xlu0 %v6255_v46, %s6609_s24 }
0x1366   :  { %v1154_v47 = vpop.permute.xlu0 %1153 }
0x1367   :  { %v1156_v48 = vmul.f32 %v6253_v39, %v1154_v47 }
0x1369   :  { %v1198_v49 = vrot.slane %v1156_v48, 1  ;;  %v1164_v18 = vrot.slane %v1156_v48, %v6969_v7 }
0x136b   :  { %1199 = vrot.lane.b32.xlu1 %v1198_v49, %s6610_s4  ;;  %v1172_v22 = vrot.slane %v1164_v18, %v6969_v7  ;;  %v1165_v30 = vcombine.high %v1164_v18, %v1164_v18  ;;  %v1019_v49 = vrot.slane %v6939_v25, %v6969_v7  ;;  %v1349_v18 = vld [vmem:[%s8044_s5 + $0x10] sm:$0xff] }
0x136d   :  { %v1183_v24 = vrot.slane %v1172_v22, %v6980_v17  ;;  %v1179_v35 = vrot.slane %v1165_v30, %v6969_v7  ;;  %v1020_v61 = vcombine.high %v1019_v49, %v1019_v49 }
0x136f   :  { %v1187_v36 = vrot.slane %v1179_v35, %v6980_v17 }
0x13dd   :  { %v1200_v50 = vpop.permute.xlu1 %1199 }
0x13de   :  { %v1202_v51 = vsel %vm186_vm2, %v6801_v12, %v1200_v50  ;;  %v1203_v52 = vsel %vm186_vm2, %v6798_v11, %v1200_v50  ;;  %v458_v50 = vrot.slane %v447_v44, %v6980_v17 }
0x13df   :  { %v1207_v54 = vrot.slane %v1202_v51, 7  ;;  %v1208_v55 = vrot.slane %v1203_v52, 7  ;;  %v440_v51 = vcombine.high %v439_v42, %v439_v42 }
0x13e1   :  { %v1209_v56 = vsel %vm1206_vm10, %v1207_v54, %v1208_v55 }
0x13e2   :  { %5339 = vmatmul.mubr.msk.f32.vlgmr.msra.gmra.mrb[6].mxu1 %vm188_vm3, %v1209_v56 }
0x13e3   :  { %5360 = vmatprep.mubr.msk.f32.mxu1 %vm6607_vm0, %v6608_v1 }
0x14b5   :  { %v1278_v57 = vpop.f32.mrb[6].mxu1 }
0x14b6   :  { %v1279_v58 = vadd.f32 %v6829_v16, %v1278_v57  ;;  %v5340_v59 = vpop.f32.mrb[7].mxu1  ;;  %v293_v16 = vrot.slane %v6835_v32, %v6969_v7  ;;  %v874_v32 = vrot.slane %v6918_v62, %v6969_v7  ;;  %v585_v62 = vcombine.high %v584_v5, %v584_v5 }
0x14b7   :  { %v454_v57 = vrot.slane %v440_v51, %v6969_v7  ;;  %v155_v59 = vld [vmem:[#allocation12 + $0x8] sm:$0xff]  ;;  %v1034_v5 = vrot.slane %v1020_v61, %v6969_v7 }
0x14b8   :  { %6256 = vtanh.f32 %v1279_v58  ;;  %v4901_v12 = vmul.f32 -1.442695, %v1279_v58  ;;  %v301_v14 = vrot.slane %v293_v16, %v6969_v7  ;;  %v882_v20 = vrot.slane %v874_v32, %v6969_v7  ;;  %v154_v58 = vld [vmem:[#allocation12] sm:$0xff] }
0x14b9   :  { %v294_v21 = vcombine.high %v293_v16, %v293_v16  ;;  %v875_v27 = vcombine.high %v874_v32, %v874_v32  ;;  %v599_v29 = vrot.slane %v585_v62, %v6969_v7  ;;  %v1348_v32 = vld [vmem:[%s8044_s5 + $0x8] sm:$0xff] }
0x14ba   :  { %6258 = vpow2.f32 %v4901_v12  ;;  %v312_v19 = vrot.slane %v301_v14, %v6980_v17  ;;  %v893_v23 = vrot.slane %v882_v20, %v6980_v17  ;;  %v7037_v12 = vpack.c.bf16 %v155_v59, %v154_v58 }
0x14bb   :  { %v308_v26 = vrot.slane %v294_v21, %v6969_v7  ;;  %v607_v31 = vrot.slane %v599_v29, %v6980_v17  ;;  %v889_v33 = vrot.slane %v875_v27, %v6969_v7 }
0x14bc   :  { %5890 = vmatpush3.bf16.msra.mxu1 %v7037_v12 }
0x14bd   :  { %v316_v28 = vrot.slane %v308_v26, %v6980_v17  ;;  %v897_v34 = vrot.slane %v889_v33, %v6980_v17  ;;  %5891 = vmatprep.subr.bf16.mxu1 %v6606_v0 }
0x14c2   :  { %v6257_v60 = vpop.eup %6256 }
0x14c3   :  { %1291 = vrot.lane.b32.xlu0 %v6257_v60, %s6609_s24  ;;  %v156_v60 = vld [vmem:[#allocation12 + $0x10] sm:$0xff] }
0x14c4   :  { %v6259_v11 = vpop.eup %6258 }
0x14c5   :  { %v1285_v3 = vadd.f32 1.0, %v6259_v11  ;;  %v157_v11 = vld [vmem:[#allocation12 + $0x18] sm:$0xff] }
0x14c6   :  { %v7042_v16 = vpack.c.bf16 %v157_v11, %v156_v60  ;;  %v1565_v11 = vand.u32 127, %v290_v2  ;;  %v7130_v2 = vsub.s32 1, %v6966_v6 }
0x14c7   :  { %6260 = vrcp.f32 %v1285_v3  ;;  %v462_v3 = vrot.slane %v454_v57, %v6980_v17 }
0x14c8   :  { %5893 = vmatpush3.bf16.msra.mxu1 %v7042_v16  ;;  %v7123_v61 = vsub.s32 %v1565_v11, %v6966_v6 }
0x14c9   :  { %5909 = vmatprep.subr.bf16.mxu1 %v6606_v0 }
0x14d1   :  { %v6973_v9 = vpop.eup %6260 }
0x14d2   :  { %v1289_v37 = vmul.f32 %v6973_v9, %v6951_v45  ;;  %v729_v45 = vrot.slane %v6898_v40, %v6969_v7  ;;  %v1027_v40 = vrot.slane %v1019_v49, %v6969_v7 }
0x14d4   :  { %v737_v48 = vrot.slane %v729_v45, %v6969_v7  ;;  %v730_v55 = vcombine.high %v729_v45, %v729_v45  ;;  %v1038_v25 = vrot.slane %v1027_v40, %v6980_v17 }
0x14d6   :  { %v748_v54 = vrot.slane %v737_v48, %v6980_v17  ;;  %v744_v4 = vrot.slane %v730_v55, %v6969_v7  ;;  %v7115_v55 = vld [vmem:[#allocation14] ss:$0 sm:$0xff] }
0x14d8   :  { %v752_v14 = vrot.slane %v744_v4, %v6980_v17 }
0x1535   :  { %v1292_v10 = vpop.permute.xlu0 %1291 }
0x1536   :  { %v1294_v15 = vmul.f32 %v6973_v9, %v1292_v10 }
0x1538   :  { %1296 = vrot.lane.b32.xlu1 %v1294_v15, %s6609_s24  ;;  %v1042_v15 = vrot.slane %v1034_v5, %v6980_v17 }
0x153c   :  { %317 = vrot.lane.b32.xlu1 %v312_v19, %s6612_s25  ;;  %v5880_v19 = vpack.c.bf16 %v1348_v32, %v1347_v8 }
0x153e   :  { %5881 = vmatprep.subr.bf16.mxu0 %v5880_v19 }
0x153f   :  { %5883 = vmatpush3.bf16.msra.mxu0 %v5880_v19 }
0x1540   :  { %608 = vrot.lane.b32.xlu1 %v603_v13, %s6612_s25  ;;  %v1350_v13 = vld [vmem:[%s8044_s5 + $0x18] sm:$0xff]  ;;  %s6614_s5 = smov 112  }
0x1541   :  { %v5884_v22 = vpack.c.bf16 %v1350_v13, %v1349_v18 }
0x1543   :  { %5885 = vmatprep.subr.bf16.mxu0 %v5884_v22 }
0x1544   :  { %898 = vrot.lane.b32.xlu1 %v893_v23, %s6612_s25  ;;  %5887 = vmatpush3.bf16.msra.mxu0 %v5884_v22 }
0x1545   :  { %5894 = vmatprep.subr.bf16.mxu0 %v6606_v0 }
0x1548   :  { %1188 = vrot.lane.b32.xlu1 %v1183_v24, %s6612_s25 }
0x154c   :  { %319 = vrot.lane.b32.xlu1 %v316_v28, %s6612_s25 }
0x1550   :  { %610 = vrot.lane.b32.xlu1 %v607_v31, %s6612_s25 }
0x1554   :  { %900 = vrot.lane.b32.xlu1 %v897_v34, %s6612_s25 }
0x1558   :  { %1190 = vrot.lane.b32.xlu1 %v1187_v36, %s6612_s25 }
0x15aa   :  { %v1297_v38 = vpop.permute.xlu1 %1296 }
0x15ab   :  { %v7011_v39 = vadd.f32 %v1297_v38, %v1289_v37 }
0x15ad   :  { %6262 = vtanh.f32 %v7011_v39 }
0x15ae   :  { %v318_v41 = vpop.permute.xlu1 %317 }
0x15af   :  { %324 = vst.msk [vmem:[#allocation2] sm:$0x1] %vm323_vm11, %v318_v41 }
0x15b2   :  { %v609_v43 = vpop.permute.xlu1 %608 }
0x15b3   :  { %614 = vst.msk [vmem:[#allocation2 + $0x2] sm:$0x1] %vm323_vm11, %v609_v43 }
0x15b6   :  { %v899_v46 = vpop.permute.xlu1 %898 }
0x15b7   :  { %v6263_v47 = vpop.eup %6262  ;;  %904 = vst.msk [vmem:[#allocation2 + $0x4] sm:$0x1] %vm323_vm11, %v899_v46 }
0x15b8   :  { %1302 = vrot.lane.b32.xlu0 %v6263_v47, %s6609_s24 }
0x15ba   :  { %v1189_v53 = vpop.permute.xlu1 %1188 }
0x15bb   :  { %1194 = vst.msk [vmem:[#allocation2 + $0x6] sm:$0x1] %vm323_vm11, %v1189_v53 }
0x15bc   :  { %463 = vrot.lane.b32.xlu0 %v458_v50, %s6612_s25 }
0x15be   :  { %v320_v52 = vpop.permute.xlu1 %319 }
0x15bf   :  { %325 = vst.msk [vmem:[#allocation2 + $0x8] sm:$0x1] %vm323_vm11, %v320_v52 }
0x15c0   :  { %753 = vrot.lane.b32.xlu0 %v748_v54, %s6612_s25 }
0x15c2   :  { %v611_v56 = vpop.permute.xlu1 %610 }
0x15c3   :  { %615 = vst.msk [vmem:[#allocation2 + $0xa] sm:$0x1] %vm323_vm11, %v611_v56 }
0x15c4   :  { %1043 = vrot.lane.b32.xlu0 %v1038_v25, %s6612_s25 }
0x15c6   :  { %v901_v63 = vpop.permute.xlu1 %900 }
0x15c7   :  { %905 = vst.msk [vmem:[#allocation2 + $0xc] sm:$0x1] %vm323_vm11, %v901_v63 }
0x15c8   :  { %465 = vrot.lane.b32.xlu0 %v462_v3, %s6612_s25 }
0x15ca   :  { %v1191_v10 = vpop.permute.xlu1 %1190 }
0x15cb   :  { %1195 = vst.msk [vmem:[#allocation2 + $0xe] sm:$0x1] %vm323_vm11, %v1191_v10 }
0x15cc   :  { %755 = vrot.lane.b32.xlu0 %v752_v14, %s6612_s25 }
0x15d0   :  { %1045 = vrot.lane.b32.xlu0 %v1042_v15, %s6612_s25  ;;  %v6613_v15 = vmov 0  }
0x15d1   :  { %6199 = vset.pattern.permute.xlu1 %v6613_v15  ;;  %6198 = vset.pattern.permute.xlu0 %v6613_v15 }
0x162a   :  { %v1303_v20 = vpop.permute.xlu0 %1302 }
0x162b   :  { %v7068_v21 = vmul.f32 %v6973_v9, %v1303_v20 }
0x162d   :  { %v1313_v23 = vrot.slane %v7068_v21, %v6969_v7  ;;  %1435 = vrot.lane.b32.xlu1 %v7068_v21, %s6612_s25 }
0x162e   :  { %v464_v62 = vpop.permute.xlu0 %463 }
0x162f   :  { %469 = vst.msk [vmem:[#allocation2 + $0x1] sm:$0x1] %vm323_vm11, %v464_v62  ;;  %v1321_v24 = vrot.slane %v1313_v23, %v6969_v7  ;;  %v1314_v26 = vcombine.high %v1313_v23, %v1313_v23 }
0x1631   :  { %v1332_v9 = vrot.slane %v1321_v24, %v6980_v17  ;;  %v1328_v27 = vrot.slane %v1314_v26, %v6969_v7 }
0x1632   :  { %v754_v28 = vpop.permute.xlu0 %753 }
0x1633   :  { %759 = vst.msk [vmem:[#allocation2 + $0x3] sm:$0x1] %vm323_vm11, %v754_v28  ;;  %1337 = vrot.lane.b32.xlu0 %v1332_v9, %s6612_s25  ;;  %v1336_v29 = vrot.slane %v1328_v27, %v6980_v17 }
0x1636   :  { %v1044_v30 = vpop.permute.xlu0 %1043 }
0x1637   :  { %1049 = vst.msk [vmem:[#allocation2 + $0x5] sm:$0x1] %vm323_vm11, %v1044_v30  ;;  %1339 = vrot.lane.b32.xlu0 %v1336_v29, %s6612_s25 }
0x163a   :  { %v466_v31 = vpop.permute.xlu0 %465 }
0x163b   :  { %470 = vst.msk [vmem:[#allocation2 + $0x9] sm:$0x1] %vm323_vm11, %v466_v31 }
0x163e   :  { %v756_v33 = vpop.permute.xlu0 %755 }
0x163f   :  { %760 = vst.msk [vmem:[#allocation2 + $0xb] sm:$0x1] %vm323_vm11, %v756_v33 }
0x1642   :  { %v1046_v34 = vpop.permute.xlu0 %1045 }
0x1643   :  { %1050 = vst.msk [vmem:[#allocation2 + $0xd] sm:$0x1] %vm323_vm11, %v1046_v34 }
0x169f   :  { %v1436_v35 = vpop.permute.xlu1 %1435 }
0x16a0   :  { %5361 = vmatmul.mubr.msk.f32.vlgmr.msra.gmra.mrb[8].mxu1 %vm1351_vm12, %v1436_v35 }
0x16a1   :  { %5406 = vmatprep.mubr.msk.f32.mxu1 %vm6607_vm0, %v6608_v1 }
0x16a5   :  { %v1338_v36 = vpop.permute.xlu0 %1337 }
0x16a6   :  { %1343 = vst.msk [vmem:[#allocation2 + $0x7] sm:$0x1] %vm323_vm11, %v1338_v36  ;;  %v134_v36 = vld [vmem:[%s8047_s8] sm:$0xff] }
0x16a9   :  { %v1340_v37 = vpop.permute.xlu0 %1339 }
0x16aa   :  { %1344 = vst.msk [vmem:[#allocation2 + $0xf] sm:$0x1] %vm323_vm11, %v1340_v37  ;;  %v135_v37 = vld [vmem:[%s8047_s8 + $0x8] sm:$0xff] }
0x16ad   :  { %v7092_v38 = vld [vmem:[#allocation2] sm:$0xff] }
0x16ae   :  { %5349 = vmatprep.mubr.msk.f32.mxu0 %vm1351_vm12, %v7092_v38 }
0x16b1   :  { %v7096_v41 = vld [vmem:[#allocation2 + $0x8] sm:$0xff] }
0x16b2   :  { %5350 = vmatmul.mubr.msk.f32.vlgmr.msra.gmra.mrb[8].mxu0 %vm1351_vm12, %v7096_v41 }
0x16b3   :  { %5383 = vmatprep.mubr.msk.f32.mxu0 %vm6607_vm0, %v6608_v1 }
0x1773   :  { %v1505_v42 = vpop.f32.mrb[8].mxu1 }
0x1774   :  { %v5362_v43 = vpop.f32.mrb[9].mxu1  ;;  %v1518_v44 = vrot.slane %v1505_v42, %v6969_v7  ;;  %v7151_v42 = vpack.c.bf16 %v135_v37, %v134_v36 }
0x1775   :  { %v137_v43 = vld [vmem:[%s8047_s8 + $0x18] sm:$0xff] }
0x1776   :  { %v1519_v45 = vcombine.high %v1518_v44, %v1518_v44  ;;  %v1526_v49 = vrot.slane %v1518_v44, %v6969_v7  ;;  %5896 = vmatpush3.bf16.msra.mxu0 %v7151_v42 }
0x1777   :  { %5897 = vmatprep.subr.bf16.mxu0 %v6606_v0 }
0x1778   :  { %v1533_v48 = vrot.slane %v1519_v45, %v6969_v7  ;;  %v1537_v50 = vrot.slane %v1526_v49, %v6980_v17  ;;  %v138_v45 = vld [vmem:[%s8047_s8 + $0x20] sm:$0xff]  ;;  %v141_v49 = vld [vmem:[%s8047_s8 + $0x38] sm:$0xff] }
0x177a   :  { %v1541_v53 = vrot.slane %v1533_v48, %v6980_v17  ;;  %v140_v48 = vld [vmem:[%s8047_s8 + $0x30] sm:$0xff] }
0x1785   :  { %v5351_v46 = vpop.f32.mrb[8].mxu0 }
0x1786   :  { %1434 = vst.msk [vmem:[#allocation3 + $0x8] sm:$0xff] %vm1351_vm12, %v5351_v46  ;;  %v1424_v47 = vpop.f32.mrb[9].mxu0  ;;  %v139_v46 = vld [vmem:[%s8047_s8 + $0x28] sm:$0xff] }
0x1787   :  { %1433 = vst.msk [vmem:[#allocation3] sm:$0xff] %vm1351_vm12, %v1424_v47  ;;  %v7167_v47 = vpack.c.bf16 %v139_v46, %v138_v45 }
0x178d   :  { %v7109_v51 = vld [vmem:[#allocation3 + $0x8] sm:$0xff] }
0x178e   :  { %v1545_v40 = vadd.f32 %v1541_v53, %v7109_v51  ;;  %v7112_v52 = vld [vmem:[#allocation3] sm:$0xff]  ;;  %v7177_v53 = vpack.c.bf16 %v141_v49, %v140_v48 }
0x178f   :  { %v1544_v54 = vadd.f32 %v1537_v50, %v7112_v52  ;;  %v142_v50 = vld [vmem:[%s8047_s8 + $0x40] sm:$0xff] }
0x1790   :  { %6264 = vtanh.f32 %v1545_v40  ;;  %v143_v40 = vld [vmem:[%s8047_s8 + $0x48] sm:$0xff] }
0x1791   :  { %6266 = vtanh.f32 %v1544_v54  ;;  %v7187_v54 = vpack.c.bf16 %v143_v40, %v142_v50 }
0x179a   :  { %v6265_v56 = vpop.eup %6264 }
0x179b   :  { %v6267_v25 = vpop.eup %6266  ;;  %v1555_v57 = vmul.f32 %v6265_v56, %v7115_v55 }
0x179c   :  { %v1554_v58 = vmul.f32 %v6267_v25, %v7115_v55 }
0x179d   :  { %v1559_v59 = vsel %vm1351_vm12, %v1555_v57, 0.0 }
0x179e   :  { %1560 = vadd.xlane.f32.xlu1 %v1559_v59  ;;  %v1556_v60 = vsel %vm1351_vm12, %v1554_v58, 0.0 }
0x179f   :  { %1557 = vadd.xlane.f32.xlu0 %v1556_v60 }
0x182b   :  { %v1561_v63 = vpop.xlane.xlu1 %1560 }
0x182c   :  { %v1573_v3 = vrot.slane %v1561_v63, %v7123_v61  ;;  %v1558_v4 = vpop.xlane.xlu0 %1557 }
0x182d   :  { %v1569_v10 = vrot.slane %v1558_v4, %v7123_v61 }
0x182f   :  { %v1574_v14 = vsel %vm183_vm1, %v1573_v3, %v1569_v10 }
0x1830   :  { %v1577_v5 = vsel %vm1576_vm13, %v1574_v14, -inf }
0x1831   :  { %1578 = vmax.xlane.f32.xlu0 %v1577_v5 }
0x18be   :  { %v1579_v8 = vpop.xlane.xlu0 %1578 }
0x18bf   :  { %v1584_v32 = vrot.slane %v1579_v8, %v6980_v17  ;;  %v1588_v19 = vrot.slane %v1579_v8, %v7130_v2 }
0x18c1   :  { %v1591_v20 = vsub.f32 %v1558_v4, %v1584_v32  ;;  %v1592_v18 = vsub.f32 %v1561_v63, %v1588_v19 }
0x18c3   :  { %v1593_v13 = vmul.f32 1.442695, %v1591_v20  ;;  %v1595_v22 = vmul.f32 1.442695, %v1592_v18 }
0x18c5   :  { %6268 = vpow2.f32 %v1593_v13  ;;  %v7201_v13 = vld [vmem:[#allocation9 + $0x8] sm:$0xff] }
0x18c6   :  { %6270 = vpow2.f32 %v1595_v22  ;;  %v1662_v22 = vrot.slane %v7201_v13, 7 }
0x18cf   :  { %v6269_v23 = vpop.eup %6268 }
0x18d0   :  { %v6271_v62 = vpop.eup %6270  ;;  %1600 = vperm.xlu0 %6198, %v6269_v23  }
0x18d1   :  { %1603 = vperm.xlu1 %6199, %v6271_v62  }
0x194f   :  { %v1601_v24 = vpop.permute.xlu0 %1600 }
0x1950   :  { %v1604_v26 = vpop.permute.xlu1 %1603  ;;  %v1608_v6 = vrot.slane %v1601_v24, %v7123_v61 }
0x1951   :  { %v1612_v9 = vrot.slane %v1604_v26, %v7123_v61 }
0x1953   :  { %v1613_v27 = vsel %vm183_vm1, %v1612_v9, %v1608_v6 }
0x1954   :  { %v1615_v28 = vsel %vm1576_vm13, %v1613_v27, 0.0  ;;  %v7220_v27 = vld [vmem:[#allocation15] ss:$0 sm:$0xff] }
0x1955   :  { %1616 = vadd.xlane.f32.xlu1 %v1615_v28 }
0x1966   :  { %1671 = vrot.lane.b32.xlu1 %v7068_v21, %s6614_s5  ;;  %v136_v21 = vld [vmem:[%s8047_s8 + $0x10] sm:$0xff]  ;;  %s6615_s8 = smov 16  }
0x1967   :  { %v7157_v44 = vpack.c.bf16 %v137_v43, %v136_v21 }
0x1969   :  { %5899 = vmatpush3.bf16.msra.mxu0 %v7157_v44 }
0x196a   :  { %5900 = vmatprep.subr.bf16.mxu0 %v6606_v0 }
0x196d   :  { %5902 = vmatpush3.bf16.msra.mxu0 %v7167_v47 }
0x196e   :  { %5903 = vmatprep.subr.bf16.mxu0 %v6606_v0 }
0x1971   :  { %5905 = vmatpush3.bf16.msra.mxu0 %v7177_v53 }
0x1972   :  { %5906 = vmatprep.subr.bf16.mxu0 %v6606_v0 }
0x1975   :  { %5908 = vmatpush3.bf16.msra.mxu0 %v7187_v54 }
0x1976   :  { %5924 = vmatprep.subr.bf16.mxu0 %v6606_v0 }
0x19e2   :  { %v1617_v29 = vpop.xlane.xlu1 %1616 }
0x19e3   :  { %6272 = vrcp.f32 %v1617_v29 }
0x19e6   :  { %v1672_v26 = vpop.permute.xlu1 %1671 }
0x19ed   :  { %v6273_v30 = vpop.eup %6272 }
0x19ee   :  { %v1623_v31 = vrot.slane %v6273_v30, %v6980_v17  ;;  %v1627_v34 = vrot.slane %v6273_v30, %v7130_v2 }
0x19f0   :  { %v1630_v33 = vmul.f32 %v6269_v23, %v1623_v31  ;;  %v1631_v35 = vmul.f32 %v6271_v62, %v1627_v34  ;;  %v7204_v23 = vld [vmem:[#allocation9] sm:$0xff] }
0x19f1   :  { %v7208_v62 = vsel %vm183_vm1, %v1662_v22, %v7204_v23 }
0x19f2   :  { %1636 = vperm.xlu0 %6198, %v1630_v33  }
0x19f6   :  { %1641 = vperm.xlu0 %6198, %v1631_v35  }
0x1a71   :  { %v1637_v56 = vpop.permute.xlu0 %1636 }
0x1a72   :  { %v1644_v25 = vmul.f32 %v1637_v56, %v7092_v38 }
0x1a74   :  { %v1646_v57 = vsel %vm1351_vm12, %v1644_v25, 0.0 }
0x1a75   :  { %v1647_v58 = vrot.slane %v1646_v57, 4  ;;  %v1642_v59 = vpop.permute.xlu0 %1641 }
0x1a76   :  { %v1645_v60 = vmul.f32 %v1642_v59, %v7096_v41 }
0x1a77   :  { %v1648_v11 = vadd.f32 %v1647_v58, %v1646_v57 }
0x1a78   :  { %v1653_v63 = vsel %vm1351_vm12, %v1645_v60, 0.0 }
0x1a79   :  { %v1649_v3 = vrot.slane %v1648_v11, 2  ;;  %v1654_v4 = vrot.slane %v1653_v63, 4 }
0x1a7b   :  { %v1650_v10 = vadd.f32 %v1649_v3, %v1648_v11  ;;  %v1655_v14 = vadd.f32 %v1654_v4, %v1653_v63 }
0x1a7d   :  { %v1656_v5 = vrot.slane %v1655_v14, 2  ;;  %v1651_v8 = vrot.slane %v1650_v10, 1 }
0x1a7f   :  { %v1657_v15 = vadd.f32 %v1656_v5, %v1655_v14  ;;  %v1652_v19 = vadd.f32 %v1651_v8, %v1650_v10 }
0x1a81   :  { %v1658_v32 = vrot.slane %v1657_v15, 1 }
0x1a83   :  { %v1659_v20 = vadd.f32 %v1658_v32, %v1657_v15 }
0x1a85   :  { %v7197_v18 = vsel %vm183_vm1, %v1659_v20, %v1652_v19 }
0x1a86   :  { %1668 = vrot.lane.b32.xlu0 %v7197_v18, %s6615_s8 }
0x1af8   :  { %v1669_v24 = vpop.permute.xlu0 %1668 }
0x1af9   :  { %v1674_v6 = vsel %vm186_vm2, %v7208_v62, %v1669_v24 }
0x1afa   :  { %v1675_v9 = vsel %vm188_vm3, %v1674_v6, %v1672_v26  ;;  %v144_v6 = vld [vmem:[%s8049_s10] sm:$0xff] }
0x1afb   :  { %5384 = vmatmul.mubr.msk.f32.vlgmr.msra.gmra.mrb[10].mxu0 %vm1676_vm14, %v1675_v9  ;;  %v145_v9 = vld [vmem:[%s8049_s10 + $0x8] sm:$0xff] }
0x1afc   :  { %5926 = vmatpush3.bf16.msra.mxu0 %v7037_v12  ;;  %5417 = vmatprep.mubr.msk.f32.mxu0 %vm6607_vm0, %v6608_v1 }
0x1afd   :  { %5927 = vmatprep.subr.bf16.mxu0 %v6606_v0 }
0x1b00   :  { %5929 = vmatpush3.bf16.msra.mxu0 %v7042_v16 }
0x1b01   :  { %5945 = vmatprep.subr.bf16.mxu0 %v6606_v0 }
0x1bce   :  { %v1746_v28 = vpop.f32.mrb[10].mxu0 }
0x1bcf   :  { %v1747_v29 = vadd.f32 %v7220_v27, %v1746_v28  ;;  %v5385_v30 = vpop.f32.mrb[11].mxu0  ;;  %v146_v28 = vld [vmem:[%s8049_s10 + $0x10] sm:$0xff] }
0x1bd0   :  { %v147_v30 = vld [vmem:[%s8049_s10 + $0x18] sm:$0xff] }
0x1bd1   :  { %6274 = vtanh.f32 %v1747_v29  ;;  %v4907_v33 = vmul.f32 -1.442695, %v1747_v29  ;;  %v7264_v29 = vpack.c.bf16 %v145_v9, %v144_v6 }
0x1bd3   :  { %6276 = vpow2.f32 %v4907_v33  ;;  %5911 = vmatpush3.bf16.msra.mxu1 %v7264_v29  ;;  %v148_v33 = vld [vmem:[%s8049_s10 + $0x20] sm:$0xff] }
0x1bd4   :  { %5912 = vmatprep.subr.bf16.mxu1 %v6606_v0 }
0x1bdb   :  { %v6275_v31 = vpop.eup %6274 }
0x1bdc   :  { %1759 = vrot.lane.b32.xlu0 %v6275_v31, %s6609_s24  ;;  %v7270_v31 = vpack.c.bf16 %v147_v30, %v146_v28 }
0x1bdd   :  { %v6277_v34 = vpop.eup %6276 }
0x1bde   :  { %v1753_v35 = vadd.f32 1.0, %v6277_v34  ;;  %v149_v34 = vld [vmem:[%s8049_s10 + $0x28] sm:$0xff]  ;;  %5914 = vmatpush3.bf16.msra.mxu1 %v7270_v31 }
0x1bdf   :  { %5915 = vmatprep.subr.bf16.mxu1 %v6606_v0 }
0x1be0   :  { %6278 = vrcp.f32 %v1753_v35  ;;  %v7282_v35 = vpack.c.bf16 %v149_v34, %v148_v33 }
0x1be2   :  { %5917 = vmatpush3.bf16.msra.mxu1 %v7282_v35 }
0x1be3   :  { %5918 = vmatprep.subr.bf16.mxu1 %v6606_v0 }
0x1bea   :  { %v6279_v36 = vpop.eup %6278 }
0x1beb   :  { %v1757_v43 = vmul.f32 %v6279_v36, %v7011_v39 }
0x1c4e   :  { %v1760_v37 = vpop.permute.xlu0 %1759 }
0x1c4f   :  { %v1762_v21 = vmul.f32 %v6279_v36, %v1760_v37 }
0x1c51   :  { %1764 = vrot.lane.b32.xlu0 %v1762_v21, %s6609_s24 }
0x1cc3   :  { %v1765_v45 = vpop.permute.xlu0 %1764 }
0x1cc4   :  { %v7226_v46 = vadd.f32 %v1765_v45, %v1757_v43 }
0x1cc6   :  { %6280 = vtanh.f32 %v7226_v46 }
0x1cd0   :  { %v6281_v48 = vpop.eup %6280 }
0x1cd1   :  { %1770 = vrot.lane.b32.xlu0 %v6281_v48, %s6609_s24 }
0x1d43   :  { %v1771_v49 = vpop.permute.xlu0 %1770 }
0x1d44   :  { %v7230_v50 = vmul.f32 %v6279_v36, %v1771_v49 }
0x1d46   :  { %1775 = vrot.lane.b32.xlu0 %v7230_v50, %s6612_s25 }
0x1db8   :  { %v7234_v40 = vpop.permute.xlu0 %1775 }
0x1db9   :  { %5418 = vmatmul.mubr.msk.f32.vlgmr.msra.gmra.mrb[12].mxu0 %vm1351_vm12, %v7234_v40 }
0x1dba   :  { %5463 = vmatprep.mubr.msk.f32.mxu0 %vm6607_vm0, %v6608_v1  ;;  %5947 = vmatpush3.bf16.msra.mxu0 %v7264_v29 }
0x1dbb   :  { %5948 = vmatprep.subr.bf16.mxu0 %v6606_v0 }
0x1dbe   :  { %5950 = vmatpush3.bf16.msra.mxu0 %v7270_v31 }
0x1dbf   :  { %5951 = vmatprep.subr.bf16.mxu0 %v6606_v0 }
0x1dc2   :  { %5953 = vmatpush3.bf16.msra.mxu0 %v7282_v35 }
0x1dc3   :  { %5954 = vmatprep.subr.bf16.mxu0 %v6606_v0 }
0x1e8c   :  { %v1939_v39 = vpop.f32.mrb[12].mxu0 }
0x1e8d   :  { %v1950_v56 = vrot.slane %v1939_v39, %v6969_v7  ;;  %v5419_v25 = vpop.f32.mrb[13].mxu0 }
0x1e8e   :  { %v150_v25 = vld [vmem:[%s8049_s10 + $0x30] sm:$0xff] }
0x1e8f   :  { %v1951_v57 = vcombine.high %v1950_v56, %v1950_v56  ;;  %v1958_v58 = vrot.slane %v1950_v56, %v6969_v7 }
0x1e91   :  { %v1965_v59 = vrot.slane %v1951_v57, %v6969_v7  ;;  %v1969_v60 = vrot.slane %v1958_v58, %v6980_v17  ;;  %v151_v57 = vld [vmem:[%s8049_s10 + $0x38] sm:$0xff] }
0x1e92   :  { %v7299_v58 = vpack.c.bf16 %v151_v57, %v150_v25 }
0x1e93   :  { %v1973_v11 = vrot.slane %v1965_v59, %v6980_v17  ;;  %v1976_v63 = vadd.f32 %v1969_v60, %v7112_v52  ;;  %v152_v59 = vld [vmem:[%s8049_s10 + $0x40] sm:$0xff]  ;;  %v153_v60 = vld [vmem:[%s8049_s10 + $0x48] sm:$0xff]  ;;  %s1860_s10 = sld [smem:[#allocation5]] }
0x1e94   :  { %5920 = vmatpush3.bf16.msra.mxu1 %v7299_v58  ;;  %5956 = vmatpush3.bf16.msra.mxu0 %v7299_v58 }
0x1e95   :  { %v1977_v3 = vadd.f32 %v1973_v11, %v7109_v51  ;;  %6282 = vtanh.f32 %v1976_v63  ;;  %5921 = vmatprep.subr.bf16.mxu1 %v6606_v0  ;;  %5957 = vmatprep.subr.bf16.mxu0 %v6606_v0  ;;  %v7313_v11 = vpack.c.bf16 %v153_v60, %v152_v59 }
0x1e97   :  { %6284 = vtanh.f32 %v1977_v3 }
0x1e98   :  { %5923 = vmatpush3.bf16.msra.mxu1 %v7313_v11  ;;  %5959 = vmatpush3.bf16.msra.mxu0 %v7313_v11 }
0x1e99   :  { %5930 = vmatprep.subr.bf16.mxu1 %v6606_v0  ;;  %5966 = vmatprep.subr.bf16.mxu0 %v6606_v0  ;;  %p1861_p11 = scmp.gt.s32.totalorder %s1860_s10, 0 }
0x1e9b   :  { %s1862_s29 = scalar_select %p1861_p11, 1, 0 }
0x1e9f   :  { %v6283_v4 = vpop.eup %6282 }
0x1ea0   :  { %v1980_v10 = vmul.f32 %v6283_v4, %v7115_v55 }
0x1ea1   :  { %v6285_v14 = vpop.eup %6284 }
0x1ea2   :  { %v1982_v5 = vsel %vm1351_vm12, %v1980_v10, 0.0  ;;  %v1981_v15 = vmul.f32 %v6285_v14, %v7115_v55 }
0x1ea3   :  { %1983 = vadd.xlane.f32.xlu1 %v1982_v5 }
0x1ea4   :  { %v1985_v8 = vsel %vm1351_vm12, %v1981_v15, 0.0 }
0x1ea5   :  { %1986 = vadd.xlane.f32.xlu0 %v1985_v8 }
0x1f30   :  { %v1984_v32 = vpop.xlane.xlu1 %1983 }
0x1f31   :  { %v1993_v20 = vrot.slane %v1984_v32, %v7123_v61 }
0x1f32   :  { %v1987_v19 = vpop.xlane.xlu0 %1986 }
0x1f33   :  { %v1997_v22 = vrot.slane %v1987_v19, %v7123_v61 }
0x1f35   :  { %v1998_v24 = vsel %vm183_vm1, %v1997_v22, %v1993_v20 }
0x1f36   :  { %v2000_v26 = vsel %vm1576_vm13, %v1998_v24, -inf }
0x1f37   :  { %2001 = vmax.xlane.f32.xlu0 %v2000_v26 }
0x1fc4   :  { %v2002_v36 = vpop.xlane.xlu0 %2001 }
0x1fc5   :  { %v2007_v37 = vrot.slane %v2002_v36, %v6980_v17  ;;  %v2011_v21 = vrot.slane %v2002_v36, %v7130_v2 }
0x1fc7   :  { %v2014_v43 = vsub.f32 %v1984_v32, %v2007_v37  ;;  %v2015_v45 = vsub.f32 %v1987_v19, %v2011_v21 }
0x1fc9   :  { %v2016_v48 = vmul.f32 1.442695, %v2014_v43  ;;  %v2018_v49 = vmul.f32 1.442695, %v2015_v45 }
0x1fcb   :  { %6286 = vpow2.f32 %v2016_v48 }
0x1fcc   :  { %6288 = vpow2.f32 %v2018_v49 }
0x1fd5   :  { %v6287_v39 = vpop.eup %6286 }
0x1fd6   :  { %v6289_v56 = vpop.eup %6288  ;;  %2023 = vperm.xlu0 %6198, %v6287_v39  }
0x1fd7   :  { %2026 = vperm.xlu1 %6199, %v6289_v56  }
0x1fdb   :  { %1778 = vrot.lane.b32.xlu1 %v7197_v18, %s6609_s24 }
0x1fdf   :  { %1781 = vrot.lane.b32.xlu1 %v7208_v62, %s6612_s25 }
0x2055   :  { %v2024_v63 = vpop.permute.xlu0 %2023 }
0x2056   :  { %v2027_v3 = vpop.permute.xlu1 %2026  ;;  %v2031_v4 = vrot.slane %v2024_v63, %v7123_v61 }
0x2057   :  { %v2035_v10 = vrot.slane %v2027_v3, %v7123_v61  ;;  %v7357_v3 = vld [vmem:[%s8050_s11] ss:$0 sm:$0xff] }
0x2059   :  { %v2036_v18 = vsel %vm183_vm1, %v2035_v10, %v2031_v4  ;;  %v1863_v10 = vstv %s1862_s29 }
0x205a   :  { %v1779_v14 = vpop.permute.xlu1 %1778  ;;  %v2038_v5 = vsel %vm1576_vm13, %v2036_v18, 0.0  ;;  %vm1864_vm10 = vcmp.eq.s32.totalorder %v1863_v10, 1 }
0x205b   :  { %2039 = vadd.xlane.f32.xlu0 %v2038_v5  ;;  %v1784_v15 = vsel %vm1351_vm12, %v7234_v40, %v1779_v14 }
0x205e   :  { %v1782_v8 = vpop.permute.xlu1 %1781 }
0x205f   :  { %v1786_v32 = vsel %vm1785_vm15, %v1784_v15, %v1782_v8 }
0x2060   :  { %5407 = vmatmul.mubr.msk.f32.vlgmr.msra.gmra.mrb[10].mxu1 %vm1676_vm14, %v1786_v32 }
0x2061   :  { %5932 = vmatpush3.bf16.msra.mxu1 %v7151_v42  ;;  %5440 = vmatprep.mubr.msk.f32.mxu1 %vm6607_vm0, %v6608_v1 }
0x2062   :  { %5933 = vmatprep.subr.bf16.mxu1 %v6606_v0 }
0x2065   :  { %5935 = vmatpush3.bf16.msra.mxu1 %v7157_v44 }
0x2066   :  { %5936 = vmatprep.subr.bf16.mxu1 %v6606_v0 }
0x2069   :  { %5938 = vmatpush3.bf16.msra.mxu1 %v7167_v47 }
0x206a   :  { %5939 = vmatprep.subr.bf16.mxu1 %v6606_v0 }
0x206d   :  { %5941 = vmatpush3.bf16.msra.mxu1 %v7177_v53 }
0x206e   :  { %5942 = vmatprep.subr.bf16.mxu1 %v6606_v0 }
0x2071   :  { %5944 = vmatpush3.bf16.msra.mxu1 %v7187_v54 }
0x2072   :  { %5960 = vmatprep.subr.bf16.mxu1 %v6606_v0 }
0x20e8   :  { %v2040_v62 = vpop.xlane.xlu0 %2039 }
0x20e9   :  { %6290 = vrcp.f32 %v2040_v62 }
0x20f3   :  { %v6291_v40 = vpop.eup %6290 }
0x20f4   :  { %v2046_v19 = vrot.slane %v6291_v40, %v6980_v17  ;;  %v2050_v22 = vrot.slane %v6291_v40, %v7130_v2 }
0x20f6   :  { %v2053_v20 = vmul.f32 %v6287_v39, %v2046_v19  ;;  %v2054_v24 = vmul.f32 %v6289_v56, %v2050_v22 }
0x20f8   :  { %2057 = vperm.xlu1 %6199, %v2053_v20  }
0x20fc   :  { %2062 = vperm.xlu1 %6199, %v2054_v24  }
0x2133   :  { %v1856_v26 = vpop.f32.mrb[10].mxu1 }
0x2134   :  { %v5408_v6 = vpop.f32.mrb[11].mxu1  ;;  %v7360_v4 = vadd.f32 %v7357_v3, %v1856_v26 }
0x2136   :  { %v1866_v18 = vrot.slane %v7360_v4, 1 }
0x2138   :  { %v1870_v14 = vsel %vm1864_vm10, %v7201_v13, %v1866_v18 }
0x2139   :  { %v2083_v5 = vrot.slane %v1870_v14, 7 }
0x2177   :  { %v2058_v9 = vpop.permute.xlu1 %2057 }
0x2178   :  { %v2065_v28 = vmul.f32 %v2058_v9, %v7092_v38 }
0x217a   :  { %v2067_v30 = vsel %vm1351_vm12, %v2065_v28, 0.0 }
0x217b   :  { %v2068_v33 = vrot.slane %v2067_v30, 4  ;;  %v2063_v34 = vpop.permute.xlu1 %2062 }
0x217c   :  { %v2066_v36 = vmul.f32 %v2063_v34, %v7096_v41 }
0x217d   :  { %v2069_v37 = vadd.f32 %v2068_v33, %v2067_v30 }
0x217e   :  { %v2074_v21 = vsel %vm1351_vm12, %v2066_v36, 0.0 }
0x217f   :  { %v2070_v43 = vrot.slane %v2069_v37, 2  ;;  %v2075_v45 = vrot.slane %v2074_v21, 4 }
0x2181   :  { %v2071_v48 = vadd.f32 %v2070_v43, %v2069_v37  ;;  %v2076_v49 = vadd.f32 %v2075_v45, %v2074_v21 }
0x2183   :  { %v2077_v39 = vrot.slane %v2076_v49, 2  ;;  %v2072_v25 = vrot.slane %v2071_v48, 1 }
0x2185   :  { %v2078_v56 = vadd.f32 %v2077_v39, %v2076_v49  ;;  %v2073_v59 = vadd.f32 %v2072_v25, %v2071_v48 }
0x2187   :  { %v2079_v57 = vrot.slane %v2078_v56, 1 }
0x2189   :  { %v2080_v60 = vadd.f32 %v2079_v57, %v2078_v56 }
0x218b   :  { %v7348_v63 = vsel %vm183_vm1, %v2080_v60, %v2073_v59 }
0x218c   :  { %2089 = vrot.lane.b32.xlu1 %v7348_v63, %s6615_s8 }
0x2190   :  { %2092 = vrot.lane.b32.xlu1 %v7230_v50, %s6614_s5  ;;  %v1869_v50 = vsel %vm1864_vm10, %v7204_v23, %v7360_v4 }
0x2191   :  { %v7367_v8 = vsel %vm183_vm1, %v2083_v5, %v1869_v50 }
0x21fe   :  { %v2090_v15 = vpop.permute.xlu1 %2089 }
0x21ff   :  { %v2095_v32 = vsel %vm186_vm2, %v7367_v8, %v2090_v15 }
0x2202   :  { %v2093_v62 = vpop.permute.xlu1 %2092 }
0x2203   :  { %v2096_v40 = vsel %vm188_vm3, %v2095_v32, %v2093_v62 }
0x2204   :  { %5441 = vmatmul.mubr.msk.f32.vlgmr.msra.gmra.mrb[12].mxu1 %vm1676_vm14, %v2096_v40 }
0x2205   :  { %5962 = vmatpush3.bf16.msra.mxu1 %v7037_v12  ;;  %5474 = vmatprep.mubr.msk.f32.mxu1 %vm6607_vm0, %v6608_v1 }
0x2206   :  { %5963 = vmatprep.subr.bf16.mxu1 %v6606_v0 }
0x2209   :  { %5965 = vmatpush3.bf16.msra.mxu1 %v7042_v16 }
0x220a   :  { %5981 = vmatprep.subr.bf16.mxu1 %v6606_v0 }
0x22d7   :  { %v2166_v19 = vpop.f32.mrb[12].mxu1 }
0x22d8   :  { %v2167_v20 = vadd.f32 %v7220_v27, %v2166_v19  ;;  %v5442_v22 = vpop.f32.mrb[13].mxu1 }
0x22da   :  { %6292 = vtanh.f32 %v2167_v20  ;;  %v4911_v26 = vmul.f32 -1.442695, %v2167_v20 }
0x22dc   :  { %6294 = vpow2.f32 %v4911_v26 }
0x22e4   :  { %v6293_v24 = vpop.eup %6292 }
0x22e5   :  { %2179 = vrot.lane.b32.xlu1 %v6293_v24, %s6609_s24 }
0x22e6   :  { %v6295_v6 = vpop.eup %6294 }
0x22e7   :  { %v2173_v9 = vadd.f32 1.0, %v6295_v6 }
0x22e9   :  { %6296 = vrcp.f32 %v2173_v9 }
0x22f3   :  { %v6297_v28 = vpop.eup %6296 }
0x22f4   :  { %v2177_v34 = vmul.f32 %v6297_v28, %v7226_v46 }
0x2357   :  { %v2180_v30 = vpop.permute.xlu1 %2179 }
0x2358   :  { %v2182_v33 = vmul.f32 %v6297_v28, %v2180_v30 }
0x235a   :  { %2184 = vrot.lane.b32.xlu1 %v2182_v33, %s6609_s24 }
0x23cc   :  { %v2185_v36 = vpop.permute.xlu1 %2184 }
0x23cd   :  { %v7383_v37 = vadd.f32 %v2185_v36, %v2177_v34 }
0x23cf   :  { %6298 = vtanh.f32 %v7383_v37 }
0x23d9   :  { %v6299_v21 = vpop.eup %6298 }
0x23da   :  { %2190 = vrot.lane.b32.xlu1 %v6299_v21, %s6609_s24 }
0x244c   :  { %v2191_v43 = vpop.permute.xlu1 %2190 }
0x244d   :  { %v7387_v45 = vmul.f32 %v6297_v28, %v2191_v43 }
0x244f   :  { %2195 = vrot.lane.b32.xlu0 %v7387_v45, %s6612_s25 }
0x24c1   :  { %v7391_v48 = vpop.permute.xlu0 %2195 }
0x24c2   :  { %5475 = vmatmul.mubr.msk.f32.vlgmr.msra.gmra.mrb[14].mxu1 %vm1351_vm12, %v7391_v48 }
0x24c3   :  { %5983 = vmatpush3.bf16.msra.mxu1 %v7264_v29  ;;  %5520 = vmatprep.mubr.msk.f32.mxu1 %vm6607_vm0, %v6608_v1 }
0x24c4   :  { %5984 = vmatprep.subr.bf16.mxu1 %v6606_v0 }
0x24c7   :  { %5986 = vmatpush3.bf16.msra.mxu1 %v7270_v31 }
0x24c8   :  { %5987 = vmatprep.subr.bf16.mxu1 %v6606_v0 }
0x24cb   :  { %5989 = vmatpush3.bf16.msra.mxu1 %v7282_v35 }
0x24cc   :  { %5990 = vmatprep.subr.bf16.mxu1 %v6606_v0 }
0x24cf   :  { %5992 = vmatpush3.bf16.msra.mxu1 %v7299_v58 }
0x24d0   :  { %5993 = vmatprep.subr.bf16.mxu1 %v6606_v0 }
0x24d3   :  { %5995 = vmatpush3.bf16.msra.mxu1 %v7313_v11 }
0x24d4   :  { %6002 = vmatprep.subr.bf16.mxu1 %v6606_v0 }
0x2595   :  { %v2358_v46 = vpop.f32.mrb[14].mxu1 }
0x2596   :  { %v2369_v49 = vrot.slane %v2358_v46, %v6969_v7  ;;  %v5476_v39 = vpop.f32.mrb[15].mxu1 }
0x2598   :  { %v2370_v56 = vcombine.high %v2369_v49, %v2369_v49  ;;  %v2377_v25 = vrot.slane %v2369_v49, %v6969_v7 }
0x259a   :  { %v2384_v57 = vrot.slane %v2370_v56, %v6969_v7  ;;  %v2388_v59 = vrot.slane %v2377_v25, %v6980_v17 }
0x259c   :  { %v2392_v60 = vrot.slane %v2384_v57, %v6980_v17  ;;  %v2395_v10 = vadd.f32 %v2388_v59, %v7112_v52 }
0x259e   :  { %v2396_v18 = vadd.f32 %v2392_v60, %v7109_v51  ;;  %6300 = vtanh.f32 %v2395_v10 }
0x25a0   :  { %6302 = vtanh.f32 %v2396_v18 }
0x25a8   :  { %v6301_v14 = vpop.eup %6300 }
0x25a9   :  { %v2399_v5 = vmul.f32 %v6301_v14, %v7115_v55 }
0x25aa   :  { %v6303_v15 = vpop.eup %6302 }
0x25ab   :  { %v2401_v50 = vsel %vm1351_vm12, %v2399_v5, 0.0  ;;  %v2400_v32 = vmul.f32 %v6303_v15, %v7115_v55 }
0x25ac   :  { %2402 = vadd.xlane.f32.xlu1 %v2401_v50 }
0x25ad   :  { %v2404_v62 = vsel %vm1351_vm12, %v2400_v32, 0.0 }
0x25ae   :  { %2405 = vadd.xlane.f32.xlu0 %v2404_v62  ;;  %v2282_v62 = vstv %s2281_s3 }
0x25af   :  { %vm2283_vm11 = vcmp.eq.s32.totalorder %v2282_v62, 1 }
0x2639   :  { %v2403_v40 = vpop.xlane.xlu1 %2402 }
0x263a   :  { %v2412_v20 = vrot.slane %v2403_v40, %v7123_v61 }
0x263b   :  { %v2406_v19 = vpop.xlane.xlu0 %2405 }
0x263c   :  { %v2416_v22 = vrot.slane %v2406_v19, %v7123_v61 }
0x263e   :  { %v2417_v24 = vsel %vm183_vm1, %v2416_v22, %v2412_v20 }
0x263f   :  { %v2419_v26 = vsel %vm1576_vm13, %v2417_v24, -inf }
0x2640   :  { %2420 = vmax.xlane.f32.xlu1 %v2419_v26 }
0x26cd   :  { %v2421_v6 = vpop.xlane.xlu1 %2420 }
0x26ce   :  { %v2426_v9 = vrot.slane %v2421_v6, %v6980_v17  ;;  %v2430_v28 = vrot.slane %v2421_v6, %v7130_v2 }
0x26d0   :  { %v2433_v30 = vsub.f32 %v2403_v40, %v2426_v9  ;;  %v2434_v33 = vsub.f32 %v2406_v19, %v2430_v28 }
0x26d2   :  { %v2435_v34 = vmul.f32 1.442695, %v2433_v30  ;;  %v2437_v36 = vmul.f32 1.442695, %v2434_v33 }
0x26d4   :  { %6304 = vpow2.f32 %v2435_v34 }
0x26d5   :  { %6306 = vpow2.f32 %v2437_v36 }
0x26de   :  { %v6305_v21 = vpop.eup %6304 }
0x26df   :  { %v6307_v43 = vpop.eup %6306  ;;  %2442 = vperm.xlu1 %6199, %v6305_v21  }
0x26e0   :  { %2445 = vperm.xlu0 %6198, %v6307_v43  }
0x26e3   :  { %2198 = vrot.lane.b32.xlu1 %v7348_v63, %s6609_s24 }
0x26e7   :  { %2201 = vrot.lane.b32.xlu1 %v7367_v8, %s6612_s25 }
0x275e   :  { %v2443_v46 = vpop.permute.xlu1 %2442 }
0x275f   :  { %v2446_v49 = vpop.permute.xlu0 %2445  ;;  %v2450_v39 = vrot.slane %v2443_v46, %v7123_v61 }
0x2760   :  { %v2454_v56 = vrot.slane %v2446_v49, %v7123_v61 }
0x2762   :  { %v2199_v25 = vpop.permute.xlu1 %2198  ;;  %v2455_v57 = vsel %vm183_vm1, %v2454_v56, %v2450_v39 }
0x2763   :  { %v2457_v59 = vsel %vm1576_vm13, %v2455_v57, 0.0  ;;  %v2204_v60 = vsel %vm1351_vm12, %v7391_v48, %v2199_v25 }
0x2764   :  { %2458 = vadd.xlane.f32.xlu1 %v2457_v59 }
0x2766   :  { %v2202_v10 = vpop.permute.xlu1 %2201 }
0x2767   :  { %v2205_v63 = vsel %vm1785_vm15, %v2204_v60, %v2202_v10 }
0x2768   :  { %5464 = vmatmul.mubr.msk.f32.vlgmr.msra.gmra.mrb[14].mxu0 %vm1676_vm14, %v2205_v63 }
0x2769   :  { %5968 = vmatpush3.bf16.msra.mxu0 %v7151_v42  ;;  %5497 = vmatprep.mubr.msk.f32.mxu0 %vm6607_vm0, %v6608_v1 }
0x276a   :  { %5969 = vmatprep.subr.bf16.mxu0 %v6606_v0 }
0x276d   :  { %5971 = vmatpush3.bf16.msra.mxu0 %v7157_v44 }
0x276e   :  { %5972 = vmatprep.subr.bf16.mxu0 %v6606_v0 }
0x2771   :  { %5974 = vmatpush3.bf16.msra.mxu0 %v7167_v47 }
0x2772   :  { %5975 = vmatprep.subr.bf16.mxu0 %v6606_v0 }
0x2775   :  { %5977 = vmatpush3.bf16.msra.mxu0 %v7177_v53 }
0x2776   :  { %5978 = vmatprep.subr.bf16.mxu0 %v6606_v0 }
0x2779   :  { %5980 = vmatpush3.bf16.msra.mxu0 %v7187_v54 }
0x277a   :  { %5996 = vmatprep.subr.bf16.mxu0 %v6606_v0 }
0x27f1   :  { %v2459_v8 = vpop.xlane.xlu1 %2458 }
0x27f2   :  { %6308 = vrcp.f32 %v2459_v8 }
0x27fc   :  { %v6309_v48 = vpop.eup %6308 }
0x27fd   :  { %v2465_v18 = vrot.slane %v6309_v48, %v6980_v17  ;;  %v2469_v5 = vrot.slane %v6309_v48, %v7130_v2 }
0x27ff   :  { %v2472_v14 = vmul.f32 %v6305_v21, %v2465_v18  ;;  %v2473_v15 = vmul.f32 %v6307_v43, %v2469_v5 }
0x2801   :  { %2476 = vperm.xlu0 %6198, %v2472_v14  }
0x2805   :  { %2481 = vperm.xlu0 %6198, %v2473_v15  }
0x283b   :  { %v2275_v50 = vpop.f32.mrb[14].mxu0 }
0x283c   :  { %v7451_v32 = vadd.f32 %v7357_v3, %v2275_v50  ;;  %v5465_v40 = vpop.f32.mrb[15].mxu0 }
0x283e   :  { %v2285_v19 = vrot.slane %v7451_v32, 7  ;;  %v2289_v24 = vsel %vm2283_vm11, %v7201_v13, %v7451_v32 }
0x283f   :  { %v2502_v8 = vrot.slane %v2289_v24, 7 }
0x2840   :  { %v2288_v20 = vsel %vm2283_vm11, %v7204_v23, %v2285_v19 }
0x2841   :  { %v2623_v22 = vrot.slane %v2288_v20, 1  ;;  %v2503_v18 = vsel %vm326_vm4, %v2502_v8, %v2288_v20 }
0x2843   :  { %v7458_v26 = vsel %vm183_vm1, %v2289_v24, %v2623_v22 }
0x2880   :  { %v2477_v6 = vpop.permute.xlu0 %2476 }
0x2881   :  { %v2484_v9 = vmul.f32 %v2477_v6, %v7092_v38 }
0x2883   :  { %v2486_v28 = vsel %vm1351_vm12, %v2484_v9, 0.0 }
0x2884   :  { %v2487_v30 = vrot.slane %v2486_v28, 4  ;;  %v2482_v33 = vpop.permute.xlu0 %2481 }
0x2885   :  { %v2485_v34 = vmul.f32 %v2482_v33, %v7096_v41  ;;  %v2511_v41 = vrot.slane %v7387_v45, 7 }
0x2886   :  { %v2488_v36 = vadd.f32 %v2487_v30, %v2486_v28 }
0x2887   :  { %v2493_v21 = vsel %vm1351_vm12, %v2485_v34, 0.0 }
0x2888   :  { %v2489_v43 = vrot.slane %v2488_v36, 2  ;;  %v2494_v46 = vrot.slane %v2493_v21, 4 }
0x288a   :  { %v2490_v49 = vadd.f32 %v2489_v43, %v2488_v36  ;;  %v2495_v39 = vadd.f32 %v2494_v46, %v2493_v21 }
0x288c   :  { %v2496_v56 = vrot.slane %v2495_v39, 2  ;;  %v2491_v25 = vrot.slane %v2490_v49, 1 }
0x288e   :  { %v2497_v57 = vadd.f32 %v2496_v56, %v2495_v39  ;;  %v2492_v60 = vadd.f32 %v2491_v25, %v2490_v49 }
0x2890   :  { %v2498_v59 = vrot.slane %v2497_v57, 1 }
0x2892   :  { %v2499_v10 = vadd.f32 %v2498_v59, %v2497_v57 }
0x2894   :  { %v2507_v38 = vsel %vm326_vm4, %v2499_v10, %v2492_v60  ;;  %v7466_v63 = vsel %vm183_vm1, %v2499_v10, %v2492_v60 }
0x2895   :  { %2508 = vrot.lane.b32.xlu0 %v2507_v38, %s6615_s8 }
0x2899   :  { %2512 = vrot.lane.b32.xlu0 %v2511_v41, %s6614_s5 }
0x2907   :  { %v2509_v48 = vpop.permute.xlu0 %2508 }
0x2908   :  { %v2515_v14 = vsel %vm186_vm2, %v2503_v18, %v2509_v48 }
0x290b   :  { %v2513_v5 = vpop.permute.xlu0 %2512 }
0x290c   :  { %v2516_v15 = vsel %vm188_vm3, %v2515_v14, %v2513_v5 }
0x290d   :  { %v2518_v50 = vrot.slane %v2516_v15, 1 }
0x290f   :  { %5498 = vmatmul.mubr.msk.f32.vlgmr.msra.gmra.mrb[16].mxu0 %vm1676_vm14, %v2518_v50 }
0x2910   :  { %5998 = vmatpush3.bf16.msra.mxu0 %v7037_v12  ;;  %5531 = vmatprep.mubr.msk.f32.mxu0 %vm6607_vm0, %v6608_v1 }
0x2911   :  { %5999 = vmatprep.subr.bf16.mxu0 %v6606_v0 }
0x2914   :  { %6001 = vmatpush3.bf16.msra.mxu0 %v7042_v16 }
0x2915   :  { %6017 = vmatprep.subr.bf16.mxu0 %v6606_v0 }
0x29e2   :  { %v2587_v45 = vpop.f32.mrb[16].mxu0 }
0x29e3   :  { %v2588_v62 = vadd.f32 %v7220_v27, %v2587_v45  ;;  %v5499_v40 = vpop.f32.mrb[17].mxu0 }
0x29e5   :  { %6310 = vtanh.f32 %v2588_v62  ;;  %v4916_v20 = vmul.f32 -1.442695, %v2588_v62 }
0x29e7   :  { %6312 = vpow2.f32 %v4916_v20 }
0x29ef   :  { %v6311_v19 = vpop.eup %6310 }
0x29f0   :  { %2600 = vrot.lane.b32.xlu0 %v6311_v19, %s6609_s24 }
0x29f1   :  { %v6313_v22 = vpop.eup %6312 }
0x29f2   :  { %v2594_v24 = vadd.f32 1.0, %v6313_v22 }
0x29f4   :  { %6314 = vrcp.f32 %v2594_v24 }
0x29fe   :  { %v6315_v6 = vpop.eup %6314 }
0x29ff   :  { %v2598_v30 = vmul.f32 %v6315_v6, %v7383_v37 }
0x2a62   :  { %v2601_v9 = vpop.permute.xlu0 %2600 }
0x2a63   :  { %v2603_v28 = vmul.f32 %v6315_v6, %v2601_v9 }
0x2a65   :  { %2605 = vrot.lane.b32.xlu0 %v2603_v28, %s6609_s24 }
0x2ad7   :  { %v2606_v33 = vpop.permute.xlu0 %2605 }
0x2ad8   :  { %v7485_v34 = vadd.f32 %v2606_v33, %v2598_v30 }
0x2ada   :  { %6316 = vtanh.f32 %v7485_v34 }
0x2ae4   :  { %v6317_v36 = vpop.eup %6316 }
0x2ae5   :  { %2611 = vrot.lane.b32.xlu0 %v6317_v36, %s6609_s24 }
0x2b57   :  { %v2612_v21 = vpop.permute.xlu0 %2611 }
0x2b58   :  { %v7489_v43 = vmul.f32 %v6315_v6, %v2612_v21 }
0x2b5a   :  { %2616 = vrot.lane.b32.xlu1 %v7489_v43, %s6612_s25 }
0x2bcc   :  { %v7493_v46 = vpop.permute.xlu1 %2616 }
0x2bcd   :  { %5532 = vmatmul.mubr.msk.f32.vlgmr.msra.gmra.mrb[18].mxu0 %vm1351_vm12, %v7493_v46 }
0x2bce   :  { %6019 = vmatpush3.bf16.msra.mxu0 %v7264_v29  ;;  %5577 = vmatprep.mubr.msk.f32.mxu0 %vm6607_vm0, %v6608_v1 }
0x2bcf   :  { %6020 = vmatprep.subr.bf16.mxu0 %v6606_v0 }
0x2bd2   :  { %6022 = vmatpush3.bf16.msra.mxu0 %v7270_v31 }
0x2bd3   :  { %6023 = vmatprep.subr.bf16.mxu0 %v6606_v0 }
0x2bd6   :  { %6025 = vmatpush3.bf16.msra.mxu0 %v7282_v35 }
0x2bd7   :  { %6026 = vmatprep.subr.bf16.mxu0 %v6606_v0 }
0x2bda   :  { %6028 = vmatpush3.bf16.msra.mxu0 %v7299_v58 }
0x2bdb   :  { %6029 = vmatprep.subr.bf16.mxu0 %v6606_v0 }
0x2bde   :  { %6031 = vmatpush3.bf16.msra.mxu0 %v7313_v11 }
0x2bdf   :  { %6038 = vmatprep.subr.bf16.mxu0 %v6606_v0 }
0x2ca0   :  { %v2783_v37 = vpop.f32.mrb[18].mxu0 }
0x2ca1   :  { %v2794_v49 = vrot.slane %v2783_v37, %v6969_v7  ;;  %v5533_v39 = vpop.f32.mrb[19].mxu0 }
0x2ca3   :  { %v2795_v56 = vcombine.high %v2794_v49, %v2794_v49  ;;  %v2802_v25 = vrot.slane %v2794_v49, %v6969_v7 }
0x2ca5   :  { %v2809_v57 = vrot.slane %v2795_v56, %v6969_v7  ;;  %v2813_v59 = vrot.slane %v2802_v25, %v6980_v17 }
0x2ca7   :  { %v2817_v60 = vrot.slane %v2809_v57, %v6980_v17  ;;  %v2820_v10 = vadd.f32 %v2813_v59, %v7112_v52 }
0x2ca9   :  { %v2821_v38 = vadd.f32 %v2817_v60, %v7109_v51  ;;  %6318 = vtanh.f32 %v2820_v10 }
0x2cab   :  { %6320 = vtanh.f32 %v2821_v38  ;;  %v2706_v38 = vstv %s2705_s20 }
0x2cac   :  { %vm2707_vm4 = vcmp.eq.s32.totalorder %v2706_v38, 1 }
0x2cb3   :  { %v6319_v41 = vpop.eup %6318 }
0x2cb4   :  { %v2824_v8 = vmul.f32 %v6319_v41, %v7115_v55 }
0x2cb5   :  { %v6321_v48 = vpop.eup %6320 }
0x2cb6   :  { %v2826_v18 = vsel %vm1351_vm12, %v2824_v8, 0.0  ;;  %v2825_v14 = vmul.f32 %v6321_v48, %v7115_v55 }
0x2cb7   :  { %2827 = vadd.xlane.f32.xlu0 %v2826_v18 }
0x2cb8   :  { %v2829_v5 = vsel %vm1351_vm12, %v2825_v14, 0.0 }
0x2cb9   :  { %2830 = vadd.xlane.f32.xlu1 %v2829_v5 }
0x2d44   :  { %v2828_v15 = vpop.xlane.xlu0 %2827 }
0x2d45   :  { %v2837_v52 = vrot.slane %v2828_v15, %v7123_v61 }
0x2d46   :  { %v2831_v50 = vpop.xlane.xlu1 %2830 }
0x2d47   :  { %v2841_v51 = vrot.slane %v2831_v50, %v7123_v61 }
0x2d49   :  { %v2842_v45 = vsel %vm183_vm1, %v2841_v51, %v2837_v52 }
0x2d4a   :  { %v2844_v62 = vsel %vm1576_vm13, %v2842_v45, -inf }
0x2d4b   :  { %2845 = vmax.xlane.f32.xlu0 %v2844_v62  ;;  %v7562_v62 = vld [vmem:[#allocation2] sm:$0xff] }
0x2dd8   :  { %v2846_v40 = vpop.xlane.xlu0 %2845 }
0x2dd9   :  { %v2851_v19 = vrot.slane %v2846_v40, %v6980_v17  ;;  %v2855_v55 = vrot.slane %v2846_v40, %v7130_v2 }
0x2ddb   :  { %v2858_v20 = vsub.f32 %v2828_v15, %v2851_v19  ;;  %v2859_v22 = vsub.f32 %v2831_v50, %v2855_v55 }
0x2ddd   :  { %v2860_v24 = vmul.f32 1.442695, %v2858_v20  ;;  %v2862_v6 = vmul.f32 1.442695, %v2859_v22  ;;  %v7566_v22 = vld [vmem:[#allocation2 + $0x8] sm:$0xff] }
0x2ddf   :  { %6322 = vpow2.f32 %v2860_v24 }
0x2de0   :  { %6324 = vpow2.f32 %v2862_v6 }
0x2de9   :  { %v6323_v9 = vpop.eup %6322 }
0x2dea   :  { %v6325_v28 = vpop.eup %6324  ;;  %2867 = vperm.xlu0 %6198, %v6323_v9  }
0x2deb   :  { %2870 = vperm.xlu1 %6199, %v6325_v28  }
0x2dee   :  { %2620 = vrot.lane.b32.xlu0 %v7466_v63, %s6609_s24 }
0x2df2   :  { %2625 = vrot.lane.b32.xlu0 %v7458_v26, %s6612_s25 }
0x2e69   :  { %v2868_v30 = vpop.permute.xlu0 %2867 }
0x2e6a   :  { %v2871_v33 = vpop.permute.xlu1 %2870  ;;  %v2875_v36 = vrot.slane %v2868_v30, %v7123_v61 }
0x2e6b   :  { %v2879_v21 = vrot.slane %v2871_v33, %v7123_v61 }
0x2e6d   :  { %v2621_v37 = vpop.permute.xlu0 %2620  ;;  %v2880_v49 = vsel %vm183_vm1, %v2879_v21, %v2875_v36 }
0x2e6e   :  { %v2882_v39 = vsel %vm1576_vm13, %v2880_v49, 0.0  ;;  %v2628_v56 = vsel %vm1351_vm12, %v7493_v46, %v2621_v37 }
0x2e6f   :  { %2883 = vadd.xlane.f32.xlu0 %v2882_v39 }
0x2e71   :  { %v2626_v25 = vpop.permute.xlu0 %2625 }
0x2e72   :  { %v2629_v63 = vsel %vm1785_vm15, %v2628_v56, %v2626_v25 }
0x2e73   :  { %5521 = vmatmul.mubr.msk.f32.vlgmr.msra.gmra.mrb[16].mxu1 %vm1676_vm14, %v2629_v63  ;;  %v2936_v63 = vrot.slane %v7489_v43, 6 }
0x2e74   :  { %6004 = vmatpush3.bf16.msra.mxu1 %v7151_v42  ;;  %5554 = vmatprep.mubr.msk.f32.mxu1 %vm6607_vm0, %v6608_v1 }
0x2e75   :  { %6005 = vmatprep.subr.bf16.mxu1 %v6606_v0 }
0x2e78   :  { %6007 = vmatpush3.bf16.msra.mxu1 %v7157_v44 }
0x2e79   :  { %6008 = vmatprep.subr.bf16.mxu1 %v6606_v0 }
0x2e7c   :  { %6010 = vmatpush3.bf16.msra.mxu1 %v7167_v47 }
0x2e7d   :  { %6011 = vmatprep.subr.bf16.mxu1 %v6606_v0 }
0x2e80   :  { %6013 = vmatpush3.bf16.msra.mxu1 %v7177_v53 }
0x2e81   :  { %6014 = vmatprep.subr.bf16.mxu1 %v6606_v0 }
0x2e84   :  { %6016 = vmatpush3.bf16.msra.mxu1 %v7187_v54 }
0x2e85   :  { %6032 = vmatprep.subr.bf16.mxu1 %v6606_v0 }
0x2efc   :  { %v2884_v26 = vpop.xlane.xlu0 %2883 }
0x2efd   :  { %6326 = vrcp.f32 %v2884_v26 }
0x2f07   :  { %v6327_v46 = vpop.eup %6326 }
0x2f08   :  { %v2890_v57 = vrot.slane %v6327_v46, %v6980_v17  ;;  %v2894_v60 = vrot.slane %v6327_v46, %v7130_v2 }
0x2f0a   :  { %v2897_v59 = vmul.f32 %v6323_v9, %v2890_v57  ;;  %v2898_v10 = vmul.f32 %v6325_v28, %v2894_v60 }
0x2f0c   :  { %2901 = vperm.xlu1 %6199, %v2897_v59  }
0x2f10   :  { %2906 = vperm.xlu1 %6199, %v2898_v10  }
0x2f46   :  { %v2699_v41 = vpop.f32.mrb[16].mxu1 }
0x2f47   :  { %v7553_v8 = vadd.f32 %v7357_v3, %v2699_v41  ;;  %v5522_v48 = vpop.f32.mrb[17].mxu1 }
0x2f49   :  { %v2709_v18 = vrot.slane %v7553_v8, 6  ;;  %v2710_v14 = vrot.slane %v7553_v8, 7 }
0x2f4b   :  { %v2713_v5 = vsel %vm2707_vm4, %v7204_v23, %v2709_v18  ;;  %v2714_v15 = vsel %vm2707_vm4, %v7201_v13, %v2710_v14 }
0x2f4c   :  { %v3048_v50 = vrot.slane %v2713_v5, 2  ;;  %v3049_v52 = vrot.slane %v2714_v15, 1  ;;  %v2927_v26 = vrot.slane %v2714_v15, 7 }
0x2f4e   :  { %v7560_v51 = vsel %vm183_vm1, %v3049_v52, %v3048_v50  ;;  %v2928_v57 = vsel %vm471_vm5, %v2927_v26, %v2713_v5 }
0x2f8b   :  { %v2902_v45 = vpop.permute.xlu1 %2901 }
0x2f8c   :  { %v2909_v40 = vmul.f32 %v7562_v62, %v2902_v45 }
0x2f8e   :  { %v2911_v19 = vsel %vm1351_vm12, %v2909_v40, 0.0 }
0x2f8f   :  { %v2912_v55 = vrot.slane %v2911_v19, 4  ;;  %v2907_v20 = vpop.permute.xlu1 %2906 }
0x2f90   :  { %v2910_v23 = vmul.f32 %v7566_v22, %v2907_v20 }
0x2f91   :  { %v2913_v24 = vadd.f32 %v2912_v55, %v2911_v19 }
0x2f92   :  { %v2918_v13 = vsel %vm1351_vm12, %v2910_v23, 0.0 }
0x2f93   :  { %v2914_v6 = vrot.slane %v2913_v24, 2  ;;  %v2919_v9 = vrot.slane %v2918_v13, 4 }
0x2f95   :  { %v2915_v28 = vadd.f32 %v2914_v6, %v2913_v24  ;;  %v2920_v30 = vadd.f32 %v2919_v9, %v2918_v13 }
0x2f97   :  { %v2921_v33 = vrot.slane %v2920_v30, 2  ;;  %v2916_v36 = vrot.slane %v2915_v28, 1 }
0x2f99   :  { %v2922_v21 = vadd.f32 %v2921_v33, %v2920_v30  ;;  %v2917_v49 = vadd.f32 %v2916_v36, %v2915_v28 }
0x2f9b   :  { %v2923_v37 = vrot.slane %v2922_v21, 1 }
0x2f9d   :  { %v2924_v39 = vadd.f32 %v2923_v37, %v2922_v21  ;;  %v7620_v21 = vld [vmem:[#allocation3] sm:$0xff] }
0x2f9f   :  { %v2932_v56 = vsel %vm471_vm5, %v2924_v39, %v2917_v49  ;;  %v7572_v25 = vsel %vm183_vm1, %v2924_v39, %v2917_v49  ;;  %v7623_v49 = vld [vmem:[#allocation3 + $0x8] sm:$0xff] }
0x2fa0   :  { %2933 = vrot.lane.b32.xlu1 %v2932_v56, %s6615_s8 }
0x2fa4   :  { %2937 = vrot.lane.b32.xlu1 %v2936_v63, %s6614_s5  ;;  %v7626_v63 = vld [vmem:[#allocation14] ss:$0 sm:$0xff] }
0x3012   :  { %v2934_v46 = vpop.permute.xlu1 %2933 }
0x3013   :  { %v2940_v59 = vsel %vm186_vm2, %v2928_v57, %v2934_v46 }
0x3016   :  { %v2938_v60 = vpop.permute.xlu1 %2937 }
0x3017   :  { %v2941_v10 = vsel %vm188_vm3, %v2940_v59, %v2938_v60 }
0x3018   :  { %v2943_v38 = vrot.slane %v2941_v10, 2 }
0x301a   :  { %5555 = vmatmul.mubr.msk.f32.vlgmr.msra.gmra.mrb[18].mxu1 %vm1676_vm14, %v2943_v38 }
0x301b   :  { %6034 = vmatpush3.bf16.msra.mxu1 %v7037_v12  ;;  %5588 = vmatprep.mubr.msk.f32.mxu1 %vm6607_vm0, %v6608_v1 }
0x301c   :  { %6035 = vmatprep.subr.bf16.mxu1 %v6606_v0 }
0x301f   :  { %6037 = vmatpush3.bf16.msra.mxu1 %v7042_v16 }
0x3020   :  { %6053 = vmatprep.subr.bf16.mxu1 %v6606_v0 }
0x30ed   :  { %v3012_v43 = vpop.f32.mrb[18].mxu1 }
0x30ee   :  { %v3013_v41 = vadd.f32 %v7220_v27, %v3012_v43  ;;  %v5556_v48 = vpop.f32.mrb[19].mxu1 }
0x30f0   :  { %6328 = vtanh.f32 %v3013_v41  ;;  %v4921_v14 = vmul.f32 -1.442695, %v3013_v41 }
0x30f2   :  { %6330 = vpow2.f32 %v4921_v14 }
0x30fa   :  { %v6329_v18 = vpop.eup %6328 }
0x30fb   :  { %3025 = vrot.lane.b32.xlu1 %v6329_v18, %s6609_s24 }
0x30fc   :  { %v6331_v5 = vpop.eup %6330 }
0x30fd   :  { %v3019_v15 = vadd.f32 1.0, %v6331_v5 }
0x30ff   :  { %6332 = vrcp.f32 %v3019_v15 }
0x3109   :  { %v6333_v50 = vpop.eup %6332 }
0x310a   :  { %v3023_v40 = vmul.f32 %v6333_v50, %v7485_v34 }
0x316d   :  { %v3026_v52 = vpop.permute.xlu1 %3025 }
0x316e   :  { %v3028_v45 = vmul.f32 %v6333_v50, %v3026_v52 }
0x3170   :  { %3030 = vrot.lane.b32.xlu1 %v3028_v45, %s6609_s24 }
0x31e2   :  { %v3031_v19 = vpop.permute.xlu1 %3030 }
0x31e3   :  { %v7591_v55 = vadd.f32 %v3031_v19, %v3023_v40 }
0x31e5   :  { %6334 = vtanh.f32 %v7591_v55 }
0x31ef   :  { %v6335_v27 = vpop.eup %6334 }
0x31f0   :  { %3036 = vrot.lane.b32.xlu1 %v6335_v27, %s6609_s24 }
0x3262   :  { %v3037_v20 = vpop.permute.xlu1 %3036 }
0x3263   :  { %v7595_v23 = vmul.f32 %v6333_v50, %v3037_v20 }
0x3265   :  { %3041 = vrot.lane.b32.xlu0 %v7595_v23, %s6612_s25 }
0x32d7   :  { %v7599_v24 = vpop.permute.xlu0 %3041 }
0x32d8   :  { %5589 = vmatmul.mubr.msk.f32.vlgmr.msra.gmra.mrb[20].mxu1 %vm1351_vm12, %v7599_v24 }
0x32d9   :  { %6055 = vmatpush3.bf16.msra.mxu1 %v7264_v29  ;;  %5634 = vmatprep.mubr.msk.f32.mxu1 %vm6607_vm0, %v6608_v1 }
0x32da   :  { %6056 = vmatprep.subr.bf16.mxu1 %v6606_v0 }
0x32dd   :  { %6058 = vmatpush3.bf16.msra.mxu1 %v7270_v31 }
0x32de   :  { %6059 = vmatprep.subr.bf16.mxu1 %v6606_v0 }
0x32e1   :  { %6061 = vmatpush3.bf16.msra.mxu1 %v7282_v35 }
0x32e2   :  { %6062 = vmatprep.subr.bf16.mxu1 %v6606_v0 }
0x32e5   :  { %6064 = vmatpush3.bf16.msra.mxu1 %v7299_v58 }
0x32e6   :  { %6065 = vmatprep.subr.bf16.mxu1 %v6606_v0 }
0x32e9   :  { %6067 = vmatpush3.bf16.msra.mxu1 %v7313_v11 }
0x32ea   :  { %6074 = vmatprep.subr.bf16.mxu1 %v6606_v0 }
0x33ab   :  { %v3209_v34 = vpop.f32.mrb[20].mxu1 }
0x33ac   :  { %v3220_v13 = vrot.slane %v3209_v34, %v6969_v7  ;;  %v5590_v6 = vpop.f32.mrb[21].mxu1 }
0x33ae   :  { %v3221_v9 = vcombine.high %v3220_v13, %v3220_v13  ;;  %v3228_v28 = vrot.slane %v3220_v13, %v6969_v7 }
0x33b0   :  { %v3235_v30 = vrot.slane %v3221_v9, %v6969_v7  ;;  %v3239_v33 = vrot.slane %v3228_v28, %v6980_v17 }
0x33b2   :  { %v3243_v36 = vrot.slane %v3235_v30, %v6980_v17  ;;  %v3246_v37 = vadd.f32 %v7620_v21, %v3239_v33 }
0x33b4   :  { %v3247_v39 = vadd.f32 %v7623_v49, %v3243_v36  ;;  %6336 = vtanh.f32 %v3246_v37 }
0x33b6   :  { %6338 = vtanh.f32 %v3247_v39 }
0x33be   :  { %v6337_v56 = vpop.eup %6336 }
0x33bf   :  { %v3250_v26 = vmul.f32 %v7626_v63, %v6337_v56 }
0x33c0   :  { %v6339_v46 = vpop.eup %6338 }
0x33c1   :  { %v3252_v57 = vsel %vm1351_vm12, %v3250_v26, 0.0  ;;  %v3251_v59 = vmul.f32 %v7626_v63, %v6339_v46  ;;  %v3132_v46 = vstv %s3131_s13 }
0x33c2   :  { %3253 = vadd.xlane.f32.xlu1 %v3252_v57  ;;  %vm3133_vm5 = vcmp.eq.s32.totalorder %v3132_v46, 1 }
0x33c3   :  { %v3255_v60 = vsel %vm1351_vm12, %v3251_v59, 0.0 }
0x33c4   :  { %3256 = vadd.xlane.f32.xlu0 %v3255_v60 }
0x344f   :  { %v3254_v10 = vpop.xlane.xlu1 %3253 }
0x3450   :  { %v3263_v43 = vrot.slane %v3254_v10, %v7123_v61 }
0x3451   :  { %v3257_v38 = vpop.xlane.xlu0 %3256 }
0x3452   :  { %v3267_v41 = vrot.slane %v3257_v38, %v7123_v61 }
0x3454   :  { %v3268_v48 = vsel %vm183_vm1, %v3267_v41, %v3263_v43  ;;  %v7669_v43 = vld [vmem:[#allocation9] sm:$0xff] }
0x3455   :  { %v3270_v18 = vsel %vm1576_vm13, %v3268_v48, -inf  ;;  %v7672_v48 = vld [vmem:[#allocation9 + $0x8] sm:$0xff] }
0x3456   :  { %3271 = vmax.xlane.f32.xlu1 %v3270_v18 }
0x34e3   :  { %v3272_v14 = vpop.xlane.xlu1 %3271 }
0x34e4   :  { %v3277_v5 = vrot.slane %v3272_v14, %v6980_v17  ;;  %v3281_v15 = vrot.slane %v3272_v14, %v7130_v2 }
0x34e6   :  { %v3284_v50 = vsub.f32 %v3254_v10, %v3277_v5  ;;  %v3285_v52 = vsub.f32 %v3257_v38, %v3281_v15 }
0x34e8   :  { %v3286_v45 = vmul.f32 1.442695, %v3284_v50  ;;  %v3288_v40 = vmul.f32 1.442695, %v3285_v52 }
0x34ea   :  { %6340 = vpow2.f32 %v3286_v45 }
0x34eb   :  { %6342 = vpow2.f32 %v3288_v40 }
0x34f4   :  { %v6341_v19 = vpop.eup %6340 }
0x34f5   :  { %v6343_v27 = vpop.eup %6342  ;;  %3293 = vperm.xlu1 %6199, %v6341_v19  }
0x34f6   :  { %3296 = vperm.xlu0 %6198, %v6343_v27  }
0x34f9   :  { %3045 = vrot.lane.b32.xlu1 %v7572_v25, %s6609_s24 }
0x34fd   :  { %3051 = vrot.lane.b32.xlu1 %v7560_v51, %s6612_s25 }
0x3574   :  { %v3294_v20 = vpop.permute.xlu1 %3293 }
0x3575   :  { %v3297_v34 = vpop.permute.xlu0 %3296  ;;  %v3301_v13 = vrot.slane %v3294_v20, %v7123_v61 }
0x3576   :  { %v3305_v6 = vrot.slane %v3297_v34, %v7123_v61 }
0x3578   :  { %v3046_v9 = vpop.permute.xlu1 %3045  ;;  %v3306_v28 = vsel %vm183_vm1, %v3305_v6, %v3301_v13 }
0x3579   :  { %v3308_v30 = vsel %vm1576_vm13, %v3306_v28, 0.0  ;;  %v3054_v33 = vsel %vm1351_vm12, %v7599_v24, %v3046_v9 }
0x357a   :  { %3309 = vadd.xlane.f32.xlu1 %v3308_v30 }
0x357c   :  { %v3052_v36 = vpop.permute.xlu1 %3051 }
0x357d   :  { %v3055_v25 = vsel %vm1785_vm15, %v3054_v33, %v3052_v36 }
0x357e   :  { %5578 = vmatmul.mubr.msk.f32.vlgmr.msra.gmra.mrb[20].mxu0 %vm1676_vm14, %v3055_v25 }
0x357f   :  { %6040 = vmatpush3.bf16.msra.mxu0 %v7151_v42  ;;  %5611 = vmatprep.mubr.msk.f32.mxu0 %vm6607_vm0, %v6608_v1 }
0x3580   :  { %6041 = vmatprep.subr.bf16.mxu0 %v6606_v0 }
0x3583   :  { %6043 = vmatpush3.bf16.msra.mxu0 %v7157_v44 }
0x3584   :  { %6044 = vmatprep.subr.bf16.mxu0 %v6606_v0 }
0x3587   :  { %6046 = vmatpush3.bf16.msra.mxu0 %v7167_v47 }
0x3588   :  { %6047 = vmatprep.subr.bf16.mxu0 %v6606_v0 }
0x358b   :  { %6049 = vmatpush3.bf16.msra.mxu0 %v7177_v53 }
0x358c   :  { %6050 = vmatprep.subr.bf16.mxu0 %v6606_v0 }
0x358f   :  { %6052 = vmatpush3.bf16.msra.mxu0 %v7187_v54 }
0x3590   :  { %6068 = vmatprep.subr.bf16.mxu0 %v6606_v0 }
0x3607   :  { %v3310_v51 = vpop.xlane.xlu1 %3309 }
0x3608   :  { %6344 = vrcp.f32 %v3310_v51 }
0x3612   :  { %v6345_v24 = vpop.eup %6344 }
0x3613   :  { %v3316_v37 = vrot.slane %v6345_v24, %v6980_v17  ;;  %v3320_v56 = vrot.slane %v6345_v24, %v7130_v2 }
0x3615   :  { %v3323_v39 = vmul.f32 %v6341_v19, %v3316_v37  ;;  %v3324_v26 = vmul.f32 %v6343_v27, %v3320_v56 }
0x3617   :  { %3327 = vperm.xlu0 %6198, %v3323_v39   ;;  %v3362_v39 = vrot.slane %v7595_v23, 5 }
0x361b   :  { %3332 = vperm.xlu0 %6198, %v3324_v26  }
0x3651   :  { %v3125_v57 = vpop.f32.mrb[20].mxu0 }
0x3652   :  { %v7665_v59 = vadd.f32 %v7357_v3, %v3125_v57  ;;  %v5579_v60 = vpop.f32.mrb[21].mxu0 }
0x3654   :  { %v3135_v10 = vrot.slane %v7665_v59, 5  ;;  %v3136_v38 = vrot.slane %v7665_v59, 6 }
0x3656   :  { %v3139_v41 = vsel %vm3133_vm5, %v7669_v43, %v3135_v10  ;;  %v3140_v18 = vsel %vm3133_vm5, %v7672_v48, %v3136_v38 }
0x3657   :  { %v3474_v14 = vrot.slane %v3139_v41, 3  ;;  %v3475_v5 = vrot.slane %v3140_v18, 2  ;;  %v3353_v56 = vrot.slane %v3140_v18, 7 }
0x3659   :  { %v7676_v15 = vsel %vm183_vm1, %v3475_v5, %v3474_v14  ;;  %v3354_v46 = vsel %vm616_vm6, %v3353_v56, %v3139_v41  ;;  %v7699_v41 = vld [vmem:[#allocation15] ss:$0 sm:$0xff] }
0x3696   :  { %v3328_v3 = vpop.permute.xlu0 %3327 }
0x3697   :  { %v3335_v50 = vmul.f32 %v7562_v62, %v3328_v3 }
0x3699   :  { %v3337_v52 = vsel %vm1351_vm12, %v3335_v50, 0.0 }
0x369a   :  { %v3338_v45 = vrot.slane %v3337_v52, 4  ;;  %v3333_v40 = vpop.permute.xlu0 %3332 }
0x369b   :  { %v3336_v19 = vmul.f32 %v7566_v22, %v3333_v40 }
0x369c   :  { %v3339_v27 = vadd.f32 %v3338_v45, %v3337_v52 }
0x369d   :  { %v3344_v20 = vsel %vm1351_vm12, %v3336_v19, 0.0 }
0x369e   :  { %v3340_v34 = vrot.slane %v3339_v27, 2  ;;  %v3345_v13 = vrot.slane %v3344_v20, 4 }
0x36a0   :  { %v3341_v6 = vadd.f32 %v3340_v34, %v3339_v27  ;;  %v3346_v9 = vadd.f32 %v3345_v13, %v3344_v20 }
0x36a2   :  { %v3347_v28 = vrot.slane %v3346_v9, 2  ;;  %v3342_v30 = vrot.slane %v3341_v6, 1 }
0x36a4   :  { %v3348_v33 = vadd.f32 %v3347_v28, %v3346_v9  ;;  %v3343_v25 = vadd.f32 %v3342_v30, %v3341_v6 }
0x36a6   :  { %v3349_v36 = vrot.slane %v3348_v33, 1 }
0x36a8   :  { %v3350_v51 = vadd.f32 %v3349_v36, %v3348_v33 }
0x36aa   :  { %v3358_v24 = vsel %vm616_vm6, %v3350_v51, %v3343_v25  ;;  %v7684_v37 = vsel %vm183_vm1, %v3350_v51, %v3343_v25 }
0x36ab   :  { %3359 = vrot.lane.b32.xlu0 %v3358_v24, %s6615_s8 }
0x36af   :  { %3363 = vrot.lane.b32.xlu0 %v3362_v39, %s6614_s5 }
0x371d   :  { %v3360_v26 = vpop.permute.xlu0 %3359 }
0x371e   :  { %v3366_v57 = vsel %vm186_vm2, %v3354_v46, %v3360_v26 }
0x3721   :  { %v3364_v60 = vpop.permute.xlu0 %3363 }
0x3722   :  { %v3367_v10 = vsel %vm188_vm3, %v3366_v57, %v3364_v60 }
0x3723   :  { %v3369_v38 = vrot.slane %v3367_v10, 3 }
0x3725   :  { %5612 = vmatmul.mubr.msk.f32.vlgmr.msra.gmra.mrb[22].mxu0 %vm1676_vm14, %v3369_v38 }
0x3726   :  { %6070 = vmatpush3.bf16.msra.mxu0 %v7037_v12  ;;  %5645 = vmatprep.mubr.msk.f32.mxu0 %vm6607_vm0, %v6608_v1 }
0x3727   :  { %6071 = vmatprep.subr.bf16.mxu0 %v6606_v0 }
0x372a   :  { %6073 = vmatpush3.bf16.msra.mxu0 %v7042_v16 }
0x372b   :  { %6089 = vmatprep.subr.bf16.mxu0 %v6606_v0 }
0x37f8   :  { %v3438_v23 = vpop.f32.mrb[22].mxu0 }
0x37f9   :  { %v3439_v18 = vadd.f32 %v7699_v41, %v3438_v23  ;;  %v5613_v14 = vpop.f32.mrb[23].mxu0 }
0x37fb   :  { %6346 = vtanh.f32 %v3439_v18  ;;  %v4926_v3 = vmul.f32 -1.442695, %v3439_v18 }
0x37fd   :  { %6348 = vpow2.f32 %v4926_v3 }
0x3805   :  { %v6347_v5 = vpop.eup %6346 }
0x3806   :  { %3451 = vrot.lane.b32.xlu0 %v6347_v5, %s6609_s24 }
0x3807   :  { %v6349_v50 = vpop.eup %6348 }
0x3808   :  { %v3445_v52 = vadd.f32 1.0, %v6349_v50 }
0x380a   :  { %6350 = vrcp.f32 %v3445_v52 }
0x3814   :  { %v6351_v45 = vpop.eup %6350 }
0x3815   :  { %v3449_v27 = vmul.f32 %v6351_v45, %v7591_v55 }
0x3878   :  { %v3452_v40 = vpop.permute.xlu0 %3451 }
0x3879   :  { %v3454_v19 = vmul.f32 %v6351_v45, %v3452_v40 }
0x387b   :  { %3456 = vrot.lane.b32.xlu0 %v3454_v19, %s6609_s24 }
0x38ed   :  { %v3457_v20 = vpop.permute.xlu0 %3456 }
0x38ee   :  { %v7705_v34 = vadd.f32 %v3457_v20, %v3449_v27 }
0x38f0   :  { %6352 = vtanh.f32 %v7705_v34 }
0x38fa   :  { %v6353_v13 = vpop.eup %6352 }
0x38fb   :  { %3462 = vrot.lane.b32.xlu0 %v6353_v13, %s6609_s24 }
0x396d   :  { %v3463_v6 = vpop.permute.xlu0 %3462 }
0x396e   :  { %v7709_v9 = vmul.f32 %v6351_v45, %v3463_v6 }
0x3970   :  { %3467 = vrot.lane.b32.xlu1 %v7709_v9, %s6612_s25 }
0x39e2   :  { %v7713_v28 = vpop.permute.xlu1 %3467 }
0x39e3   :  { %5646 = vmatmul.mubr.msk.f32.vlgmr.msra.gmra.mrb[24].mxu0 %vm1351_vm12, %v7713_v28 }
0x39e4   :  { %6091 = vmatpush3.bf16.msra.mxu0 %v7264_v29  ;;  %5691 = vmatprep.mubr.msk.f32.mxu0 %vm6607_vm0, %v6608_v1 }
0x39e5   :  { %6092 = vmatprep.subr.bf16.mxu0 %v6606_v0 }
0x39e8   :  { %6094 = vmatpush3.bf16.msra.mxu0 %v7270_v31 }
0x39e9   :  { %6095 = vmatprep.subr.bf16.mxu0 %v6606_v0 }
0x39ec   :  { %6097 = vmatpush3.bf16.msra.mxu0 %v7282_v35 }
0x39ed   :  { %6098 = vmatprep.subr.bf16.mxu0 %v6606_v0 }
0x39f0   :  { %6100 = vmatpush3.bf16.msra.mxu0 %v7299_v58 }
0x39f1   :  { %6101 = vmatprep.subr.bf16.mxu0 %v6606_v0 }
0x39f4   :  { %6103 = vmatpush3.bf16.msra.mxu0 %v7313_v11 }
0x39f5   :  { %6110 = vmatprep.subr.bf16.mxu0 %v6606_v0 }
0x3ab6   :  { %v3635_v55 = vpop.f32.mrb[24].mxu0 }
0x3ab7   :  { %v3646_v30 = vrot.slane %v3635_v55, %v6969_v7  ;;  %v5647_v33 = vpop.f32.mrb[25].mxu0 }
0x3ab9   :  { %v3647_v36 = vcombine.high %v3646_v30, %v3646_v30  ;;  %v3654_v25 = vrot.slane %v3646_v30, %v6969_v7 }
0x3abb   :  { %v3661_v51 = vrot.slane %v3647_v36, %v6969_v7  ;;  %v3665_v24 = vrot.slane %v3654_v25, %v6980_v17 }
0x3abd   :  { %v3669_v39 = vrot.slane %v3661_v51, %v6980_v17  ;;  %v3672_v56 = vadd.f32 %v7620_v21, %v3665_v24 }
0x3abf   :  { %v3673_v26 = vadd.f32 %v7623_v49, %v3669_v39  ;;  %6354 = vtanh.f32 %v3672_v56 }
0x3ac1   :  { %6356 = vtanh.f32 %v3673_v26 }
0x3ac9   :  { %v6355_v46 = vpop.eup %6354 }
0x3aca   :  { %v3676_v57 = vmul.f32 %v7626_v63, %v6355_v46 }
0x3acb   :  { %v6357_v60 = vpop.eup %6356 }
0x3acc   :  { %v3678_v10 = vsel %vm1351_vm12, %v3676_v57, 0.0  ;;  %v3677_v38 = vmul.f32 %v7626_v63, %v6357_v60 }
0x3acd   :  { %3679 = vadd.xlane.f32.xlu0 %v3678_v10 }
0x3ace   :  { %v3681_v23 = vsel %vm1351_vm12, %v3677_v38, 0.0 }
0x3acf   :  { %3682 = vadd.xlane.f32.xlu1 %v3681_v23  ;;  %v3558_v23 = vstv %s3557_s0 }
0x3ad0   :  { %vm3559_vm6 = vcmp.eq.s32.totalorder %v3558_v23, 1  ;;  %v3788_v23 = vrot.slane %v7709_v9, 4 }
0x3b5a   :  { %v3680_v18 = vpop.xlane.xlu0 %3679 }
0x3b5b   :  { %v3689_v5 = vrot.slane %v3680_v18, %v7123_v61 }
0x3b5c   :  { %v3683_v14 = vpop.xlane.xlu1 %3682 }
0x3b5d   :  { %v3693_v3 = vrot.slane %v3683_v14, %v7123_v61 }
0x3b5f   :  { %v3694_v50 = vsel %vm183_vm1, %v3693_v3, %v3689_v5 }
0x3b60   :  { %v3696_v52 = vsel %vm1576_vm13, %v3694_v50, -inf }
0x3b61   :  { %3697 = vmax.xlane.f32.xlu0 %v3696_v52 }
0x3bee   :  { %v3698_v45 = vpop.xlane.xlu0 %3697 }
0x3bef   :  { %v3703_v40 = vrot.slane %v3698_v45, %v6980_v17  ;;  %v3707_v19 = vrot.slane %v3698_v45, %v7130_v2 }
0x3bf1   :  { %v3710_v27 = vsub.f32 %v3680_v18, %v3703_v40  ;;  %v3711_v20 = vsub.f32 %v3683_v14, %v3707_v19  ;;  %v7775_v14 = vld [vmem:[%s8050_s11] ss:$0 sm:$0xff]  ;;  %s4933_s11 = sld [smem:[#allocation5 + $0x5]] }
0x3bf3   :  { %v3712_v13 = vmul.f32 1.442695, %v3710_v27  ;;  %v3714_v6 = vmul.f32 1.442695, %v3711_v20 }
0x3bf5   :  { %6358 = vpow2.f32 %v3712_v13 }
0x3bf6   :  { %6360 = vpow2.f32 %v3714_v6 }
0x3bf7   :  { %p3982_p2 = scmp.gt.s32.totalorder %s4933_s11, 0 }
0x3bf9   :  { %s3983_s18 = scalar_select %p3982_p2, 1, 0 }
0x3bff   :  { %v6359_v55 = vpop.eup %6358 }
0x3c00   :  { %v6361_v30 = vpop.eup %6360  ;;  %3719 = vperm.xlu0 %6198, %v6359_v55  }
0x3c01   :  { %3722 = vperm.xlu1 %6199, %v6361_v30  }
0x3c04   :  { %3471 = vrot.lane.b32.xlu0 %v7684_v37, %s6609_s24 }
0x3c08   :  { %3477 = vrot.lane.b32.xlu0 %v7676_v15, %s6612_s25 }
0x3c7f   :  { %v3720_v33 = vpop.permute.xlu0 %3719 }
0x3c80   :  { %v3723_v36 = vpop.permute.xlu1 %3722  ;;  %v3727_v25 = vrot.slane %v3720_v33, %v7123_v61 }
0x3c81   :  { %v3731_v51 = vrot.slane %v3723_v36, %v7123_v61 }
0x3c83   :  { %v3472_v24 = vpop.permute.xlu0 %3471  ;;  %v3732_v39 = vsel %vm183_vm1, %v3731_v51, %v3727_v25 }
0x3c84   :  { %v3734_v56 = vsel %vm1576_vm13, %v3732_v39, 0.0  ;;  %v3480_v26 = vsel %vm1351_vm12, %v7713_v28, %v3472_v24 }
0x3c85   :  { %3735 = vadd.xlane.f32.xlu0 %v3734_v56 }
0x3c87   :  { %v3478_v46 = vpop.permute.xlu0 %3477 }
0x3c88   :  { %v3481_v37 = vsel %vm1785_vm15, %v3480_v26, %v3478_v46 }
0x3c89   :  { %5635 = vmatmul.mubr.msk.f32.vlgmr.msra.gmra.mrb[22].mxu1 %vm1676_vm14, %v3481_v37 }
0x3c8a   :  { %6076 = vmatpush3.bf16.msra.mxu1 %v7151_v42  ;;  %5668 = vmatprep.mubr.msk.f32.mxu1 %vm6607_vm0, %v6608_v1 }
0x3c8b   :  { %6077 = vmatprep.subr.bf16.mxu1 %v6606_v0 }
0x3c8e   :  { %6079 = vmatpush3.bf16.msra.mxu1 %v7157_v44 }
0x3c8f   :  { %6080 = vmatprep.subr.bf16.mxu1 %v6606_v0 }
0x3c92   :  { %6082 = vmatpush3.bf16.msra.mxu1 %v7167_v47 }
0x3c93   :  { %6083 = vmatprep.subr.bf16.mxu1 %v6606_v0 }
0x3c96   :  { %6085 = vmatpush3.bf16.msra.mxu1 %v7177_v53 }
0x3c97   :  { %6086 = vmatprep.subr.bf16.mxu1 %v6606_v0 }
0x3c9a   :  { %6088 = vmatpush3.bf16.msra.mxu1 %v7187_v54 }
0x3c9b   :  { %6104 = vmatprep.subr.bf16.mxu1 %v6606_v0 }
0x3d12   :  { %v3736_v15 = vpop.xlane.xlu0 %3735 }
0x3d13   :  { %6362 = vrcp.f32 %v3736_v15 }
0x3d1d   :  { %v6363_v28 = vpop.eup %6362 }
0x3d1e   :  { %v3742_v57 = vrot.slane %v6363_v28, %v6980_v17  ;;  %v3746_v10 = vrot.slane %v6363_v28, %v7130_v2 }
0x3d20   :  { %v3749_v60 = vmul.f32 %v6359_v55, %v3742_v57  ;;  %v3750_v38 = vmul.f32 %v6361_v30, %v3746_v10 }
0x3d22   :  { %3753 = vperm.xlu1 %6199, %v3749_v60  }
0x3d26   :  { %3758 = vperm.xlu1 %6199, %v3750_v38  }
0x3d5c   :  { %v3551_v18 = vpop.f32.mrb[22].mxu1 }
0x3d5d   :  { %v7778_v5 = vadd.f32 %v7775_v14, %v3551_v18  ;;  %v5636_v3 = vpop.f32.mrb[23].mxu1 }
0x3d5f   :  { %v3561_v50 = vrot.slane %v7778_v5, 4  ;;  %v3562_v52 = vrot.slane %v7778_v5, 5 }
0x3d61   :  { %v3565_v45 = vsel %vm3559_vm6, %v7669_v43, %v3561_v50  ;;  %v3566_v40 = vsel %vm3559_vm6, %v7672_v48, %v3562_v52 }
0x3d62   :  { %v3900_v19 = vrot.slane %v3565_v45, 4  ;;  %v3901_v27 = vrot.slane %v3566_v40, 3  ;;  %v3779_v18 = vrot.slane %v3566_v40, 7 }
0x3d64   :  { %v7785_v20 = vsel %vm183_vm1, %v3901_v27, %v3900_v19  ;;  %v3780_v50 = vsel %vm761_vm7, %v3779_v18, %v3565_v45 }
0x3da1   :  { %v3754_v13 = vpop.permute.xlu1 %3753 }
0x3da2   :  { %v3761_v6 = vmul.f32 %v7562_v62, %v3754_v13 }
0x3da4   :  { %v3763_v55 = vsel %vm1351_vm12, %v3761_v6, 0.0 }
0x3da5   :  { %v3764_v30 = vrot.slane %v3763_v55, 4  ;;  %v3759_v33 = vpop.permute.xlu1 %3758 }
0x3da6   :  { %v3762_v36 = vmul.f32 %v7566_v22, %v3759_v33 }
0x3da7   :  { %v3765_v25 = vadd.f32 %v3764_v30, %v3763_v55 }
0x3da8   :  { %v3770_v51 = vsel %vm1351_vm12, %v3762_v36, 0.0 }
0x3da9   :  { %v3766_v24 = vrot.slane %v3765_v25, 2  ;;  %v3771_v39 = vrot.slane %v3770_v51, 4 }
0x3dab   :  { %v3767_v56 = vadd.f32 %v3766_v24, %v3765_v25  ;;  %v3772_v26 = vadd.f32 %v3771_v39, %v3770_v51 }
0x3dad   :  { %v3773_v46 = vrot.slane %v3772_v26, 2  ;;  %v3768_v37 = vrot.slane %v3767_v56, 1 }
0x3daf   :  { %v3774_v15 = vadd.f32 %v3773_v46, %v3772_v26  ;;  %v3769_v57 = vadd.f32 %v3768_v37, %v3767_v56 }
0x3db1   :  { %v3775_v28 = vrot.slane %v3774_v15, 1 }
0x3db3   :  { %v3776_v60 = vadd.f32 %v3775_v28, %v3774_v15 }
0x3db5   :  { %v3784_v10 = vsel %vm761_vm7, %v3776_v60, %v3769_v57  ;;  %v7793_v38 = vsel %vm183_vm1, %v3776_v60, %v3769_v57 }
0x3db6   :  { %3785 = vrot.lane.b32.xlu1 %v3784_v10, %s6615_s8 }
0x3dba   :  { %3789 = vrot.lane.b32.xlu1 %v3788_v23, %s6614_s5 }
0x3e28   :  { %v3786_v3 = vpop.permute.xlu1 %3785 }
0x3e29   :  { %v3792_v52 = vsel %vm186_vm2, %v3780_v50, %v3786_v3 }
0x3e2c   :  { %v3790_v19 = vpop.permute.xlu1 %3789 }
0x3e2d   :  { %v3793_v27 = vsel %vm188_vm3, %v3792_v52, %v3790_v19 }
0x3e2e   :  { %v3795_v13 = vrot.slane %v3793_v27, 4 }
0x3e30   :  { %5669 = vmatmul.mubr.msk.f32.vlgmr.msra.gmra.mrb[24].mxu1 %vm1676_vm14, %v3795_v13 }
0x3e31   :  { %6106 = vmatpush3.bf16.msra.mxu1 %v7037_v12  ;;  %5702 = vmatprep.mubr.msk.f32.mxu1 %vm6607_vm0, %v6608_v1 }
0x3e32   :  { %6107 = vmatprep.subr.bf16.mxu1 %v6606_v0 }
0x3e35   :  { %6109 = vmatpush3.bf16.msra.mxu1 %v7042_v16 }
0x3e36   :  { %6125 = vmatprep.subr.bf16.mxu1 %v6606_v0 }
0x3f03   :  { %v3864_v9 = vpop.f32.mrb[24].mxu1 }
0x3f04   :  { %v3865_v45 = vadd.f32 %v7699_v41, %v3864_v9  ;;  %v5670_v40 = vpop.f32.mrb[25].mxu1 }
0x3f06   :  { %6364 = vtanh.f32 %v3865_v45  ;;  %v4931_v55 = vmul.f32 -1.442695, %v3865_v45 }
0x3f08   :  { %6366 = vpow2.f32 %v4931_v55 }
0x3f10   :  { %v6365_v6 = vpop.eup %6364 }
0x3f11   :  { %3877 = vrot.lane.b32.xlu1 %v6365_v6, %s6609_s24 }
0x3f12   :  { %v6367_v30 = vpop.eup %6366 }
0x3f13   :  { %v3871_v33 = vadd.f32 1.0, %v6367_v30 }
0x3f15   :  { %6368 = vrcp.f32 %v3871_v33 }
0x3f1f   :  { %v6369_v36 = vpop.eup %6368 }
0x3f20   :  { %v3875_v24 = vmul.f32 %v6369_v36, %v7705_v34 }
0x3f83   :  { %v3878_v25 = vpop.permute.xlu1 %3877 }
0x3f84   :  { %v3880_v51 = vmul.f32 %v6369_v36, %v3878_v25 }
0x3f86   :  { %3882 = vrot.lane.b32.xlu1 %v3880_v51, %s6609_s24 }
0x3ff8   :  { %v3883_v39 = vpop.permute.xlu1 %3882 }
0x3ff9   :  { %v7812_v56 = vadd.f32 %v3883_v39, %v3875_v24 }
0x3ffb   :  { %6370 = vtanh.f32 %v7812_v56 }
0x4005   :  { %v6371_v26 = vpop.eup %6370 }
0x4006   :  { %3888 = vrot.lane.b32.xlu1 %v6371_v26, %s6609_s24 }
0x4078   :  { %v3889_v46 = vpop.permute.xlu1 %3888 }
0x4079   :  { %v7816_v37 = vmul.f32 %v6369_v36, %v3889_v46 }
0x407b   :  { %3893 = vrot.lane.b32.xlu0 %v7816_v37, %s6612_s25 }
0x40ed   :  { %v7820_v15 = vpop.permute.xlu0 %3893 }
0x40ee   :  { %5703 = vmatmul.mubr.msk.f32.vlgmr.msra.gmra.mrb[26].mxu1 %vm1351_vm12, %v7820_v15 }
0x40ef   :  { %6127 = vmatpush3.bf16.msra.mxu1 %v7264_v29  ;;  %5748 = vmatprep.mubr.msk.f32.mxu1 %vm6607_vm0, %v6608_v1 }
0x40f0   :  { %6128 = vmatprep.subr.bf16.mxu1 %v6606_v0 }
0x40f3   :  { %6130 = vmatpush3.bf16.msra.mxu1 %v7270_v31 }
0x40f4   :  { %6131 = vmatprep.subr.bf16.mxu1 %v6606_v0 }
0x40f7   :  { %6133 = vmatpush3.bf16.msra.mxu1 %v7282_v35 }
0x40f8   :  { %6134 = vmatprep.subr.bf16.mxu1 %v6606_v0 }
0x40fb   :  { %6136 = vmatpush3.bf16.msra.mxu1 %v7299_v58 }
0x40fc   :  { %6137 = vmatprep.subr.bf16.mxu1 %v6606_v0 }
0x40ff   :  { %6139 = vmatpush3.bf16.msra.mxu1 %v7313_v11 }
0x4100   :  { %6146 = vmatprep.subr.bf16.mxu1 %v6606_v0 }
0x41c1   :  { %v4061_v34 = vpop.f32.mrb[26].mxu1 }
0x41c2   :  { %v4072_v28 = vrot.slane %v4061_v34, %v6969_v7  ;;  %v5704_v57 = vpop.f32.mrb[27].mxu1 }
0x41c4   :  { %v4073_v60 = vcombine.high %v4072_v28, %v4072_v28  ;;  %v4080_v10 = vrot.slane %v4072_v28, %v6969_v7 }
0x41c6   :  { %v4087_v23 = vrot.slane %v4073_v60, %v6969_v7  ;;  %v4091_v18 = vrot.slane %v4080_v10, %v6980_v17 }
0x41c8   :  { %v4095_v3 = vrot.slane %v4087_v23, %v6980_v17  ;;  %v4098_v50 = vadd.f32 %v7620_v21, %v4091_v18 }
0x41ca   :  { %v4099_v52 = vadd.f32 %v7623_v49, %v4095_v3  ;;  %6372 = vtanh.f32 %v4098_v50 }
0x41cc   :  { %6374 = vtanh.f32 %v4099_v52 }
0x41d4   :  { %v6373_v19 = vpop.eup %6372 }
0x41d5   :  { %v4102_v27 = vmul.f32 %v7626_v63, %v6373_v19 }
0x41d6   :  { %v6375_v13 = vpop.eup %6374 }
0x41d7   :  { %v4104_v9 = vsel %vm1351_vm12, %v4102_v27, 0.0  ;;  %v4103_v45 = vmul.f32 %v7626_v63, %v6375_v13 }
0x41d8   :  { %4105 = vadd.xlane.f32.xlu1 %v4104_v9 }
0x41d9   :  { %v4107_v40 = vsel %vm1351_vm12, %v4103_v45, 0.0 }
0x41da   :  { %4108 = vadd.xlane.f32.xlu0 %v4107_v40 }
0x4265   :  { %v4106_v6 = vpop.xlane.xlu1 %4105 }
0x4266   :  { %v4115_v30 = vrot.slane %v4106_v6, %v7123_v61 }
0x4267   :  { %v4109_v55 = vpop.xlane.xlu0 %4108 }
0x4268   :  { %v4119_v33 = vrot.slane %v4109_v55, %v7123_v61 }
0x426a   :  { %v4120_v36 = vsel %vm183_vm1, %v4119_v33, %v4115_v30 }
0x426b   :  { %v4122_v25 = vsel %vm1576_vm13, %v4120_v36, -inf }
0x426c   :  { %4123 = vmax.xlane.f32.xlu1 %v4122_v25 }
0x42f9   :  { %v4124_v51 = vpop.xlane.xlu1 %4123 }
0x42fa   :  { %v4129_v24 = vrot.slane %v4124_v51, %v6980_v17  ;;  %v4133_v39 = vrot.slane %v4124_v51, %v7130_v2 }
0x42fc   :  { %v4136_v26 = vsub.f32 %v4106_v6, %v4129_v24  ;;  %v4137_v46 = vsub.f32 %v4109_v55, %v4133_v39  ;;  %v3984_v55 = vstv %s3983_s18 }
0x42fd   :  { %vm3985_vm7 = vcmp.eq.s32.totalorder %v3984_v55, 1 }
0x42fe   :  { %v4138_v34 = vmul.f32 1.442695, %v4136_v26  ;;  %v4140_v28 = vmul.f32 1.442695, %v4137_v46 }
0x4300   :  { %6376 = vpow2.f32 %v4138_v34 }
0x4301   :  { %6378 = vpow2.f32 %v4140_v28 }
0x430a   :  { %v6377_v57 = vpop.eup %6376 }
0x430b   :  { %v6379_v60 = vpop.eup %6378  ;;  %4145 = vperm.xlu1 %6199, %v6377_v57  }
0x430c   :  { %4148 = vperm.xlu0 %6198, %v6379_v60  }
0x430f   :  { %3897 = vrot.lane.b32.xlu1 %v7793_v38, %s6609_s24 }
0x4313   :  { %3903 = vrot.lane.b32.xlu1 %v7785_v20, %s6612_s25 }
0x438a   :  { %v4146_v10 = vpop.permute.xlu1 %4145 }
0x438b   :  { %v4149_v23 = vpop.permute.xlu0 %4148  ;;  %v4153_v18 = vrot.slane %v4146_v10, %v7123_v61 }
0x438c   :  { %v4157_v3 = vrot.slane %v4149_v23, %v7123_v61 }
0x438e   :  { %v3898_v50 = vpop.permute.xlu1 %3897  ;;  %v4158_v52 = vsel %vm183_vm1, %v4157_v3, %v4153_v18 }
0x438f   :  { %v4160_v19 = vsel %vm1576_vm13, %v4158_v52, 0.0  ;;  %v3906_v27 = vsel %vm1351_vm12, %v7820_v15, %v3898_v50 }
0x4390   :  { %4161 = vadd.xlane.f32.xlu1 %v4160_v19 }
0x4392   :  { %v3904_v13 = vpop.permute.xlu1 %3903 }
0x4393   :  { %v3907_v38 = vsel %vm1785_vm15, %v3906_v27, %v3904_v13 }
0x4394   :  { %5692 = vmatmul.mubr.msk.f32.vlgmr.msra.gmra.mrb[26].mxu0 %vm1676_vm14, %v3907_v38 }
0x4395   :  { %6112 = vmatpush3.bf16.msra.mxu0 %v7151_v42  ;;  %5725 = vmatprep.mubr.msk.f32.mxu0 %vm6607_vm0, %v6608_v1 }
0x4396   :  { %6113 = vmatprep.subr.bf16.mxu0 %v6606_v0 }
0x4399   :  { %6115 = vmatpush3.bf16.msra.mxu0 %v7157_v44 }
0x439a   :  { %6116 = vmatprep.subr.bf16.mxu0 %v6606_v0 }
0x439d   :  { %6118 = vmatpush3.bf16.msra.mxu0 %v7167_v47 }
0x439e   :  { %6119 = vmatprep.subr.bf16.mxu0 %v6606_v0 }
0x43a1   :  { %6121 = vmatpush3.bf16.msra.mxu0 %v7177_v53 }
0x43a2   :  { %6122 = vmatprep.subr.bf16.mxu0 %v6606_v0 }
0x43a5   :  { %6124 = vmatpush3.bf16.msra.mxu0 %v7187_v54 }
0x43a6   :  { %6140 = vmatprep.subr.bf16.mxu0 %v6606_v0 }
0x441d   :  { %v4162_v20 = vpop.xlane.xlu1 %4161 }
0x441e   :  { %6380 = vrcp.f32 %v4162_v20 }
0x4428   :  { %v6381_v15 = vpop.eup %6380 }
0x4429   :  { %v4168_v9 = vrot.slane %v6381_v15, %v6980_v17  ;;  %v4172_v40 = vrot.slane %v6381_v15, %v7130_v2 }
0x442b   :  { %v4175_v45 = vmul.f32 %v6377_v57, %v4168_v9  ;;  %v4176_v6 = vmul.f32 %v6379_v60, %v4172_v40 }
0x442d   :  { %4179 = vperm.xlu0 %6198, %v4175_v45  }
0x4431   :  { %4184 = vperm.xlu0 %6198, %v4176_v6  }
0x4467   :  { %v3977_v30 = vpop.f32.mrb[26].mxu0 }
0x4468   :  { %v7880_v33 = vadd.f32 %v7775_v14, %v3977_v30  ;;  %v5693_v36 = vpop.f32.mrb[27].mxu0 }
0x446a   :  { %v3987_v25 = vrot.slane %v7880_v33, 3  ;;  %v3988_v51 = vrot.slane %v7880_v33, 4 }
0x446c   :  { %v3991_v24 = vsel %vm3985_vm7, %v7669_v43, %v3987_v25  ;;  %v3992_v39 = vsel %vm3985_vm7, %v7672_v48, %v3988_v51 }
0x446d   :  { %v4326_v26 = vrot.slane %v3991_v24, 5  ;;  %v4327_v46 = vrot.slane %v3992_v39, 4  ;;  %v4205_v55 = vrot.slane %v3992_v39, 7 }
0x446f   :  { %v7887_v34 = vsel %vm183_vm1, %v4327_v46, %v4326_v26  ;;  %v4206_v36 = vsel %vm906_vm8, %v4205_v55, %v3991_v24 }
0x44ac   :  { %v4180_v28 = vpop.permute.xlu0 %4179 }
0x44ad   :  { %v4187_v57 = vmul.f32 %v7562_v62, %v4180_v28 }
0x44af   :  { %v4189_v60 = vsel %vm1351_vm12, %v4187_v57, 0.0 }
0x44b0   :  { %v4190_v10 = vrot.slane %v4189_v60, 4  ;;  %v4185_v23 = vpop.permute.xlu0 %4184 }
0x44b1   :  { %v4188_v18 = vmul.f32 %v7566_v22, %v4185_v23  ;;  %v4214_v22 = vrot.slane %v7816_v37, 3 }
0x44b2   :  { %v4191_v3 = vadd.f32 %v4190_v10, %v4189_v60 }
0x44b3   :  { %v4196_v50 = vsel %vm1351_vm12, %v4188_v18, 0.0 }
0x44b4   :  { %v4192_v52 = vrot.slane %v4191_v3, 2  ;;  %v4197_v19 = vrot.slane %v4196_v50, 4 }
0x44b6   :  { %v4193_v27 = vadd.f32 %v4192_v52, %v4191_v3  ;;  %v4198_v13 = vadd.f32 %v4197_v19, %v4196_v50 }
0x44b8   :  { %v4199_v38 = vrot.slane %v4198_v13, 2  ;;  %v4194_v20 = vrot.slane %v4193_v27, 1 }
0x44ba   :  { %v4200_v15 = vadd.f32 %v4199_v38, %v4198_v13  ;;  %v4195_v45 = vadd.f32 %v4194_v20, %v4193_v27 }
0x44bc   :  { %v4201_v9 = vrot.slane %v4200_v15, 1 }
0x44be   :  { %v4202_v40 = vadd.f32 %v4201_v9, %v4200_v15 }
0x44c0   :  { %v4210_v62 = vsel %vm906_vm8, %v4202_v40, %v4195_v45  ;;  %v7895_v6 = vsel %vm183_vm1, %v4202_v40, %v4195_v45  ;;  %vm4862_vm8 = vcmask 916480  }
0x44c1   :  { %4211 = vrot.lane.b32.xlu0 %v4210_v62, %s6615_s8 }
0x44c5   :  { %4215 = vrot.lane.b32.xlu0 %v4214_v22, %s6614_s5 }
0x4533   :  { %v4212_v30 = vpop.permute.xlu0 %4211 }
0x4534   :  { %v4218_v25 = vsel %vm186_vm2, %v4206_v36, %v4212_v30 }
0x4537   :  { %v4216_v51 = vpop.permute.xlu0 %4215 }
0x4538   :  { %v4219_v26 = vsel %vm188_vm3, %v4218_v25, %v4216_v51 }
0x4539   :  { %v4221_v46 = vrot.slane %v4219_v26, 5 }
0x453b   :  { %5726 = vmatmul.mubr.msk.f32.vlgmr.msra.gmra.mrb[28].mxu0 %vm1676_vm14, %v4221_v46 }
0x453c   :  { %6142 = vmatpush3.bf16.msra.mxu0 %v7037_v12  ;;  %5759 = vmatprep.mubr.msk.f32.mxu0 %vm6607_vm0, %v6608_v1 }
0x453d   :  { %6143 = vmatprep.subr.bf16.mxu0 %v6606_v0 }
0x4540   :  { %6145 = vmatpush3.bf16.msra.mxu0 %v7042_v16 }
0x4541   :  { %6161 = vmatprep.subr.bf16.mxu0 %v6606_v0 }
0x460e   :  { %v4290_v37 = vpop.f32.mrb[28].mxu0 }
0x460f   :  { %v4291_v24 = vadd.f32 %v7699_v41, %v4290_v37  ;;  %v5727_v39 = vpop.f32.mrb[29].mxu0 }
0x4611   :  { %6382 = vtanh.f32 %v4291_v24  ;;  %v4936_v57 = vmul.f32 -1.442695, %v4291_v24 }
0x4613   :  { %6384 = vpow2.f32 %v4936_v57 }
0x461b   :  { %v6383_v28 = vpop.eup %6382 }
0x461c   :  { %4303 = vrot.lane.b32.xlu0 %v6383_v28, %s6609_s24 }
0x461d   :  { %v6385_v12 = vpop.eup %6384 }
0x461e   :  { %v4297_v60 = vadd.f32 1.0, %v6385_v12 }
0x4620   :  { %6386 = vrcp.f32 %v4297_v60 }
0x462a   :  { %v6387_v10 = vpop.eup %6386 }
0x462b   :  { %v4301_v16 = vmul.f32 %v6387_v10, %v7812_v56 }
0x468e   :  { %v4304_v23 = vpop.permute.xlu0 %4303 }
0x468f   :  { %v4306_v18 = vmul.f32 %v6387_v10, %v4304_v23 }
0x4691   :  { %4308 = vrot.lane.b32.xlu0 %v4306_v18, %s6609_s24 }
0x4703   :  { %v4309_v3 = vpop.permute.xlu0 %4308 }
0x4704   :  { %v7914_v50 = vadd.f32 %v4309_v3, %v4301_v16 }
0x4706   :  { %6388 = vtanh.f32 %v7914_v50 }
0x4710   :  { %v6389_v52 = vpop.eup %6388 }
0x4711   :  { %4314 = vrot.lane.b32.xlu0 %v6389_v52, %s6609_s24 }
0x4783   :  { %v4315_v19 = vpop.permute.xlu0 %4314 }
0x4784   :  { %v7918_v27 = vmul.f32 %v6387_v10, %v4315_v19 }
0x4786   :  { %4319 = vrot.lane.b32.xlu1 %v7918_v27, %s6612_s25 }
0x47f8   :  { %v7922_v13 = vpop.permute.xlu1 %4319 }
0x47f9   :  { %5760 = vmatmul.mubr.msk.f32.vlgmr.msra.gmra.mrb[30].mxu0 %vm1351_vm12, %v7922_v13 }
0x47fa   :  { %6163 = vmatpush3.bf16.msra.mxu0 %v7264_v29  ;;  %5805 = vmatprep.mubr.msk.f32.mxu0 %vm6607_vm0, %v6608_v1 }
0x47fb   :  { %6164 = vmatprep.subr.bf16.mxu0 %v6606_v0 }
0x47fe   :  { %6166 = vmatpush3.bf16.msra.mxu0 %v7270_v31 }
0x47ff   :  { %6167 = vmatprep.subr.bf16.mxu0 %v6606_v0 }
0x4802   :  { %6169 = vmatpush3.bf16.msra.mxu0 %v7282_v35 }
0x4803   :  { %6170 = vmatprep.subr.bf16.mxu0 %v6606_v0 }
0x4806   :  { %6172 = vmatpush3.bf16.msra.mxu0 %v7299_v58 }
0x4807   :  { %6173 = vmatprep.subr.bf16.mxu0 %v6606_v0 }
0x480a   :  { %6175 = vmatpush3.bf16.msra.mxu0 %v7313_v11 }
0x48cc   :  { %v4487_v29 = vpop.f32.mrb[30].mxu0 }
0x48cd   :  { %v4498_v56 = vrot.slane %v4487_v29, %v6969_v7  ;;  %v5761_v38 = vpop.f32.mrb[31].mxu0 }
0x48cf   :  { %v4499_v20 = vcombine.high %v4498_v56, %v4498_v56  ;;  %v4506_v15 = vrot.slane %v4498_v56, %v6969_v7 }
0x48d1   :  { %v4513_v31 = vrot.slane %v4499_v20, %v6969_v7  ;;  %v4517_v9 = vrot.slane %v4506_v15, %v6980_v17 }
0x48d3   :  { %v4521_v35 = vrot.slane %v4513_v31, %v6980_v17  ;;  %v4524_v45 = vadd.f32 %v7620_v21, %v4517_v9 }
0x48d5   :  { %v4525_v58 = vadd.f32 %v7623_v49, %v4521_v35  ;;  %6390 = vtanh.f32 %v4524_v45  ;;  %v6417_v35 = vld [vmem:[#allocation2] sm:$0xff] }
0x48d7   :  { %6392 = vtanh.f32 %v4525_v58 }
0x48df   :  { %v6391_v11 = vpop.eup %6390 }
0x48e0   :  { %v4528_v40 = vmul.f32 %v7626_v63, %v6391_v11 }
0x48e1   :  { %v6393_v62 = vpop.eup %6392 }
0x48e2   :  { %v4530_v22 = vsel %vm1351_vm12, %v4528_v40, 0.0  ;;  %v4529_v55 = vmul.f32 %v7626_v63, %v6393_v62  ;;  %v6418_v62 = vld [vmem:[#allocation2 + $0x8] sm:$0xff] }
0x48e3   :  { %4531 = vadd.xlane.f32.xlu0 %v4530_v22 }
0x48e4   :  { %v4533_v7 = vsel %vm1351_vm12, %v4529_v55, 0.0 }
0x48e5   :  { %4534 = vadd.xlane.f32.xlu1 %v4533_v7 }
0x4970   :  { %v4532_v30 = vpop.xlane.xlu0 %4531 }
0x4971   :  { %v4541_v21 = vrot.slane %v4532_v30, %v7123_v61 }
0x4972   :  { %v4535_v36 = vpop.xlane.xlu1 %4534 }
0x4973   :  { %v4545_v49 = vrot.slane %v4535_v36, %v7123_v61 }
0x4975   :  { %v4546_v25 = vsel %vm183_vm1, %v4545_v49, %v4541_v21 }
0x4976   :  { %v4548_v51 = vsel %vm1576_vm13, %v4546_v25, -inf }
0x4977   :  { %4549 = vmax.xlane.f32.xlu0 %v4548_v51 }
0x4a04   :  { %v4550_v26 = vpop.xlane.xlu0 %4549 }
0x4a05   :  { %v4555_v46 = vrot.slane %v4550_v26, %v6980_v17  ;;  %v4559_v63 = vrot.slane %v4550_v26, %v7130_v2 }
0x4a07   :  { %v4562_v37 = vsub.f32 %v4532_v30, %v4555_v46  ;;  %v4563_v24 = vsub.f32 %v4535_v36, %v4559_v63 }
0x4a09   :  { %v4564_v39 = vmul.f32 1.442695, %v4562_v37  ;;  %v4566_v28 = vmul.f32 1.442695, %v4563_v24  ;;  %v4640_v24 = vrot.slane %v7918_v27, 2 }
0x4a0b   :  { %6394 = vpow2.f32 %v4564_v39 }
0x4a0c   :  { %6396 = vpow2.f32 %v4566_v28 }
0x4a15   :  { %v6395_v57 = vpop.eup %6394 }
0x4a16   :  { %v6397_v12 = vpop.eup %6396  ;;  %4571 = vperm.xlu0 %6198, %v6395_v57  }
0x4a17   :  { %4574 = vperm.xlu1 %6199, %v6397_v12  }
0x4a1a   :  { %4323 = vrot.lane.b32.xlu0 %v7895_v6, %s6609_s24 }
0x4a1e   :  { %4329 = vrot.lane.b32.xlu0 %v7887_v34, %s6612_s25 }
0x4a95   :  { %v4572_v60 = vpop.permute.xlu0 %4571 }
0x4a96   :  { %v4575_v10 = vpop.permute.xlu1 %4574  ;;  %v4579_v23 = vrot.slane %v4572_v60, %v7123_v61 }
0x4a97   :  { %v4583_v18 = vrot.slane %v4575_v10, %v7123_v61 }
0x4a99   :  { %v4324_v16 = vpop.permute.xlu0 %4323  ;;  %v4584_v3 = vsel %vm183_vm1, %v4583_v18, %v4579_v23 }
0x4a9a   :  { %v4586_v52 = vsel %vm1576_vm13, %v4584_v3, 0.0  ;;  %v4332_v19 = vsel %vm1351_vm12, %v7922_v13, %v4324_v16 }
0x4a9b   :  { %4587 = vadd.xlane.f32.xlu0 %v4586_v52 }
0x4a9d   :  { %v4330_v29 = vpop.permute.xlu0 %4329 }
0x4a9e   :  { %v4333_v6 = vsel %vm1785_vm15, %v4332_v19, %v4330_v29 }
0x4a9f   :  { %5749 = vmatmul.mubr.msk.f32.vlgmr.msra.gmra.mrb[28].mxu1 %vm1676_vm14, %v4333_v6 }
0x4aa0   :  { %6148 = vmatpush3.bf16.msra.mxu1 %v7151_v42  ;;  %5782 = vmatprep.mubr.msk.f32.mxu1 %vm6607_vm0, %v6608_v1 }
0x4aa1   :  { %6149 = vmatprep.subr.bf16.mxu1 %v6606_v0 }
0x4aa4   :  { %6151 = vmatpush3.bf16.msra.mxu1 %v7157_v44 }
0x4aa5   :  { %6152 = vmatprep.subr.bf16.mxu1 %v6606_v0 }
0x4aa8   :  { %6154 = vmatpush3.bf16.msra.mxu1 %v7167_v47  ;;  %v4410_v47 = vstv %s4409_s15 }
0x4aa9   :  { %6155 = vmatprep.subr.bf16.mxu1 %v6606_v0  ;;  %vm4411_vm0 = vcmp.eq.s32.totalorder %v4410_v47, 1 }
0x4aac   :  { %6157 = vmatpush3.bf16.msra.mxu1 %v7177_v53 }
0x4aad   :  { %6158 = vmatprep.subr.bf16.mxu1 %v6606_v0 }
0x4ab0   :  { %6160 = vmatpush3.bf16.msra.mxu1 %v7187_v54 }
0x4b28   :  { %v4588_v61 = vpop.xlane.xlu0 %4587 }
0x4b29   :  { %6398 = vrcp.f32 %v4588_v61 }
0x4b33   :  { %v6399_v42 = vpop.eup %6398 }
0x4b34   :  { %v4594_v1 = vrot.slane %v6399_v42, %v6980_v17  ;;  %v4598_v44 = vrot.slane %v6399_v42, %v7130_v2 }
0x4b36   :  { %v4601_v34 = vmul.f32 %v6395_v57, %v4594_v1  ;;  %v4602_v13 = vmul.f32 %v6397_v12, %v4598_v44 }
0x4b38   :  { %4605 = vperm.xlu1 %6199, %v4601_v34  }
0x4b3c   :  { %4610 = vperm.xlu1 %6199, %v4602_v13  }
0x4b72   :  { %v4403_v53 = vpop.f32.mrb[28].mxu1 }
0x4b73   :  { %v7980_v0 = vadd.f32 %v7775_v14, %v4403_v53  ;;  %v5750_v54 = vpop.f32.mrb[29].mxu1 }
0x4b75   :  { %v4413_v56 = vrot.slane %v7980_v0, 2  ;;  %v4414_v17 = vrot.slane %v7980_v0, 3 }
0x4b77   :  { %v4417_v38 = vsel %vm4411_vm0, %v7669_v43, %v4413_v56  ;;  %v4418_v2 = vsel %vm4411_vm0, %v7672_v48, %v4414_v17 }
0x4b78   :  { %v4752_v20 = vrot.slane %v4417_v38, 6  ;;  %v4753_v15 = vrot.slane %v4418_v2, 5  ;;  %v4631_v39 = vrot.slane %v4418_v2, 7 }
0x4b7a   :  { %v4754_v31 = vsel %vm183_vm1, %v4753_v15, %v4752_v20  ;;  %v4632_v57 = vsel %vm1051_vm9, %v4631_v39, %v4417_v38 }
0x4bb7   :  { %v4606_v9 = vpop.permute.xlu1 %4605 }
0x4bb8   :  { %v4613_v45 = vmul.f32 %v6417_v35, %v4606_v9 }
0x4bba   :  { %v4615_v58 = vsel %vm1351_vm12, %v4613_v45, 0.0 }
0x4bbb   :  { %v4616_v11 = vrot.slane %v4615_v58, 4  ;;  %v4611_v40 = vpop.permute.xlu1 %4610 }
0x4bbc   :  { %v4614_v22 = vmul.f32 %v6418_v62, %v4611_v40 }
0x4bbd   :  { %v4617_v55 = vadd.f32 %v4616_v11, %v4615_v58 }
0x4bbe   :  { %v4622_v7 = vsel %vm1351_vm12, %v4614_v22, 0.0 }
0x4bbf   :  { %v4618_v30 = vrot.slane %v4617_v55, 2  ;;  %v4623_v43 = vrot.slane %v4622_v7, 4 }
0x4bc1   :  { %v4619_v36 = vadd.f32 %v4618_v30, %v4617_v55  ;;  %v4624_v48 = vadd.f32 %v4623_v43, %v4622_v7 }
0x4bc3   :  { %v4625_v21 = vrot.slane %v4624_v48, 2  ;;  %v4620_v49 = vrot.slane %v4619_v36, 1 }
0x4bc5   :  { %v4626_v25 = vadd.f32 %v4625_v21, %v4624_v48  ;;  %v4621_v26 = vadd.f32 %v4620_v49, %v4619_v36 }
0x4bc7   :  { %v4627_v51 = vrot.slane %v4626_v25, 1 }
0x4bc9   :  { %v4628_v46 = vadd.f32 %v4627_v51, %v4626_v25 }
0x4bcb   :  { %v4636_v63 = vsel %vm1051_vm9, %v4628_v46, %v4621_v26  ;;  %v4748_v37 = vsel %vm183_vm1, %v4628_v46, %v4621_v26  ;;  %vm4860_vm1 = vcmask 785408  }
0x4bcc   :  { %4637 = vrot.lane.b32.xlu1 %v4636_v63, %s6615_s8 }
0x4bd0   :  { %4641 = vrot.lane.b32.xlu1 %v4640_v24, %s6614_s5 }
0x4c3e   :  { %v4638_v28 = vpop.permute.xlu1 %4637 }
0x4c3f   :  { %v4644_v12 = vsel %vm186_vm2, %v4632_v57, %v4638_v28 }
0x4c42   :  { %v4642_v60 = vpop.permute.xlu1 %4641 }
0x4c43   :  { %v4645_v10 = vsel %vm188_vm3, %v4644_v12, %v4642_v60 }
0x4c44   :  { %v4647_v23 = vrot.slane %v4645_v10, 6 }
0x4c46   :  { %5783 = vmatmul.mubr.msk.f32.vlgmr.msra.gmra.mrb[30].mxu1 %vm1676_vm14, %v4647_v23 }
0x4d19   :  { %v4716_v18 = vpop.f32.mrb[30].mxu1 }
0x4d1a   :  { %v4717_v16 = vadd.f32 %v7699_v41, %v4716_v18  ;;  %v5784_v3 = vpop.f32.mrb[31].mxu1 }
0x4d1c   :  { %6400 = vtanh.f32 %v4717_v16  ;;  %v4941_v52 = vmul.f32 -1.442695, %v4717_v16 }
0x4d1e   :  { %6402 = vpow2.f32 %v4941_v52 }
0x4d26   :  { %v6401_v27 = vpop.eup %6400 }
0x4d27   :  { %4729 = vrot.lane.b32.xlu1 %v6401_v27, %s6609_s24 }
0x4d28   :  { %v6403_v19 = vpop.eup %6402 }
0x4d29   :  { %v4723_v29 = vadd.f32 1.0, %v6403_v19 }
0x4d2b   :  { %6404 = vrcp.f32 %v4723_v29 }
0x4d35   :  { %v6405_v6 = vpop.eup %6404 }
0x4d36   :  { %v4727_v1 = vmul.f32 %v6405_v6, %v7914_v50 }
0x4d99   :  { %v4730_v61 = vpop.permute.xlu1 %4729 }
0x4d9a   :  { %v4732_v42 = vmul.f32 %v6405_v6, %v4730_v61 }
0x4d9c   :  { %4734 = vrot.lane.b32.xlu1 %v4732_v42, %s6609_s24 }
0x4e0e   :  { %v4735_v34 = vpop.permute.xlu1 %4734 }
0x4e0f   :  { %v4737_v44 = vadd.f32 %v4735_v34, %v4727_v1 }
0x4e11   :  { %6406 = vtanh.f32 %v4737_v44 }
0x4e1b   :  { %v6407_v41 = vpop.eup %6406 }
0x4e1c   :  { %4740 = vrot.lane.b32.xlu1 %v6407_v41, %s6609_s24 }
0x4e20   :  { %4749 = vrot.lane.b32.xlu1 %v4748_v37, %s6609_s24 }
0x4e24   :  { %4755 = vrot.lane.b32.xlu1 %v4754_v31, %s6612_s25 }
0x4e28   :  { %4833 = vrot.lane.b32.xlu1 %v7451_v32, %s6615_s8 }
0x4e2c   :  { %4836 = vrot.lane.b32.xlu1 %v7553_v8, %s6609_s24  ;;  %s6618_s24 = smov [#allocation17]  }
0x4e30   :  { %4839 = vrot.lane.b32.xlu1 %v7665_v59, %s6616_s21 }
0x4e34   :  { %4842 = vrot.lane.b32.xlu1 %v7778_v5, %s6612_s25 }
0x4e38   :  { %4848 = vrot.lane.b32.xlu1 %v7980_v0, %s6617_s7 }
0x4e8e   :  { %v4741_v50 = vpop.permute.xlu1 %4740 }
0x4e8f   :  { %v4743_v13 = vmul.f32 %v6405_v6, %v4741_v50 }
0x4e91   :  { %4745 = vrot.lane.b32.xlu0 %v4743_v13, %s6612_s25 }
0x4e92   :  { %v4750_v32 = vpop.permute.xlu1 %4749 }
0x4e95   :  { %4845 = vrot.lane.b32.xlu0 %v7880_v33, %s6610_s4  ;;  %s4871_s4 = sshll.u32 %s6618_s24, 4  ;;  %s4872_s4 = int_to_ptr.vmem [resolvable:$true] %s4871_s4 }
0x4e96   :  { %v4756_v53 = vpop.permute.xlu1 %4755  ;;  %s6563_s25 = scalar_lea.vmem %s4872_s4, 32  ;;  %p6568_p5 = scmp.lt.s32.totalorder %s4872_s4, %s4872_s4 }
0x4e97   :  { %p6564_p4 = scmp.ne.s32.totalorder %s4872_s4, %s6563_s25  ;;  %p6569_p6 = scmp.lt.s32.totalorder %s6563_s25, %s6563_s25 }
0x4e99   :  { %p6570_p7 = por %p6569_p6, %p6568_p5 }
0x4e9a   :  { %v4834_v56 = vpop.permute.xlu1 %4833 }
0x4e9b   :  { %v4855_v33 = vsel %vm186_vm2, %v7360_v4, %v4834_v56  ;;  %p6571_p8 = pnand %p6570_p7, %p6564_p4 }
0x4e9e   :  { %v4837_v17 = vpop.permute.xlu1 %4836 }
0x4e9f   :  { %v4856_v20 = vsel %vm1351_vm12, %v4855_v33, %v4837_v17 }
0x4ea2   :  { %v4840_v38 = vpop.permute.xlu1 %4839 }
0x4ea3   :  { %v4857_v31 = vsel %vm188_vm3, %v4856_v20, %v4840_v38 }
0x4ea6   :  { %v4843_v2 = vpop.permute.xlu1 %4842 }
0x4ea7   :  { %v4858_v9 = vsel %vm1785_vm15, %v4857_v31, %v4843_v2 }
0x4f03   :  { %v4746_v47 = vpop.permute.xlu0 %4745 }
0x4f04   :  { %v4758_v8 = vsel %vm1351_vm12, %v4746_v47, %v4750_v32 }
0x4f05   :  { %v4759_v59 = vsel %vm1785_vm15, %v4758_v8, %v4756_v53 }
0x4f06   :  { %5806 = vmatmul.mubr.msk.f32.vlgmr.msra.gmra.mrb[32].mxu0 %vm1676_vm14, %v4759_v59 }
0x4f07   :  { %v4846_v15 = vpop.permute.xlu0 %4845 }
0x4f08   :  { %v4859_v35 = vsel %vm1676_vm14, %v4858_v9, %v4846_v15 }
0x4fd9   :  { %v4829_v5 = vpop.f32.mrb[32].mxu0 }
0x4fda   :  { %v4830_v54 = vadd.f32 %v7775_v14, %v4829_v5  ;;  %v5807_v0 = vpop.f32.mrb[33].mxu0  ;;  %v4849_v14 = vpop.permute.xlu1 %4848 }
0x4fdb   :  { %v4861_v45 = vsel %vm4860_vm1, %v4859_v35, %v4849_v14 }
0x4fdc   :  { %4852 = vrot.lane.b32.xlu0 %v4830_v54, %s6614_s5 }
0x504e   :  { %v4853_v58 = vpop.permute.xlu0 %4852 }
0x504f   :  { %v4863_v11 = vsel %vm4862_vm8, %v4861_v45, %v4853_v58 }
0x5050   :  { %4864 = vst [vmem:[#allocation17] sm:$0x3] %v4863_v11 }
0x5051   :  { %6574 = shalt.err (!%p6571_p8)
}
0x5052   :  { %s6575_s22 = scalar_lea.hbm %s8051_s12, 32 }
0x5053   :  { %p6576_p9 = scmp.ne.s32.totalorder %s8051_s12, %s6575_s22  ;;  %p6579_p10 = scmp.lt.u32.totalorder %s6575_s22, %s8051_s12 }
0x5055   :  { %p6581_p11 = pnand %p6579_p10, %p6576_p9 }
0x5057   :  { %6584 = shalt.err (!%p6581_p11)
}
0x5058   :  { %4874 = dma.vmem_to_hbm [thread:$0]  %s4872_s4, 32, %s8051_s12, [#allocation8]  }
0x5059   :  { %6595 = dma.done.wait [#allocation8], 32  }
0x505a   :  { %6596 = vsyncadd [#allocation8], 4294967264 }
0x505b   :  { %4878 = vsyncpa [#allocation7], 1 }
0x505c   :  { %4879 = vsyncpa [#allocation10], 1 }
0x505d   :  { %4880 = vsyncpa [#allocation13], 1 }
0x505e   :  { %4881 = vsyncpa [#allocation16], 1 }
0x505f   :  { %4882 = vsyncpa [#allocation8], 1 }

</bundles_post_ra>
